<compile_context>
chip_gen: v7x
topology: tpu7x:2x2x1
jax: 0.10.0
libtpu: 0.0.40
codegen_flags: <defaults>
</compile_context>

<pallas_src>
import jax
import jax.numpy as jnp
from jax.experimental import pallas as pl
from jax.experimental.pallas import tpu as pltpu


def _offsetnet_kernel(x_ref,
                      w1_ref, b1_ref,
                      w2_ref, b2_ref,
                      w3_ref, b3_ref,
                      w4t_ref, b4_ref,
                      o_ref):
    x = x_ref[...]                      # (tm, in_ch) f32
    in_ch = x_ref.shape[1]
    out_ch = w4t_ref.shape[0]

    # ---- Layer 1: K = in_ch (tiny, e.g. 3) -> VPU broadcast FMAs, no MXU ----
    h = b1_ref[...] + x[:, 0:1] * w1_ref[0:1, :]
    for k in range(1, in_ch):           # static, unrolled at trace time
        h = h + x[:, k:k + 1] * w1_ref[k:k + 1, :]
    # fused ReLU + bf16 cast (activations carried in bf16 into the MXU layers)
    h = jnp.maximum(h, 0.0).astype(jnp.bfloat16)

    # ---- Layers 2-3: bf16 MXU matmuls, f32 accumulation, fused bias+ReLU(+cast) ----
    h = jnp.maximum(
        jnp.dot(h, w2_ref[...], preferred_element_type=jnp.float32) + b2_ref[...],
        0.0).astype(jnp.bfloat16)
    h = jnp.maximum(
        jnp.dot(h, w3_ref[...], preferred_element_type=jnp.float32) + b3_ref[...],
        0.0)                             # keep f32: layer 4 runs on the VPU below

    # ---- Layer 4: 256 -> out_ch (tiny) on VPU + lane reductions, NOT the MXU ----
    # out[:, j] = sum_k h[:, k] * w4t[j, k]  (+ b4[j])
    cols = [jnp.sum(h * w4t_ref[j:j + 1, :], axis=-1, keepdims=True)
            for j in range(out_ch)]      # static unroll, out_ch is tiny (e.g. 3)
    out = jnp.concatenate(cols, axis=-1) + b4_ref[...]
    o_ref[...] = out.astype(o_ref.dtype)


def _pick_tile_m(N):
    """Batch tile: big enough to amortize per-step overhead (cap 2048, safe on all
    generations with the explicit vmem limit), >= 2 grid steps when N allows
    (so both v7x TensorCores get work), multiple of 8 sublanes, and padding
    waste bounded to < 8 rows per step for medium N."""
    if N <= 128:
        return pl.next_power_of_2(max(N, 8))
    cap = 2048
    half = (pl.cdiv(N, 2) + 7) // 8 * 8    # split into >= 2 steps, 8-row aligned
    return min(cap, half)


def offsetnet_forward(x, params, *, tile_m=None):
    """x: (N, input_ch) f32. params: w1..w4 stored (in, out), b1..b4 stored (1, out)."""
    N, in_ch = x.shape
    W = params["w2"].shape[0]
    out_ch = params["w4"].shape[1]

    if tile_m is None:
        tile_m = _pick_tile_m(N)

    # Ragged batch: pad to a multiple of tile_m (padded rows compute garbage
    # that is sliced off below; pad is zeros so no NaN propagation).
    padded_n = pl.cdiv(N, tile_m) * tile_m
    if padded_n != N:
        x = jnp.pad(x, ((0, padded_n - N), (0, 0)))

    # Pre-cast MXU weights to bf16 once; layer-1 / layer-4 weights stay f32 (VPU path).
    w1 = params["w1"]
    w2 = params["w2"].astype(jnp.bfloat16)
    w3 = params["w3"].astype(jnp.bfloat16)
    w4t = params["w4"].T                 # (out_ch, W) so the kernel reads lane-dense rows
    b1, b2, b3, b4 = params["b1"], params["b2"], params["b3"], params["b4"]

    # Constant index_map -> weights/biases stay resident in VMEM across steps.
    full = lambda arr: pl.BlockSpec(arr.shape, lambda i: (0, 0))

    # Scheduling hint for XLA (layer FLOPs dominated by the two WxW matmuls).
    flops = 2 * padded_n * (in_ch * W + 2 * W * W + W * out_ch)
    weight_bytes = (in_ch * W + 2 * W * W + W * out_ch + 3 * W + out_ch) * 4
    bytes_accessed = padded_n * (in_ch + out_ch) * 4 + weight_bytes
    cost = pl.CostEstimate(flops=flops, transcendentals=0,
                           bytes_accessed=bytes_accessed)

    out = pl.pallas_call(
        _offsetnet_kernel,
        out_shape=jax.ShapeDtypeStruct((padded_n, out_ch), x.dtype),
        grid_spec=pltpu.PrefetchScalarGridSpec(
            num_scalar_prefetch=0,
            grid=(padded_n // tile_m,),
            in_specs=[
                pl.BlockSpec((tile_m, in_ch), lambda i: (i, 0)),  # x tile
                full(w1), full(b1),
                full(w2), full(b2),
                full(w3), full(b3),
                full(w4t), full(b4),
            ],
            out_specs=pl.BlockSpec((tile_m, out_ch), lambda i: (i, 0)),
        ),
        compiler_params=pltpu.CompilerParams(
            dimension_semantics=("parallel",),
            # ~15-17 MiB live at tile_m=2048; raise the scoped limit explicitly
            # (v5e default is 16 MiB) while staying well under v7x's 64 MiB.
            vmem_limit_bytes=48 * 1024 * 1024,
        ),
        cost_estimate=cost,
    )(x, w1, b1, w2, b2, w3, b3, w4t, b4)

    return out[:N] if padded_n != N else out


def init_offsetnet_params(key, input_ch=3, out_ch=3, W=256):
    """Deterministic init mimicking nn.Linear's U(-1/sqrt(fan_in), 1/sqrt(fan_in)).
    Weights are stored as (in, out) = PyTorch weight.T."""
    dims = [(input_ch, W), (W, W), (W, W), (W, out_ch)]
    params = {}
    for idx, (fan_in, fan_out) in enumerate(dims, start=1):
        key, kw, kb = jax.random.split(key, 3)
        bound = 1.0 / jnp.sqrt(float(fan_in))
        params[f"w{idx}"] = jax.random.uniform(
            kw, (fan_in, fan_out), jnp.float32, minval=-bound, maxval=bound)
        params[f"b{idx}"] = jax.random.uniform(
            kb, (1, fan_out), jnp.float32, minval=-bound, maxval=bound)
    return params


def offsetnet_reference(x, params):
    h = jax.nn.relu(x @ params["w1"] + params["b1"])
    h = jax.nn.relu(h @ params["w2"] + params["b2"])
    h = jax.nn.relu(h @ params["w3"] + params["b3"])
    return h @ params["w4"] + params["b4"]


if __name__ == "__main__":
    key = jax.random.PRNGKey(0)
    k_param, k_x = jax.random.split(key)

    input_ch, out_ch, W = 3, 3, 256    # matches the PyTorch module defaults
    N = 512                            # batch of points (e.g. flattened rays)

    params = init_offsetnet_params(k_param, input_ch=input_ch, out_ch=out_ch, W=W)
    x = jax.random.normal(k_x, (N, input_ch), jnp.float32)

    out = offsetnet_forward(x, params)           # tile_m -> 256, grid=(2,)
    out = jax.block_until_ready(out)

    ref = offsetnet_reference(x, params)         # f32 reference
    assert out.shape == (N, out_ch)
    # Layers 2-3 run in bf16 on the MXU (f32 accumulation); layers 1 and 4 are f32,
    # so use bf16-level tolerances against the f32 reference.
    assert jnp.allclose(out, ref, atol=2e-2, rtol=2e-2), "mismatch vs reference"

    # Also exercise a ragged batch (padding path) once.
    x2 = jax.random.normal(k_x, (260, input_ch), jnp.float32)
    out2 = jax.block_until_ready(offsetnet_forward(x2, params))
    ref2 = offsetnet_reference(x2, params)
    assert out2.shape == (260, out_ch)
    assert jnp.allclose(out2, ref2, atol=2e-2, rtol=2e-2), "ragged mismatch"

    print("KERNEL_OK")
</pallas_src>

<mosaic_0001>
module attributes {stable_mosaic.version = 11 : i64} {
  func.func @_offsetnet_kernel(%arg0: i32, %arg1: memref<256x3xf32, #tpu.memory_space<vmem>>, %arg2: memref<3x256xf32, #tpu.memory_space<vmem>>, %arg3: memref<1x256xf32, #tpu.memory_space<vmem>>, %arg4: memref<256x256xbf16, #tpu.memory_space<vmem>>, %arg5: memref<1x256xf32, #tpu.memory_space<vmem>>, %arg6: memref<256x256xbf16, #tpu.memory_space<vmem>>, %arg7: memref<1x256xf32, #tpu.memory_space<vmem>>, %arg8: memref<3x256xf32, #tpu.memory_space<vmem>>, %arg9: memref<1x3xf32, #tpu.memory_space<vmem>>, %arg10: memref<256x3xf32, #tpu.memory_space<vmem>>) attributes {dimension_semantics = [#tpu.dimension_semantics<parallel>], iteration_bounds = array<i64: 2>, scalar_prefetch = 0 : i64, scratch_operands = 0 : i64, tpu.core_type = #tpu.core_type<tc>, window_params = [{transform_indices = @transform_0, window_bounds = array<i64: 256, 3>}, {pipeline_mode = #tpu.pipeline_mode<synchronous>, transform_indices = @transform_1, window_bounds = array<i64: 3, 256>}, {pipeline_mode = #tpu.pipeline_mode<synchronous>, transform_indices = @transform_2, window_bounds = array<i64: 1, 256>}, {pipeline_mode = #tpu.pipeline_mode<synchronous>, transform_indices = @transform_3, window_bounds = array<i64: 256, 256>}, {pipeline_mode = #tpu.pipeline_mode<synchronous>, transform_indices = @transform_4, window_bounds = array<i64: 1, 256>}, {pipeline_mode = #tpu.pipeline_mode<synchronous>, transform_indices = @transform_5, window_bounds = array<i64: 256, 256>}, {pipeline_mode = #tpu.pipeline_mode<synchronous>, transform_indices = @transform_6, window_bounds = array<i64: 1, 256>}, {pipeline_mode = #tpu.pipeline_mode<synchronous>, transform_indices = @transform_7, window_bounds = array<i64: 3, 256>}, {pipeline_mode = #tpu.pipeline_mode<synchronous>, transform_indices = @transform_8, window_bounds = array<i64: 1, 3>}, {transform_indices = @transform_9, window_bounds = array<i64: 256, 3>}]} {
    %c0 = arith.constant 0 : index
    %c0_0 = arith.constant 0 : index
    %0 = vector.load %arg1[%c0, %c0_0] : memref<256x3xf32, #tpu.memory_space<vmem>>, vector<256x3xf32>
    %c0_1 = arith.constant 0 : index
    %c0_2 = arith.constant 0 : index
    %1 = vector.load %arg3[%c0_1, %c0_2] : memref<1x256xf32, #tpu.memory_space<vmem>>, vector<1x256xf32>
    %2 = vector.extract_strided_slice %0 {offsets = [0, 0], sizes = [256, 1], strides = [1, 1]} : vector<256x3xf32> to vector<256x1xf32>
    %c0_3 = arith.constant 0 : index
    %c0_4 = arith.constant 0 : index
    %3 = vector.load %arg2[%c0_3, %c0_4] : memref<3x256xf32, #tpu.memory_space<vmem>>, vector<1x256xf32>
    %4 = vector.broadcast %2 : vector<256x1xf32> to vector<256x256xf32>
    %5 = vector.broadcast %3 : vector<1x256xf32> to vector<256x256xf32>
    %6 = arith.mulf %4, %5 : vector<256x256xf32>
    %7 = vector.broadcast %1 : vector<1x256xf32> to vector<256x256xf32>
    %8 = arith.addf %7, %6 : vector<256x256xf32>
    %9 = vector.extract_strided_slice %0 {offsets = [0, 1], sizes = [256, 1], strides = [1, 1]} : vector<256x3xf32> to vector<256x1xf32>
    %c1 = arith.constant 1 : index
    %c0_5 = arith.constant 0 : index
    %10 = vector.load %arg2[%c1, %c0_5] : memref<3x256xf32, #tpu.memory_space<vmem>>, vector<1x256xf32>
    %11 = vector.broadcast %9 : vector<256x1xf32> to vector<256x256xf32>
    %12 = vector.broadcast %10 : vector<1x256xf32> to vector<256x256xf32>
    %13 = arith.mulf %11, %12 : vector<256x256xf32>
    %14 = arith.addf %8, %13 : vector<256x256xf32>
    %15 = vector.extract_strided_slice %0 {offsets = [0, 2], sizes = [256, 1], strides = [1, 1]} : vector<256x3xf32> to vector<256x1xf32>
    %c2 = arith.constant 2 : index
    %c0_6 = arith.constant 0 : index
    %16 = vector.load %arg2[%c2, %c0_6] : memref<3x256xf32, #tpu.memory_space<vmem>>, vector<1x256xf32>
    %17 = vector.broadcast %15 : vector<256x1xf32> to vector<256x256xf32>
    %18 = vector.broadcast %16 : vector<1x256xf32> to vector<256x256xf32>
    %19 = arith.mulf %17, %18 : vector<256x256xf32>
    %20 = arith.addf %14, %19 : vector<256x256xf32>
    %cst = arith.constant 0.000000e+00 : f32
    %21 = vector.broadcast %cst : f32 to vector<256x256xf32>
    %22 = arith.maximumf %20, %21 : vector<256x256xf32>
    %23 = arith.truncf %22 : vector<256x256xf32> to vector<256x256xbf16>
    %c0_7 = arith.constant 0 : index
    %c0_8 = arith.constant 0 : index
    %24 = vector.load %arg4[%c0_7, %c0_8] : memref<256x256xbf16, #tpu.memory_space<vmem>>, vector<256x256xbf16>
    %cst_9 = arith.constant dense<0.000000e+00> : vector<256x256xf32>
    %25 = tpu.matmul %23, %24, %cst_9 {dimension_numbers = #tpu.dot_dimension_numbers<[1], [0], [0], [1], [0, 0, 1, 1], [], []>} : vector<256x256xbf16>, vector<256x256xbf16>, vector<256x256xf32> -> vector<256x256xf32>
    %c0_10 = arith.constant 0 : index
    %c0_11 = arith.constant 0 : index
    %26 = vector.load %arg5[%c0_10, %c0_11] : memref<1x256xf32, #tpu.memory_space<vmem>>, vector<1x256xf32>
    %27 = vector.broadcast %26 : vector<1x256xf32> to vector<256x256xf32>
    %28 = arith.addf %25, %27 : vector<256x256xf32>
    %cst_12 = arith.constant 0.000000e+00 : f32
    %29 = vector.broadcast %cst_12 : f32 to vector<256x256xf32>
    %30 = arith.maximumf %28, %29 : vector<256x256xf32>
    %31 = arith.truncf %30 : vector<256x256xf32> to vector<256x256xbf16>
    %c0_13 = arith.constant 0 : index
    %c0_14 = arith.constant 0 : index
    %32 = vector.load %arg6[%c0_13, %c0_14] : memref<256x256xbf16, #tpu.memory_space<vmem>>, vector<256x256xbf16>
    %cst_15 = arith.constant dense<0.000000e+00> : vector<256x256xf32>
    %33 = tpu.matmul %31, %32, %cst_15 {dimension_numbers = #tpu.dot_dimension_numbers<[1], [0], [0], [1], [0, 0, 1, 1], [], []>} : vector<256x256xbf16>, vector<256x256xbf16>, vector<256x256xf32> -> vector<256x256xf32>
    %c0_16 = arith.constant 0 : index
    %c0_17 = arith.constant 0 : index
    %34 = vector.load %arg7[%c0_16, %c0_17] : memref<1x256xf32, #tpu.memory_space<vmem>>, vector<1x256xf32>
    %35 = vector.broadcast %34 : vector<1x256xf32> to vector<256x256xf32>
    %36 = arith.addf %33, %35 : vector<256x256xf32>
    %cst_18 = arith.constant 0.000000e+00 : f32
    %37 = vector.broadcast %cst_18 : f32 to vector<256x256xf32>
    %38 = arith.maximumf %36, %37 : vector<256x256xf32>
    %c0_19 = arith.constant 0 : index
    %c0_20 = arith.constant 0 : index
    %39 = vector.load %arg8[%c0_19, %c0_20] : memref<3x256xf32, #tpu.memory_space<vmem>>, vector<1x256xf32>
    %40 = vector.broadcast %39 : vector<1x256xf32> to vector<256x256xf32>
    %41 = arith.mulf %38, %40 : vector<256x256xf32>
    %cst_21 = arith.constant dense<0.000000e+00> : vector<256xf32>
    %42 = vector.multi_reduction <add>, %41, %cst_21 [1] : vector<256x256xf32> to vector<256xf32>
    %43 = vector.shape_cast %42 : vector<256xf32> to vector<256x1xf32>
    %c1_22 = arith.constant 1 : index
    %c0_23 = arith.constant 0 : index
    %44 = vector.load %arg8[%c1_22, %c0_23] : memref<3x256xf32, #tpu.memory_space<vmem>>, vector<1x256xf32>
    %45 = vector.broadcast %44 : vector<1x256xf32> to vector<256x256xf32>
    %46 = arith.mulf %38, %45 : vector<256x256xf32>
    %cst_24 = arith.constant dense<0.000000e+00> : vector<256xf32>
    %47 = vector.multi_reduction <add>, %46, %cst_24 [1] : vector<256x256xf32> to vector<256xf32>
    %48 = vector.shape_cast %47 : vector<256xf32> to vector<256x1xf32>
    %c2_25 = arith.constant 2 : index
    %c0_26 = arith.constant 0 : index
    %49 = vector.load %arg8[%c2_25, %c0_26] : memref<3x256xf32, #tpu.memory_space<vmem>>, vector<1x256xf32>
    %50 = vector.broadcast %49 : vector<1x256xf32> to vector<256x256xf32>
    %51 = arith.mulf %38, %50 : vector<256x256xf32>
    %cst_27 = arith.constant dense<0.000000e+00> : vector<256xf32>
    %52 = vector.multi_reduction <add>, %51, %cst_27 [1] : vector<256x256xf32> to vector<256xf32>
    %53 = vector.shape_cast %52 : vector<256xf32> to vector<256x1xf32>
    %54 = tpu.concatenate %43, %48, %53 in 1 : vector<256x1xf32>, vector<256x1xf32>, vector<256x1xf32> -> vector<256x3xf32>
    %c0_28 = arith.constant 0 : index
    %c0_29 = arith.constant 0 : index
    %55 = vector.load %arg9[%c0_28, %c0_29] : memref<1x3xf32, #tpu.memory_space<vmem>>, vector<1x3xf32>
    %56 = vector.broadcast %55 : vector<1x3xf32> to vector<256x3xf32>
    %57 = arith.addf %54, %56 : vector<256x3xf32>
    %c0_30 = arith.constant 0 : index
    %c0_31 = arith.constant 0 : index
    %58 = vector.load %arg10[%c0_30, %c0_31] : memref<256x3xf32, #tpu.memory_space<vmem>>, vector<256x3xf32>
    tpu.vector_store %arg10[%c0_30, %c0_31], %57 {strides = array<i32>} : memref<256x3xf32, #tpu.memory_space<vmem>>, vector<256x3xf32>,
    return
  }
  func.func @transform_0(%arg0: i32) -> (i32, i32) {
    %c0_i32 = arith.constant 0 : i32
    %c0_i32_0 = arith.constant 0 : i32
    return %arg0, %c0_i32 : i32, i32
  }
  func.func @transform_1(%arg0: i32) -> (i32, i32) {
    %c0_i32 = arith.constant 0 : i32
    %c0_i32_0 = arith.constant 0 : i32
    %c0_i32_1 = arith.constant 0 : i32
    return %c0_i32, %c0_i32_0 : i32, i32
  }
  func.func @transform_2(%arg0: i32) -> (i32, i32) {
    %c0_i32 = arith.constant 0 : i32
    %c0_i32_0 = arith.constant 0 : i32
    %c0_i32_1 = arith.constant 0 : i32
    return %c0_i32, %c0_i32_0 : i32, i32
  }
  func.func @transform_3(%arg0: i32) -> (i32, i32) {
    %c0_i32 = arith.constant 0 : i32
    %c0_i32_0 = arith.constant 0 : i32
    %c0_i32_1 = arith.constant 0 : i32
    return %c0_i32, %c0_i32_0 : i32, i32
  }
  func.func @transform_4(%arg0: i32) -> (i32, i32) {
    %c0_i32 = arith.constant 0 : i32
    %c0_i32_0 = arith.constant 0 : i32
    %c0_i32_1 = arith.constant 0 : i32
    return %c0_i32, %c0_i32_0 : i32, i32
  }
  func.func @transform_5(%arg0: i32) -> (i32, i32) {
    %c0_i32 = arith.constant 0 : i32
    %c0_i32_0 = arith.constant 0 : i32
    %c0_i32_1 = arith.constant 0 : i32
    return %c0_i32, %c0_i32_0 : i32, i32
  }
  func.func @transform_6(%arg0: i32) -> (i32, i32) {
    %c0_i32 = arith.constant 0 : i32
    %c0_i32_0 = arith.constant 0 : i32
    %c0_i32_1 = arith.constant 0 : i32
    return %c0_i32, %c0_i32_0 : i32, i32
  }
  func.func @transform_7(%arg0: i32) -> (i32, i32) {
    %c0_i32 = arith.constant 0 : i32
    %c0_i32_0 = arith.constant 0 : i32
    %c0_i32_1 = arith.constant 0 : i32
    return %c0_i32, %c0_i32_0 : i32, i32
  }
  func.func @transform_8(%arg0: i32) -> (i32, i32) {
    %c0_i32 = arith.constant 0 : i32
    %c0_i32_0 = arith.constant 0 : i32
    %c0_i32_1 = arith.constant 0 : i32
    return %c0_i32, %c0_i32_0 : i32, i32
  }
  func.func @transform_9(%arg0: i32) -> (i32, i32) {
    %c0_i32 = arith.constant 0 : i32
    %c0_i32_0 = arith.constant 0 : i32
    return %arg0, %c0_i32 : i32, i32
  }
}

</mosaic_0001>

<bundles_post_ra>
// kernel: tpu_custom_call.1
= control target key start
LH: loop header
LB: loop body
LE: loop exit
PB: predicated region body
PF: predicated region fallthrough
CT: control target
= control target key end

     0   :  { %s3282_s30 = smov 0   ;;  %s4567_s0 = inlined_call_operand.vmem [shape: f32[512,3], index: 0, kind: input, shape index: {}]   ;;  %s4568_s1 = inlined_call_operand.vmem [shape: f32[3,256], index: 1, kind: input, shape index: {}]   ;;  %s4569_s2 = inlined_call_operand.vmem [shape: f32[1,256], index: 2, kind: input, shape index: {}]   ;;  %s4570_s3 = inlined_call_operand.vmem [shape: bf16[256,256], index: 3, kind: input, shape index: {}]   ;;  %s4571_s4 = inlined_call_operand.vmem [shape: f32[1,256], index: 4, kind: input, shape index: {}]   ;;  %s4572_s5 = inlined_call_operand.vmem [shape: bf16[256,256], index: 5, kind: input, shape index: {}]   ;;  %s4573_s6 = inlined_call_operand.vmem [shape: f32[1,256], index: 6, kind: input, shape index: {}]   ;;  %s4574_s7 = inlined_call_operand.vmem [shape: f32[3,256], index: 7, kind: input, shape index: {}]   ;;  %s4575_s8 = inlined_call_operand.vmem [shape: f32[1,3], index: 8, kind: input, shape index: {}]   ;;  %s4576_s9 = inlined_call_operand.vmem [shape: f32[512,3], index: 9, kind: output, shape index: {}]  }
   0x1 LB: > { %s2980_s10 = sadd.s32 4294967295, %s3227_s30   ;;  %p2984_p0 = scmp.ge.s32.totalorder %s3227_s30, 1  ;;  %s3227_s30 = sphi %s3282_s30, %s19_s30  }
   0x2   : > { %p288_p1 = scmp.lt.s32.totalorder %s3227_s30, 3 }
   0x4   : > { %p289_p2 = pnand %p2984_p0, %p288_p1 }
   0x5   : > { %s2985_s11 = sshll.u32 (!%p289_p2), %s2980_s10, 5  ;;  %v3229_v0 = vmov (!%p289_p2), 2   ;;  %v3230_v1 = vmov (!%p289_p2), 1   ;;  %v3125_v2 = vld [vmem:[%s4570_s3 + $0x4] ss:$8 sps:$4 sm:$0xff] (!%p289_p2)   ;;  %v3231_v17 = vmov (!%p289_p2), 0  }
   0x6   : > { %292 = sbr.rel (%p289_p2) target bundleno = 1047 (0x417), region = 56  ;;  %3072 = vset.pattern.permute.xlu0 (!%p289_p2), %v3229_v0  ;;  %3071 = vset.pattern.permute.xlu1 (!%p289_p2), %v3230_v1  ;;  %p325_p3 = scmp.lt.s32.totalorder (!%p289_p2), %s2985_s11, 63  ;;  %v3127_v3 = vld [vmem:[%s4570_s3] ss:$8 sps:$4 sm:$0xff] (!%p289_p2)   ;;  %v3128_v4 = vld [vmem:[%s4570_s3 + $0x14] ss:$8 sps:$4 sm:$0xff] (!%p289_p2)  }
   0x7   : > { %1518 = vmatprep.subr.bf16.mxu0 (!%p289_p2), %v3125_v2  ;;  %v3130_v5 = vld [vmem:[%s4570_s3 + $0x10] ss:$8 sps:$4 sm:$0xff] (!%p289_p2)   ;;  %v3131_v6 = vld [vmem:[%s4570_s3 + $0x24] ss:$8 sps:$4 sm:$0xff] (!%p289_p2)   ;;  %v3133_v10 = vld [vmem:[%s4570_s3 + $0x20] ss:$8 sps:$4 sm:$0xff] (!%p289_p2)   ;;  %v531_v2 = vlaneseq (!%p289_p2) }
   0x8   : > { %1519 = vmatpush1.bf16.msra.mxu0 (!%p289_p2), %v3127_v3  ;;  %v3134_v11 = vld [vmem:[%s4570_s3 + $0x34] ss:$8 sps:$4 sm:$0xff] (!%p289_p2)   ;;  %v3136_v12 = vld [vmem:[%s4570_s3 + $0x30] ss:$8 sps:$4 sm:$0xff] (!%p289_p2)   ;;  %v3137_v14 = vld [vmem:[%s4570_s3 + $0x44] ss:$8 sps:$4 sm:$0xff] (!%p289_p2)  }
   0x9   : > { %1520 = vmatprep.subr.bf16.mxu0 (!%p289_p2), %v3128_v4  ;;  %v3139_v15 = vld [vmem:[%s4570_s3 + $0x40] ss:$8 sps:$4 sm:$0xff] (!%p289_p2)   ;;  %v3140_v16 = vld [vmem:[%s4570_s3 + $0x54] ss:$8 sps:$4 sm:$0xff] (!%p289_p2)   ;;  %v3142_v18 = vld [vmem:[%s4570_s3 + $0x50] ss:$8 sps:$4 sm:$0xff] (!%p289_p2)  }
   0xa   : > { %v3143_v19 = vld [vmem:[%s4570_s3 + $0x64] ss:$8 sps:$4 sm:$0xff] (!%p289_p2)   ;;  %v3145_v21 = vld [vmem:[%s4570_s3 + $0x60] ss:$8 sps:$4 sm:$0xff] (!%p289_p2)   ;;  %v3146_v22 = vld [vmem:[%s4570_s3 + $0x74] ss:$8 sps:$4 sm:$0xff] (!%p289_p2)  }
   0xb   : > { %v3148_v24 = vld [vmem:[%s4570_s3 + $0x70] ss:$8 sps:$4 sm:$0xff] (!%p289_p2)   ;;  %v3149_v25 = vld [vmem:[%s4570_s3 + $0x84] ss:$8 sps:$4 sm:$0xff] (!%p289_p2)   ;;  %v3151_v27 = vld [vmem:[%s4570_s3 + $0x80] ss:$8 sps:$4 sm:$0xff] (!%p289_p2)  }
   0xc   : > { %1521 = vmatpush1.bf16.msra.mxu0 (!%p289_p2), %v3130_v5  ;;  %v3152_v28 = vld [vmem:[%s4570_s3 + $0x94] ss:$8 sps:$4 sm:$0xff] (!%p289_p2)   ;;  %v3154_v30 = vld [vmem:[%s4570_s3 + $0x90] ss:$8 sps:$4 sm:$0xff] (!%p289_p2)   ;;  %v3155_v31 = vld [vmem:[%s4570_s3 + $0xa4] ss:$8 sps:$4 sm:$0xff] (!%p289_p2)  }
   0xd   : > { %s4578_s11 = smov (!%p325_p3, %s2985_s11), 63  ;;  %1522 = vmatprep.subr.bf16.mxu0 %v3131_v6  ;;  %v3157_v33 = vld [vmem:[%s4570_s3 + $0xa0] ss:$8 sps:$4 sm:$0xff]   ;;  %v3158_v34 = vld [vmem:[%s4570_s3 + $0xb4] ss:$8 sps:$4 sm:$0xff]   ;;  %v532_v5 = vshrl.u32 %v531_v2, 7 }
   0xe   : > { %s2986_s18 = sshll.u32 %s4578_s11, 3  ;;  %v3160_v36 = vld [vmem:[%s4570_s3 + $0xb0] ss:$8 sps:$4 sm:$0xff]   ;;  %v3161_v37 = vld [vmem:[%s4570_s3 + $0xc4] ss:$8 sps:$4 sm:$0xff]   ;;  %vm2786_vm0 = vcmask 7168  }
   0xf   : > { %s3312_s23 = scalar_lea.vmem %s4567_s0, %s2986_s18  ;;  %v3163_v39 = vld [vmem:[%s4570_s3 + $0xc0] ss:$8 sps:$4 sm:$0xff]   ;;  %v3164_v40 = vld [vmem:[%s4570_s3 + $0xd4] ss:$8 sps:$4 sm:$0xff]   ;;  %v3166_v41 = vld [vmem:[%s4570_s3 + $0xd0] ss:$8 sps:$4 sm:$0xff]   ;;  %s4291_s25 = scalar_lea.vmem %s4576_s9, %s2986_s18 }
  0x10   : > { %v336_v7 = vld [vmem:[%s3312_s23] sm:$0xff]  ;;  %v338_v8 = vld [vmem:[%s3312_s23 + $0x10] sm:$0xff]  ;;  %v337_v9 = vld [vmem:[%s3312_s23 + $0x8] sm:$0xff]  ;;  %1523 = vmatpush1.bf16.msra.mxu0 %v3133_v10  ;;  %v3522_v10 = vsub.s32 1, %v532_v5  ;;  %vm2819_vm1 = vcmask 15360   ;;  %vm2891_vm2 = vcmask 23552  }
  0x11   : > { %952 = vperm.xlu0 %3072, %v336_v7   ;;  %683 = vperm.xlu1 %3071, %v336_v7   ;;  %v340_v13 = vld [vmem:[%s3312_s23 + $0x20] sm:$0xff]  ;;  %v339_v20 = vld [vmem:[%s3312_s23 + $0x18] sm:$0xff]  ;;  %v341_v23 = vld [vmem:[%s3312_s23 + $0x28] sm:$0xff] }
  0x12   : > { %1524 = vmatprep.subr.bf16.mxu0 %v3134_v11  ;;  %v3364_v26 = vld [vmem:[%s3312_s23 + $0x38] sm:$0xff]  ;;  %v3374_v29 = vld [vmem:[%s3312_s23 + $0x48] sm:$0xff]  ;;  %v342_v43 = vld [vmem:[%s3312_s23 + $0x30] sm:$0xff] }
  0x13   : > { %v3386_v32 = vld [vmem:[%s3312_s23 + $0x58] sm:$0xff]  ;;  %v3397_v35 = vld [vmem:[%s3312_s23 + $0x68] sm:$0xff]  ;;  %v344_v46 = vld [vmem:[%s3312_s23 + $0x40] sm:$0xff] }
  0x14   : > { %1525 = vmatpush1.bf16.msra.mxu0 %v3136_v12  ;;  %v3407_v38 = vld [vmem:[%s3312_s23 + $0x78] sm:$0xff]  ;;  %v3167_v42 = vld [vmem:[%s4570_s3 + $0xe4] ss:$8 sps:$4 sm:$0xff]   ;;  %v3169_v44 = vld [vmem:[%s4570_s3 + $0xe0] ss:$8 sps:$4 sm:$0xff]  }
  0x15   : > { %960 = vperm.xlu0 %3072, %v338_v8   ;;  %687 = vperm.xlu1 %3071, %v337_v9   ;;  %v3170_v45 = vld [vmem:[%s4570_s3 + $0xf4] ss:$8 sps:$4 sm:$0xff]   ;;  %v3172_v47 = vld [vmem:[%s4570_s3 + $0xf0] ss:$8 sps:$4 sm:$0xff]   ;;  %v348_v49 = vld [vmem:[%s3312_s23 + $0x60] sm:$0xff] }
  0x16   : > { %1526 = vmatprep.subr.bf16.mxu0 %v3137_v14  ;;  %v346_v48 = vld [vmem:[%s3312_s23 + $0x50] sm:$0xff]  ;;  %v3444_v51 = vld [vmem:[%s3312_s23 + $0x80] sm:$0xff]  ;;  %v3459_v54 = vld [vmem:[%s3312_s23 + $0x88] sm:$0xff] }
  0x17   : > { %v350_v50 = vld [vmem:[%s3312_s23 + $0x70] sm:$0xff]  ;;  %v3454_v53 = vld [vmem:[%s3312_s23 + $0xa0] sm:$0xff]  ;;  %v3465_v55 = vld [vmem:[%s3312_s23 + $0x98] sm:$0xff] }
  0x18   : > { %1527 = vmatpush1.bf16.msra.mxu0 %v3139_v15  ;;  %v3449_v52 = vld [vmem:[%s3312_s23 + $0x90] sm:$0xff]  ;;  %v3470_v56 = vld [vmem:[%s3312_s23 + $0xa8] sm:$0xff]  ;;  %v3475_v57 = vld [vmem:[%s3312_s23 + $0xb8] sm:$0xff] }
  0x19   : > { %968 = vperm.xlu0 %3072, %v340_v13   ;;  %3073 = vset.pattern.permute.xlu1 %v3229_v0  ;;  %v3480_v58 = vld [vmem:[%s3312_s23 + $0xc8] sm:$0xff]  ;;  %v3485_v59 = vld [vmem:[%s3312_s23 + $0xd8] sm:$0xff]  ;;  %v3491_v60 = vld [vmem:[%s3312_s23 + $0xb0] sm:$0xff] }
  0x1a   : > { %956 = vperm.xlu1 %3073, %v337_v9   ;;  %1528 = vmatprep.subr.bf16.mxu0 %v3140_v16  ;;  %v3497_v61 = vld [vmem:[%s3312_s23 + $0xc0] sm:$0xff]  ;;  %v3502_v62 = vld [vmem:[%s3312_s23 + $0xd0] sm:$0xff] }
  0x1b   : > { %v3507_v63 = vld [vmem:[%s3312_s23 + $0xe0] sm:$0xff] }
  0x1c   : > { %1529 = vmatpush1.bf16.msra.mxu0 %v3142_v18  ;;  %v2989_v12 = vld [vmem:[%s4568_s1 + $0x1] ss:$4 sm:$0x3] }
  0x1d   : > { %3079 = vset.pattern.permute.xlu0 %v3231_v17  ;;  %1530 = vmatprep.subr.bf16.mxu0 %v3143_v19  ;;  %v368_v14 = vld [vmem:[%s4569_s2] sm:$0x3]  ;;  %v2990_v19 = vld [vmem:[%s4568_s1 + $0x2] ss:$4 sm:$0x3] }
  0x1e   : > { %372 = vperm.xlu0 %3079, %v336_v7   ;;  %3074 = vset.pattern.permute.xlu1 %v3231_v17 }
  0x1f   : > { %382 = vperm.xlu1 %3074, %v338_v8  }
  0x20   : > { %1531 = vmatpush1.bf16.msra.mxu0 %v3145_v21  ;;  %v3549_v21 = vrot.slane %v368_v14, %v3522_v10 }
  0x21   : > { %1532 = vmatprep.subr.bf16.mxu0 %v3146_v22  ;;  %v3552_v22 = vld [vmem:[%s3312_s23 + $0xe8] sm:$0xff] }
  0x22   : > { %377 = vperm.xlu0 %3079, %v337_v9   ;;  %v3520_v9 = vsub.s32 0, %v532_v5 }
  0x23   : > { %3075 = vset.pattern.permute.xlu1 %v3230_v1 }
  0x24   : > { %691 = vperm.xlu1 %3075, %v338_v8   ;;  %1533 = vmatpush1.bf16.msra.mxu0 %v3148_v24  ;;  %v369_v8 = vld [vmem:[%s4568_s1] ss:$4 sm:$0x3]  ;;  %v3540_v18 = vrot.slane %v2989_v12, %v3520_v9 }
  0x25   : > { %1534 = vmatprep.subr.bf16.mxu0 %v3149_v25  ;;  %v3534_v15 = vrot.slane %v369_v8, %v3520_v9  ;;  %v3537_v16 = vrot.slane %v369_v8, %v3522_v10 }
  0x26   : > { %387 = vperm.xlu0 %3079, %v339_v20  }
  0x28   : > { %695 = vperm.xlu1 %3075, %v339_v20   ;;  %1535 = vmatpush1.bf16.msra.mxu0 %v3151_v27 }
  0x29   : > { %1536 = vmatprep.subr.bf16.mxu0 %v3152_v28  ;;  %v3562_v28 = vrot.slane %v2990_v19, %v3520_v9 }
  0x2a   : > { %397 = vperm.xlu0 %3079, %v341_v23  }
  0x2c   : > { %3076 = vset.pattern.permute.xlu1 %v3229_v0  ;;  %1537 = vmatpush1.bf16.msra.mxu0 %v3154_v30 }
  0x2d   : > { %964 = vperm.xlu1 %3076, %v339_v20   ;;  %1538 = vmatprep.subr.bf16.mxu0 %v3155_v31  ;;  %v3546_v20 = vrot.slane %v368_v14, %v3520_v9 }
  0x2e   : > { %407 = vperm.xlu0 %3079, %v3364_v26  }
  0x30   : > { %1539 = vmatpush1.bf16.msra.mxu0 %v3157_v33  ;;  %v3570_v33 = vrot.slane %v2990_v19, %v3522_v10 }
  0x31   : > { %3077 = vset.pattern.permute.xlu1 %v3231_v17  ;;  %1540 = vmatprep.subr.bf16.mxu0 %v3158_v34 }
  0x32   : > { %392 = vperm.xlu1 %3077, %v340_v13   ;;  %417 = vperm.xlu0 %3079, %v3374_v29  }
  0x34   : > { %1541 = vmatpush1.bf16.msra.mxu0 %v3160_v36 }
  0x35   : > { %1542 = vmatprep.subr.bf16.mxu0 %v3161_v37 }
  0x36   : > { %3078 = vset.pattern.permute.xlu1 %v3230_v1  ;;  %427 = vperm.xlu0 %3079, %v3386_v32  }
  0x37   : > { %699 = vperm.xlu1 %3078, %v340_v13  }
  0x38   : > { %1543 = vmatpush1.bf16.msra.mxu0 %v3163_v39 }
  0x39   : > { %1544 = vmatprep.subr.bf16.mxu0 %v3164_v40 }
  0x3a   : > { %437 = vperm.xlu0 %3079, %v3397_v35  }
  0x3b   : > { %703 = vperm.xlu1 %3078, %v341_v23  }
  0x3c   : > { %1545 = vmatpush1.bf16.msra.mxu0 %v3166_v41 }
  0x3d   : > { %1546 = vmatprep.subr.bf16.mxu0 %v3167_v42 }
  0x3e   : > { %447 = vperm.xlu0 %3079, %v3407_v38  }
  0x3f   : > { %3080 = vset.pattern.permute.xlu1 %v3229_v0 }
  0x40   : > { %972 = vperm.xlu1 %3080, %v341_v23   ;;  %1547 = vmatpush1.bf16.msra.mxu0 %v3169_v44  ;;  %v3555_v23 = vrot.slane %v2989_v12, %v3522_v10  ;;  %v3592_v12 = vld [vmem:[%s3312_s23 + $0xf8] sm:$0xff] }
  0x41   : > { %1548 = vmatprep.subr.bf16.mxu0 %v3170_v45 }
  0x42   : > { %3094 = vset.pattern.permute.xlu0 %v3229_v0 }
  0x43   : > { %976 = vperm.xlu0 %3094, %v342_v43  }
  0x44   : > { %3081 = vset.pattern.permute.xlu1 %v3231_v17  ;;  %1549 = vmatpush1.bf16.msra.mxu0 %v3172_v47 }
  0x45   : > { %402 = vperm.xlu1 %3081, %v342_v43  }
  0x47   : > { %984 = vperm.xlu0 %3094, %v344_v46  }
  0x49   : > { %3082 = vset.pattern.permute.xlu1 %v3230_v1 }
  0x4a   : > { %707 = vperm.xlu1 %3082, %v342_v43  }
  0x4b   : > { %992 = vperm.xlu0 %3094, %v346_v48  }
  0x4e   : > { %711 = vperm.xlu1 %3082, %v3364_v26  }
  0x4f   : > { %1000 = vperm.xlu0 %3094, %v348_v49  }
  0x52   : > { %3083 = vset.pattern.permute.xlu1 %v3229_v0 }
  0x53   : > { %980 = vperm.xlu1 %3083, %v3364_v26   ;;  %1008 = vperm.xlu0 %3094, %v350_v50  }
  0x57   : > { %3084 = vset.pattern.permute.xlu1 %v3231_v17  ;;  %1016 = vperm.xlu0 %3094, %v3444_v51  }
  0x58   : > { %412 = vperm.xlu1 %3084, %v344_v46  }
  0x5b   : > { %1024 = vperm.xlu0 %3094, %v3449_v52  }
  0x5c   : > { %3085 = vset.pattern.permute.xlu1 %v3230_v1 }
  0x5d   : > { %715 = vperm.xlu1 %3085, %v344_v46  }
  0x5f   : > { %1032 = vperm.xlu0 %3094, %v3454_v53  }
  0x61   : > { %719 = vperm.xlu1 %3085, %v3374_v29  }
  0x63   : > { %3105 = vset.pattern.permute.xlu0 %v3231_v17 }
  0x64   : > { %457 = vperm.xlu0 %3105, %v3459_v54  }
  0x65   : > { %3086 = vset.pattern.permute.xlu1 %v3229_v0 }
  0x66   : > { %988 = vperm.xlu1 %3086, %v3374_v29  }
  0x68   : > { %467 = vperm.xlu0 %3105, %v3465_v55  }
  0x6a   : > { %3087 = vset.pattern.permute.xlu1 %v3231_v17 }
  0x6b   : > { %422 = vperm.xlu1 %3087, %v346_v48  }
  0x6c   : > { %477 = vperm.xlu0 %3105, %v3470_v56  }
  0x6f   : > { %3088 = vset.pattern.permute.xlu1 %v3230_v1 }
  0x70   : > { %723 = vperm.xlu1 %3088, %v346_v48   ;;  %487 = vperm.xlu0 %3105, %v3475_v57  }
  0x74   : > { %727 = vperm.xlu1 %3088, %v3386_v32   ;;  %497 = vperm.xlu0 %3105, %v3480_v58  }
  0x78   : > { %3089 = vset.pattern.permute.xlu1 %v3229_v0  ;;  %507 = vperm.xlu0 %3105, %v3485_v59  }
  0x79   : > { %996 = vperm.xlu1 %3089, %v3386_v32  }
  0x7c   : > { %3114 = vset.pattern.permute.xlu0 %v3229_v0 }
  0x7d   : > { %3090 = vset.pattern.permute.xlu1 %v3231_v17  ;;  %1040 = vperm.xlu0 %3114, %v3491_v60  }
  0x7e   : > { %432 = vperm.xlu1 %3090, %v348_v49  }
  0x81   : > { %1048 = vperm.xlu0 %3114, %v3497_v61  }
  0x82   : > { %3091 = vset.pattern.permute.xlu1 %v3230_v1 }
  0x83   : > { %731 = vperm.xlu1 %3091, %v348_v49  }
  0x85   : > { %1056 = vperm.xlu0 %3114, %v3502_v62  }
  0x87   : > { %735 = vperm.xlu1 %3091, %v3397_v35  }
  0x89   : > { %1064 = vperm.xlu0 %3114, %v3507_v63  }
  0x8b   : > { %3092 = vset.pattern.permute.xlu1 %v3229_v0 }
  0x8c   : > { %1004 = vperm.xlu1 %3092, %v3397_v35  }
  0x8d   : > { %3119 = vset.pattern.permute.xlu0 %v3231_v17 }
  0x8e   : > { %517 = vperm.xlu0 %3119, %v3552_v22  }
  0x90   : > { %3093 = vset.pattern.permute.xlu1 %v3231_v17  ;;  %v684_v3 = vpop.permute.xlu1 %683  ;;  %v953_v4 = vpop.permute.xlu0 %952 }
  0x91   : > { %442 = vperm.xlu1 %3093, %v350_v50   ;;  %v821_v29 = vmul.f32 %v3540_v18, %v684_v3  ;;  %v822_v32 = vmul.f32 %v3555_v23, %v684_v3  ;;  %v1090_v34 = vmul.f32 %v3562_v28, %v953_v4  ;;  %v1091_v40 = vmul.f32 %v3570_v33, %v953_v4 }
  0x92   : > { %527 = vperm.xlu0 %3119, %v3592_v12  }
  0x94   : > { %v688_v6 = vpop.permute.xlu1 %687  ;;  %v3514_v7 = vpop.permute.xlu0 %960 }
  0x95   : > { %3095 = vset.pattern.permute.xlu1 %v3230_v1  ;;  %v823_v41 = vmul.f32 %v3540_v18, %v688_v6  ;;  %v824_v44 = vmul.f32 %v3555_v23, %v688_v6  ;;  %v1095_v48 = vmul.f32 %v3570_v33, %v3514_v7 }
  0x96   : > { %739 = vperm.xlu1 %3095, %v350_v50   ;;  %3123 = vset.pattern.permute.xlu0 %v3229_v0 }
  0x98   : > { %v3524_v11 = vpop.permute.xlu0 %968 }
  0x99   : > { %v957_v13 = vpop.permute.xlu1 %956 }
  0x9a   : > { %743 = vperm.xlu1 %3095, %v3407_v38   ;;  %v1092_v49 = vmul.f32 %v3562_v28, %v957_v13  ;;  %v1093_v50 = vmul.f32 %v3570_v33, %v957_v13 }
  0x9d   : > { %v373_v24 = vpop.permute.xlu0 %372 }
  0x9e   : > { %v541_v25 = vmul.f32 %v3534_v15, %v373_v24  ;;  %v542_v26 = vmul.f32 %v3537_v16, %v373_v24  ;;  %3096 = vset.pattern.permute.xlu1 %v3229_v0  ;;  %v383_v27 = vpop.permute.xlu1 %382 }
  0x9f   : > { %1012 = vperm.xlu1 %3096, %v3407_v38   ;;  %v546_v37 = vmul.f32 %v3537_v16, %v383_v27  ;;  %v545_v2 = vmul.f32 %v3534_v15, %v383_v27 }
  0xa0   : > { %v616_v30 = vadd.f32 %v3546_v20, %v541_v25  ;;  %v617_v31 = vadd.f32 %v3549_v21, %v542_v26 }
  0xa1   : > { %v378_v35 = vpop.permute.xlu0 %377  ;;  %v621_v4 = vadd.f32 %v3549_v21, %v546_v37 }
  0xa2   : > { %v885_v36 = vadd.f32 %v821_v29, %v616_v30  ;;  %v543_v39 = vmul.f32 %v3534_v15, %v378_v35  ;;  %v544_v38 = vmul.f32 %v3537_v16, %v378_v35  ;;  %v886_v43 = vadd.f32 %v822_v32, %v617_v31 }
  0xa3   : > { %3097 = vset.pattern.permute.xlu1 %v3231_v17  ;;  %v692_v42 = vpop.permute.xlu1 %691 }
  0xa4   : > { %v618_v45 = vadd.f32 %v3546_v20, %v543_v39  ;;  %v619_v46 = vadd.f32 %v3549_v21, %v544_v38  ;;  %v826_v47 = vmul.f32 %v3555_v23, %v692_v42  ;;  %452 = vperm.xlu1 %3097, %v3444_v51   ;;  %v1154_v8 = vadd.f32 %v1090_v34, %v885_v36 }
  0xa5   : > { %v388_v3 = vpop.permute.xlu0 %387  ;;  %v825_v14 = vmul.f32 %v3540_v18, %v692_v42  ;;  %v1155_v26 = vadd.f32 %v1091_v40, %v886_v43  ;;  %v620_v36 = vadd.f32 %v3546_v20, %v545_v2  ;;  %v1094_v38 = vmul.f32 %v3562_v28, %v3514_v7  ;;  %v3607_v42 = vld [vmem:[%s3312_s23 + $0xf0] sm:$0xff] }
  0xa6   : > { %v887_v5 = vadd.f32 %v823_v41, %v618_v45  ;;  %v547_v6 = vmul.f32 %v3534_v15, %v388_v3  ;;  %v548_v19 = vmul.f32 %v3537_v16, %v388_v3  ;;  %v888_v25 = vadd.f32 %v824_v44, %v619_v46  ;;  %1072 = vperm.xlu0 %3123, %v3607_v42  }
  0xa7   : > { %v696_v24 = vpop.permute.xlu1 %695  ;;  %v890_v13 = vadd.f32 %v826_v47, %v621_v4  ;;  %v1218_v37 = vmax.f32 %v1154_v8, 0.0  ;;  %v1219_v40 = vmax.f32 %v1155_v26, 0.0  ;;  %v889_v43 = vadd.f32 %v825_v14, %v620_v36 }
  0xa8   : > { %v622_v27 = vadd.f32 %v3546_v20, %v547_v6  ;;  %v827_v29 = vmul.f32 %v3540_v18, %v696_v24  ;;  %3098 = vset.pattern.permute.xlu1 %v3230_v1  ;;  %v1156_v30 = vadd.f32 %v1092_v49, %v887_v5  ;;  %v623_v31 = vadd.f32 %v3549_v21, %v548_v19 }
  0xa9   : > { %v828_v32 = vmul.f32 %v3555_v23, %v696_v24  ;;  %747 = vperm.xlu1 %3098, %v3444_v51   ;;  %v1157_v34 = vadd.f32 %v1093_v50, %v888_v25  ;;  %v398_v35 = vpop.permute.xlu0 %397  ;;  %v1159_v51 = vadd.f32 %v1095_v48, %v890_v13  ;;  %v1158_v5 = vadd.f32 %v1094_v38, %v889_v43 }
  0xaa   : > { %v1220_v39 = vmax.f32 %v1156_v30, 0.0  ;;  %v891_v44 = vadd.f32 %v827_v29, %v622_v27  ;;  %v1098_v38 = vmul.f32 %v3562_v28, %v3524_v11 }
  0xab   : > { %v1221_v41 = vmax.f32 %v1157_v34, 0.0  ;;  %v892_v47 = vadd.f32 %v828_v32, %v623_v31  ;;  %v1223_v6 = vmax.f32 %v1159_v51, 0.0  ;;  %v1222_v25 = vmax.f32 %v1158_v5, 0.0 }
  0xac   : > { %v965_v45 = vpop.permute.xlu1 %964  ;;  %v1282_v46 = vpack.c.bf16 %v1220_v39, %v1218_v37  ;;  %v552_v32 = vmul.f32 %v3537_v16, %v398_v35 }
  0xad   : > { %v1096_v49 = vmul.f32 %v3562_v28, %v965_v45  ;;  %v1097_v50 = vmul.f32 %v3570_v33, %v965_v45  ;;  %751 = vperm.xlu1 %3098, %v3459_v54   ;;  %v1283_v7 = vpack.c.bf16 %v1221_v41, %v1219_v40  ;;  %v3614_v2 = vpop.permute.xlu0 %407  ;;  %v1099_v40 = vmul.f32 %v3570_v33, %v3524_v11 }
  0xaf   : > { %v1160_v3 = vadd.f32 %v1096_v49, %v891_v44  ;;  %v1161_v4 = vadd.f32 %v1097_v50, %v892_v47  ;;  %1550 = vmatprep.mubr.bf16.mxu0 %v1283_v7  ;;  %v627_v44 = vadd.f32 %v3549_v21, %v552_v32  ;;  %v556_v32 = vmul.f32 %v3537_v16, %v3614_v2 }
  0xb0   : > { %1551 = vmatmul.mubr.bf16.vlgmr.msra.gmra.mrb[0].mxu0 %v1282_v46 }
  0xb1   : > { %3099 = vset.pattern.permute.xlu1 %v3229_v0  ;;  %v393_v48 = vpop.permute.xlu1 %392  ;;  %v1225_v8 = vmax.f32 %v1161_v4, 0.0  ;;  %v1224_v14 = vmax.f32 %v1160_v3, 0.0  ;;  %v3618_v24 = vpop.permute.xlu0 %417 }
  0xb2   : > { %1020 = vperm.xlu1 %3099, %v3459_v54   ;;  %v549_v26 = vmul.f32 %v3534_v15, %v393_v48  ;;  %v550_v13 = vmul.f32 %v3537_v16, %v393_v48  ;;  %v551_v54 = vmul.f32 %v3534_v15, %v398_v35 }
  0xb3   : > { %v1285_v19 = vpack.c.bf16 %v1225_v8, %v1223_v6  ;;  %v1284_v29 = vpack.c.bf16 %v1224_v14, %v1222_v25 }
  0xb4   : > { %v624_v34 = vadd.f32 %v3546_v20, %v549_v26  ;;  %v625_v36 = vadd.f32 %v3549_v21, %v550_v13  ;;  %v626_v35 = vadd.f32 %v3546_v20, %v551_v54 }
  0xb5   : > { %1560 = vmatprep.mubr.bf16.mxu0 %v1285_v19  ;;  %v3630_v37 = vpop.permute.xlu0 %427 }
  0xb6   : > { %3100 = vset.pattern.permute.xlu1 %v3231_v17  ;;  %v700_v27 = vpop.permute.xlu1 %699 }
  0xb7   : > { %v829_v30 = vmul.f32 %v3540_v18, %v700_v27  ;;  %v830_v31 = vmul.f32 %v3555_v23, %v700_v27  ;;  %462 = vperm.xlu1 %3100, %v3449_v52  }
  0xb8   : > { %1561 = vmatmul.mubr.bf16.gmra.mrb[4].mxu0 %v1284_v29 }
  0xb9   : > { %v893_v41 = vadd.f32 %v829_v30, %v624_v34  ;;  %v894_v43 = vadd.f32 %v830_v31, %v625_v36  ;;  %v3642_v47 = vpop.permute.xlu0 %437  ;;  %v555_v30 = vmul.f32 %v3534_v15, %v3614_v2 }
  0xba   : > { %v704_v39 = vpop.permute.xlu1 %703 }
  0xbb   : > { %3101 = vset.pattern.permute.xlu1 %v3230_v1  ;;  %v831_v45 = vmul.f32 %v3540_v18, %v704_v39  ;;  %v832_v46 = vmul.f32 %v3555_v23, %v704_v39  ;;  %v1163_v49 = vadd.f32 %v1099_v40, %v894_v43  ;;  %v1162_v50 = vadd.f32 %v1098_v38, %v893_v41  ;;  %v3173_v38 = vld [vmem:[%s4572_s5 + $0x4] ss:$8 sps:$4 sm:$0xff]   ;;  %v3175_v43 = vld [vmem:[%s4572_s5] ss:$8 sps:$4 sm:$0xff]  }
  0xbc   : > { %755 = vperm.xlu1 %3101, %v3449_v52   ;;  %v630_v40 = vadd.f32 %v3546_v20, %v555_v30  ;;  %2011 = vmatprep.subr.bf16.mxu1 %v3173_v38  ;;  %v3185_v38 = vld [vmem:[%s4572_s5 + $0x44] ss:$8 sps:$4 sm:$0xff]  }
  0xbd   : > { %v895_v11 = vadd.f32 %v831_v45, %v626_v35  ;;  %v896_v7 = vadd.f32 %v832_v46, %v627_v44  ;;  %v1227_v8 = vmax.f32 %v1163_v49, 0.0  ;;  %v1226_v14 = vmax.f32 %v1162_v50, 0.0  ;;  %v3649_v25 = vpop.permute.xlu0 %447  ;;  %2012 = vmatpush1.bf16.msra.mxu1 %v3175_v43  ;;  %v3176_v50 = vld [vmem:[%s4572_s5 + $0x14] ss:$8 sps:$4 sm:$0xff]  }
  0xbe   : > { %v631_v46 = vadd.f32 %v3549_v21, %v556_v32  ;;  %2013 = vmatprep.subr.bf16.mxu1 %v3176_v50  ;;  %v3184_v32 = vld [vmem:[%s4572_s5 + $0x30] ss:$8 sps:$4 sm:$0xff]   ;;  %v560_v43 = vmul.f32 %v3537_v16, %v3618_v24 }
  0xbf   : > { %v973_v51 = vpop.permute.xlu1 %972 }
  0xc0   : > { %v1100_v3 = vmul.f32 %v3562_v28, %v973_v51  ;;  %v1101_v4 = vmul.f32 %v3570_v33, %v973_v51  ;;  %759 = vperm.xlu1 %3101, %v3465_v55  }
  0xc2   : > { %v1164_v5 = vadd.f32 %v1100_v3, %v895_v11  ;;  %v1165_v48 = vadd.f32 %v1101_v4, %v896_v7  ;;  %v977_v34 = vpop.permute.xlu0 %976  ;;  %v3178_v11 = vld [vmem:[%s4572_s5 + $0x10] ss:$8 sps:$4 sm:$0xff]  }
  0xc3   : > { %v1102_v2 = vmul.f32 %v3562_v28, %v977_v34  ;;  %v1103_v45 = vmul.f32 %v3570_v33, %v977_v34  ;;  %2014 = vmatpush1.bf16.msra.mxu1 %v3178_v11 }
  0xc4   : > { %3102 = vset.pattern.permute.xlu1 %v3229_v0  ;;  %v403_v6 = vpop.permute.xlu1 %402  ;;  %v1229_v52 = vmax.f32 %v1165_v48, 0.0  ;;  %v1228_v19 = vmax.f32 %v1164_v5, 0.0 }
  0xc5   : > { %1028 = vperm.xlu1 %3102, %v3465_v55   ;;  %v553_v27 = vmul.f32 %v3534_v15, %v403_v6  ;;  %v554_v29 = vmul.f32 %v3537_v16, %v403_v6 }
  0xc6   : > { %v1287_v26 = vpack.c.bf16 %v1229_v52, %v1227_v8  ;;  %v1286_v13 = vpack.c.bf16 %v1228_v19, %v1226_v14  ;;  %v3179_v8 = vld [vmem:[%s4572_s5 + $0x24] ss:$8 sps:$4 sm:$0xff]   ;;  %v3181_v19 = vld [vmem:[%s4572_s5 + $0x20] ss:$8 sps:$4 sm:$0xff]  }
  0xc7   : > { %v628_v36 = vadd.f32 %v3546_v20, %v553_v27  ;;  %v629_v39 = vadd.f32 %v3549_v21, %v554_v29  ;;  %2015 = vmatprep.subr.bf16.mxu1 %v3179_v8 }
  0xc8   : > { %1570 = vmatprep.mubr.bf16.mxu0 %v1287_v26  ;;  %2016 = vmatpush1.bf16.msra.mxu1 %v3181_v19 }
  0xc9   : > { %3103 = vset.pattern.permute.xlu1 %v3231_v17  ;;  %1571 = vmatmul.mubr.bf16.gmra.mrb[8].mxu0 %v1286_v13  ;;  %v708_v31 = vpop.permute.xlu1 %707 }
  0xca   : > { %v833_v54 = vmul.f32 %v3540_v18, %v708_v31  ;;  %v834_v55 = vmul.f32 %v3555_v23, %v708_v31  ;;  %472 = vperm.xlu1 %3103, %v3454_v53   ;;  %v3182_v31 = vld [vmem:[%s4572_s5 + $0x34] ss:$8 sps:$4 sm:$0xff]  }
  0xcb   : > { %2017 = vmatprep.subr.bf16.mxu1 %v3182_v31 }
  0xcc   : > { %v897_v35 = vadd.f32 %v833_v54, %v628_v36  ;;  %v898_v44 = vadd.f32 %v834_v55, %v629_v39  ;;  %2018 = vmatpush1.bf16.msra.mxu1 %v3184_v32 }
  0xcd   : > { %v712_v41 = vpop.permute.xlu1 %711  ;;  %2019 = vmatprep.subr.bf16.mxu1 %v3185_v38 }
  0xce   : > { %3104 = vset.pattern.permute.xlu1 %v3230_v1  ;;  %v835_v51 = vmul.f32 %v3540_v18, %v712_v41  ;;  %v836_v49 = vmul.f32 %v3555_v23, %v712_v41  ;;  %v1166_v7 = vadd.f32 %v1102_v2, %v897_v35  ;;  %v1167_v3 = vadd.f32 %v1103_v45, %v898_v44  ;;  %v985_v35 = vpop.permute.xlu0 %984  ;;  %v3187_v44 = vld [vmem:[%s4572_s5 + $0x40] ss:$8 sps:$4 sm:$0xff]  }
  0xcf   : > { %763 = vperm.xlu1 %3104, %v3454_v53  }
  0xd0   : > { %v899_v5 = vadd.f32 %v835_v51, %v630_v40  ;;  %v900_v48 = vadd.f32 %v836_v49, %v631_v46  ;;  %v1231_v13 = vmax.f32 %v1167_v3, 0.0  ;;  %v1230_v29 = vmax.f32 %v1166_v7, 0.0  ;;  %v3188_v49 = vld [vmem:[%s4572_s5 + $0x54] ss:$8 sps:$4 sm:$0xff]   ;;  %2020 = vmatpush1.bf16.msra.mxu1 %v3187_v44 }
  0xd1   : > { %v1107_v7 = vmul.f32 %v3570_v33, %v985_v35  ;;  %v635_v3 = vadd.f32 %v3549_v21, %v560_v43  ;;  %2021 = vmatprep.subr.bf16.mxu1 %v3188_v49 }
  0xd2   : > { %v981_v4 = vpop.permute.xlu1 %980 }
  0xd3   : > { %v1104_v6 = vmul.f32 %v3562_v28, %v981_v4  ;;  %v1105_v53 = vmul.f32 %v3570_v33, %v981_v4  ;;  %767 = vperm.xlu1 %3104, %v3470_v56  }
  0xd5   : > { %v1168_v52 = vadd.f32 %v1104_v6, %v899_v5  ;;  %v1169_v14 = vadd.f32 %v1105_v53, %v900_v48  ;;  %v3190_v48 = vld [vmem:[%s4572_s5 + $0x50] ss:$8 sps:$4 sm:$0xff]   ;;  %v3191_v6 = vld [vmem:[%s4572_s5 + $0x64] ss:$8 sps:$4 sm:$0xff]  }
  0xd6   : > { %2022 = vmatpush1.bf16.msra.mxu1 %v3190_v48 }
  0xd7   : > { %3106 = vset.pattern.permute.xlu1 %v3229_v0  ;;  %v413_v26 = vpop.permute.xlu1 %412  ;;  %v1233_v27 = vmax.f32 %v1169_v14, 0.0  ;;  %v1232_v30 = vmax.f32 %v1168_v52, 0.0  ;;  %2023 = vmatprep.subr.bf16.mxu1 %v3191_v6 }
  0xd8   : > { %1036 = vperm.xlu1 %3106, %v3470_v56   ;;  %v557_v34 = vmul.f32 %v3534_v15, %v413_v26  ;;  %v558_v36 = vmul.f32 %v3537_v16, %v413_v26  ;;  %v559_v56 = vmul.f32 %v3534_v15, %v3618_v24  ;;  %v1106_v24 = vmul.f32 %v3562_v28, %v985_v35 }
  0xd9   : > { %v1289_v54 = vpack.c.bf16 %v1233_v27, %v1231_v13  ;;  %v1288_v55 = vpack.c.bf16 %v1232_v30, %v1230_v29  ;;  %v3194_v30 = vld [vmem:[%s4572_s5 + $0x74] ss:$8 sps:$4 sm:$0xff]  }
  0xda   : > { %v632_v2 = vadd.f32 %v3546_v20, %v557_v34  ;;  %v633_v45 = vadd.f32 %v3549_v21, %v558_v36  ;;  %v634_v46 = vadd.f32 %v3546_v20, %v559_v56 }
  0xdb   : > { %1580 = vmatprep.mubr.bf16.mxu0 %v1289_v54 }
  0xdc   : > { %3107 = vset.pattern.permute.xlu1 %v3231_v17  ;;  %1581 = vmatmul.mubr.bf16.gmra.mrb[12].mxu0 %v1288_v55  ;;  %v716_v39 = vpop.permute.xlu1 %715 }
  0xdd   : > { %v837_v40 = vmul.f32 %v3540_v18, %v716_v39  ;;  %v838_v41 = vmul.f32 %v3555_v23, %v716_v39  ;;  %482 = vperm.xlu1 %3107, %v3491_v60   ;;  %v3196_v39 = vld [vmem:[%s4572_s5 + $0x70] ss:$8 sps:$4 sm:$0xff]  }
  0xdf   : > { %v901_v50 = vadd.f32 %v837_v40, %v632_v2  ;;  %v902_v11 = vadd.f32 %v838_v41, %v633_v45  ;;  %v3197_v41 = vld [vmem:[%s4572_s5 + $0x84] ss:$8 sps:$4 sm:$0xff]   ;;  %v993_v2 = vpop.permute.xlu0 %992  ;;  %v564_v45 = vmul.f32 %v3537_v16, %v3630_v37 }
  0xe0   : > { %v720_v51 = vpop.permute.xlu1 %719 }
  0xe1   : > { %3108 = vset.pattern.permute.xlu1 %v3230_v1  ;;  %v839_v4 = vmul.f32 %v3540_v18, %v720_v51  ;;  %v840_v5 = vmul.f32 %v3555_v23, %v720_v51  ;;  %v1170_v53 = vadd.f32 %v1106_v24, %v901_v50  ;;  %v1171_v8 = vadd.f32 %v1107_v7, %v902_v11  ;;  %v3200_v50 = vld [vmem:[%s4572_s5 + $0x94] ss:$8 sps:$4 sm:$0xff]  }
  0xe2   : > { %771 = vperm.xlu1 %3108, %v3491_v60   ;;  %v3193_v60 = vld [vmem:[%s4572_s5 + $0x60] ss:$8 sps:$4 sm:$0xff]   ;;  %v1110_v24 = vmul.f32 %v3562_v28, %v993_v2  ;;  %v639_v48 = vadd.f32 %v3549_v21, %v564_v45 }
  0xe3   : > { %v903_v14 = vadd.f32 %v839_v4, %v634_v46  ;;  %v904_v19 = vadd.f32 %v840_v5, %v635_v3  ;;  %v1235_v54 = vmax.f32 %v1171_v8, 0.0  ;;  %v1234_v32 = vmax.f32 %v1170_v53, 0.0  ;;  %2024 = vmatpush1.bf16.msra.mxu1 %v3193_v60  ;;  %v3199_v46 = vld [vmem:[%s4572_s5 + $0x80] ss:$8 sps:$4 sm:$0xff]   ;;  %v3202_v53 = vld [vmem:[%s4572_s5 + $0x90] ss:$8 sps:$4 sm:$0xff]   ;;  %v1001_v45 = vpop.permute.xlu0 %1000 }
  0xe4   : > { %2025 = vmatprep.subr.bf16.mxu1 %v3194_v30  ;;  %v1111_v4 = vmul.f32 %v3570_v33, %v993_v2  ;;  %v3203_v8 = vld [vmem:[%s4572_s5 + $0xa4] ss:$8 sps:$4 sm:$0xff]  }
  0xe5   : > { %v989_v52 = vpop.permute.xlu1 %988 }
  0xe6   : > { %v1108_v26 = vmul.f32 %v3562_v28, %v989_v52  ;;  %v1109_v13 = vmul.f32 %v3570_v33, %v989_v52  ;;  %775 = vperm.xlu1 %3108, %v3475_v57  }
  0xe7   : > { %2026 = vmatpush1.bf16.msra.mxu1 %v3196_v39 }
  0xe8   : > { %v1172_v27 = vadd.f32 %v1108_v26, %v903_v14  ;;  %v1173_v29 = vadd.f32 %v1109_v13, %v904_v19  ;;  %2027 = vmatprep.subr.bf16.mxu1 %v3197_v41 }
  0xea   : > { %3109 = vset.pattern.permute.xlu1 %v3229_v0  ;;  %v423_v31 = vpop.permute.xlu1 %422  ;;  %v1237_v55 = vmax.f32 %v1173_v29, 0.0  ;;  %v1236_v34 = vmax.f32 %v1172_v27, 0.0  ;;  %v3206_v29 = vld [vmem:[%s4572_s5 + $0xb4] ss:$8 sps:$4 sm:$0xff]  }
  0xeb   : > { %1044 = vperm.xlu1 %3109, %v3475_v57   ;;  %v561_v38 = vmul.f32 %v3534_v15, %v423_v31  ;;  %v562_v40 = vmul.f32 %v3537_v16, %v423_v31  ;;  %v563_v57 = vmul.f32 %v3534_v15, %v3630_v37  ;;  %2028 = vmatpush1.bf16.msra.mxu1 %v3199_v46 }
  0xec   : > { %v1291_v36 = vpack.c.bf16 %v1237_v55, %v1235_v54  ;;  %v1290_v56 = vpack.c.bf16 %v1236_v34, %v1234_v32  ;;  %2029 = vmatprep.subr.bf16.mxu1 %v3200_v50  ;;  %v567_v50 = vmul.f32 %v3534_v15, %v3642_v47 }
  0xed   : > { %v636_v51 = vadd.f32 %v3546_v20, %v561_v38  ;;  %v637_v49 = vadd.f32 %v3549_v21, %v562_v40  ;;  %v638_v11 = vadd.f32 %v3546_v20, %v563_v57  ;;  %v3209_v40 = vld [vmem:[%s4572_s5 + $0xc4] ss:$8 sps:$4 sm:$0xff]  }
  0xee   : > { %1590 = vmatprep.mubr.bf16.mxu0 %v1291_v36 }
  0xef   : > { %3110 = vset.pattern.permute.xlu1 %v3231_v17  ;;  %1591 = vmatmul.mubr.bf16.gmra.mrb[16].mxu0 %v1290_v56  ;;  %v724_v43 = vpop.permute.xlu1 %723  ;;  %v3208_v56 = vld [vmem:[%s4572_s5 + $0xb0] ss:$8 sps:$4 sm:$0xff]  }
  0xf0   : > { %v841_v35 = vmul.f32 %v3540_v18, %v724_v43  ;;  %v842_v44 = vmul.f32 %v3555_v23, %v724_v43  ;;  %492 = vperm.xlu1 %3110, %v3497_v61   ;;  %2030 = vmatpush1.bf16.msra.mxu1 %v3202_v53  ;;  %v3211_v43 = vld [vmem:[%s4572_s5 + $0xc0] ss:$8 sps:$4 sm:$0xff]   ;;  %v642_v53 = vadd.f32 %v3546_v20, %v567_v50 }
  0xf1   : > { %2031 = vmatprep.subr.bf16.mxu1 %v3203_v8 }
  0xf2   : > { %v905_v37 = vadd.f32 %v841_v35, %v636_v51  ;;  %v906_v3 = vadd.f32 %v842_v44, %v637_v49  ;;  %v3212_v35 = vld [vmem:[%s4572_s5 + $0xd4] ss:$8 sps:$4 sm:$0xff]   ;;  %v3214_v49 = vld [vmem:[%s4572_s5 + $0xd0] ss:$8 sps:$4 sm:$0xff]  }
  0xf3   : > { %v728_v7 = vpop.permute.xlu1 %727 }
  0xf4   : > { %v843_v5 = vmul.f32 %v3540_v18, %v728_v7  ;;  %3111 = vset.pattern.permute.xlu1 %v3230_v1  ;;  %v844_v6 = vmul.f32 %v3555_v23, %v728_v7  ;;  %v1174_v52 = vadd.f32 %v1110_v24, %v905_v37  ;;  %v1175_v14 = vadd.f32 %v1111_v4, %v906_v3  ;;  %v3215_v7 = vld [vmem:[%s4572_s5 + $0xe4] ss:$8 sps:$4 sm:$0xff]  }
  0xf5   : > { %779 = vperm.xlu1 %3111, %v3497_v61   ;;  %v3205_v61 = vld [vmem:[%s4572_s5 + $0xa0] ss:$8 sps:$4 sm:$0xff]   ;;  %v1114_v4 = vmul.f32 %v3562_v28, %v1001_v45 }
  0xf6   : > { %v907_v19 = vadd.f32 %v843_v5, %v638_v11  ;;  %v908_v13 = vadd.f32 %v844_v6, %v639_v48  ;;  %v1239_v55 = vmax.f32 %v1175_v14, 0.0  ;;  %v1238_v34 = vmax.f32 %v1174_v52, 0.0  ;;  %2032 = vmatpush1.bf16.msra.mxu1 %v3205_v61  ;;  %v3218_v52 = vld [vmem:[%s4572_s5 + $0xf4] ss:$8 sps:$4 sm:$0xff]   ;;  %v3220_v61 = vld [vmem:[%s4572_s5 + $0xf0] ss:$8 sps:$4 sm:$0xff]  }
  0xf7   : > { %2033 = vmatprep.subr.bf16.mxu1 %v3206_v29  ;;  %v568_v11 = vmul.f32 %v3537_v16, %v3642_v47  ;;  %v1115_v5 = vmul.f32 %v3570_v33, %v1001_v45  ;;  %v3217_v47 = vld [vmem:[%s4572_s5 + $0xe0] ss:$8 sps:$4 sm:$0xff]  }
  0xf8   : > { %v997_v26 = vpop.permute.xlu1 %996 }
  0xf9   : > { %v1112_v60 = vmul.f32 %v3562_v28, %v997_v26  ;;  %v1113_v27 = vmul.f32 %v3570_v33, %v997_v26  ;;  %783 = vperm.xlu1 %3111, %v3480_v58   ;;  %v643_v8 = vadd.f32 %v3549_v21, %v568_v11 }
  0xfa   : > { %2034 = vmatpush1.bf16.msra.mxu1 %v3208_v56 }
  0xfb   : > { %v1176_v30 = vadd.f32 %v1112_v60, %v907_v19  ;;  %v1177_v31 = vadd.f32 %v1113_v27, %v908_v13  ;;  %2035 = vmatprep.subr.bf16.mxu1 %v3209_v40 }
  0xfd   : > { %3112 = vset.pattern.permute.xlu1 %v3229_v0  ;;  %v433_v54 = vpop.permute.xlu1 %432  ;;  %v1241_v32 = vmax.f32 %v1177_v31, 0.0  ;;  %v1240_v36 = vmax.f32 %v1176_v30, 0.0 }
  0xfe   : > { %1052 = vperm.xlu1 %3112, %v3480_v58   ;;  %v565_v41 = vmul.f32 %v3534_v15, %v433_v54  ;;  %v566_v57 = vmul.f32 %v3537_v16, %v433_v54  ;;  %2036 = vmatpush1.bf16.msra.mxu1 %v3211_v43 }
  0xff   : > { %v1293_v39 = vpack.c.bf16 %v1241_v32, %v1239_v55  ;;  %v1292_v38 = vpack.c.bf16 %v1240_v36, %v1238_v34  ;;  %2037 = vmatprep.subr.bf16.mxu1 %v3212_v35  ;;  %v1009_v36 = vpop.permute.xlu0 %1008 }
 0x100   : > { %v640_v46 = vadd.f32 %v3546_v20, %v565_v41  ;;  %v641_v51 = vadd.f32 %v3549_v21, %v566_v57  ;;  %v1119_v50 = vmul.f32 %v3570_v33, %v1009_v36 }
 0x101   : > { %1600 = vmatprep.mubr.bf16.mxu0 %v1293_v39 }
 0x102   : > { %3113 = vset.pattern.permute.xlu1 %v3231_v17  ;;  %1601 = vmatmul.mubr.bf16.gmra.mrb[20].mxu0 %v1292_v38  ;;  %v732_v58 = vpop.permute.xlu1 %731 }
 0x103   : > { %v845_v44 = vmul.f32 %v3540_v18, %v732_v58  ;;  %v846_v2 = vmul.f32 %v3555_v23, %v732_v58  ;;  %502 = vperm.xlu1 %3113, %v3502_v62   ;;  %2038 = vmatpush1.bf16.msra.mxu1 %v3214_v49  ;;  %v3850_v57 = vpop.permute.xlu0 %1016  ;;  %v1118_v49 = vmul.f32 %v3562_v28, %v1009_v36 }
 0x104   : > { %2039 = vmatprep.subr.bf16.mxu1 %v3215_v7 }
 0x105   : > { %v909_v37 = vadd.f32 %v845_v44, %v640_v46  ;;  %v910_v3 = vadd.f32 %v846_v2, %v641_v51  ;;  %v571_v44 = vmul.f32 %v3534_v15, %v3649_v25  ;;  %v572_v2 = vmul.f32 %v3537_v16, %v3649_v25 }
 0x106   : > { %v736_v24 = vpop.permute.xlu1 %735 }
 0x107   : > { %3115 = vset.pattern.permute.xlu1 %v3230_v1  ;;  %v847_v48 = vmul.f32 %v3540_v18, %v736_v24  ;;  %v848_v6 = vmul.f32 %v3555_v23, %v736_v24  ;;  %v1178_v14 = vadd.f32 %v1114_v4, %v909_v37  ;;  %v1179_v19 = vadd.f32 %v1115_v5, %v910_v3  ;;  %v3867_v7 = vpop.permute.xlu0 %1024 }
 0x108   : > { %787 = vperm.xlu1 %3115, %v3502_v62   ;;  %2040 = vmatpush1.bf16.msra.mxu1 %v3217_v47  ;;  %v646_v37 = vadd.f32 %v3546_v20, %v571_v44  ;;  %v647_v25 = vadd.f32 %v3549_v21, %v572_v2 }
 0x109   : > { %v911_v13 = vadd.f32 %v847_v48, %v642_v53  ;;  %v912_v60 = vadd.f32 %v848_v6, %v643_v8  ;;  %2041 = vmatprep.subr.bf16.mxu1 %v3218_v52  ;;  %v1243_v54 = vmax.f32 %v1179_v19, 0.0  ;;  %v1242_v32 = vmax.f32 %v1178_v14, 0.0 }
 0x10b   : > { %v1005_v26 = vpop.permute.xlu1 %1004 }
 0x10c   : > { %v1116_v62 = vmul.f32 %v3562_v28, %v1005_v26  ;;  %v1117_v27 = vmul.f32 %v3570_v33, %v1005_v26  ;;  %791 = vperm.xlu1 %3115, %v3485_v59   ;;  %2042 = vmatpush1.bf16.msra.mxu1 %v3220_v61 }
 0x10e   : > { %v1180_v29 = vadd.f32 %v1116_v62, %v911_v13  ;;  %v1181_v30 = vadd.f32 %v1117_v27, %v912_v60 }
 0x110   : > { %3116 = vset.pattern.permute.xlu1 %v3229_v0  ;;  %v443_v31 = vpop.permute.xlu1 %442  ;;  %v1245_v55 = vmax.f32 %v1181_v30, 0.0  ;;  %v1244_v34 = vmax.f32 %v1180_v29, 0.0 }
 0x111   : > { %1060 = vperm.xlu1 %3116, %v3485_v59   ;;  %v569_v38 = vmul.f32 %v3534_v15, %v443_v31  ;;  %v570_v40 = vmul.f32 %v3537_v16, %v443_v31 }
 0x112   : > { %v1295_v56 = vpack.c.bf16 %v1245_v55, %v1243_v54  ;;  %v1294_v39 = vpack.c.bf16 %v1244_v34, %v1242_v32 }
 0x113   : > { %v644_v59 = vadd.f32 %v3546_v20, %v569_v38  ;;  %v645_v35 = vadd.f32 %v3549_v21, %v570_v40 }
 0x114   : > { %1610 = vmatprep.mubr.bf16.mxu0 %v1295_v56 }
 0x115   : > { %3117 = vset.pattern.permute.xlu1 %v3231_v17  ;;  %1611 = vmatmul.mubr.bf16.gmra.mrb[24].mxu0 %v1294_v39  ;;  %v740_v41 = vpop.permute.xlu1 %739 }
 0x116   : > { %v849_v43 = vmul.f32 %v3540_v18, %v740_v41  ;;  %v850_v58 = vmul.f32 %v3555_v23, %v740_v41  ;;  %512 = vperm.xlu1 %3117, %v3507_v63  }
 0x118   : > { %v913_v46 = vadd.f32 %v849_v43, %v644_v59  ;;  %v914_v51 = vadd.f32 %v850_v58, %v645_v35  ;;  %v1122_v58 = vmul.f32 %v3562_v28, %v3850_v57  ;;  %v1123_v59 = vmul.f32 %v3570_v33, %v3850_v57 }
 0x119   : > { %v744_v45 = vpop.permute.xlu1 %743 }
 0x11a   : > { %3118 = vset.pattern.permute.xlu1 %v3230_v1  ;;  %v851_v11 = vmul.f32 %v3540_v18, %v744_v45  ;;  %v852_v24 = vmul.f32 %v3555_v23, %v744_v45  ;;  %v1182_v3 = vadd.f32 %v1118_v49, %v913_v46  ;;  %v1183_v4 = vadd.f32 %v1119_v50, %v914_v51 }
 0x11b   : > { %795 = vperm.xlu1 %3118, %v3507_v63   ;;  %v3874_v63 = vpop.permute.xlu0 %1032 }
 0x11c   : > { %v915_v48 = vadd.f32 %v851_v11, %v646_v37  ;;  %v916_v6 = vadd.f32 %v852_v24, %v647_v25  ;;  %v1247_v19 = vmax.f32 %v1183_v4, 0.0  ;;  %v1246_v13 = vmax.f32 %v1182_v3, 0.0 }
 0x11e   : > { %v1013_v5 = vpop.permute.xlu1 %1012 }
 0x11f   : > { %v1120_v47 = vmul.f32 %v3562_v28, %v1013_v5  ;;  %v1121_v53 = vmul.f32 %v3570_v33, %v1013_v5  ;;  %799 = vperm.xlu1 %3118, %v3552_v22   ;;  %v458_v30 = vpop.permute.xlu0 %457 }
 0x120   : > { %v576_v32 = vmul.f32 %v3537_v16, %v458_v30 }
 0x121   : > { %v1184_v8 = vadd.f32 %v1120_v47, %v915_v48  ;;  %v1185_v52 = vadd.f32 %v1121_v53, %v916_v6 }
 0x122   : > { %v651_v40 = vadd.f32 %v3549_v21, %v576_v32 }
 0x123   : > { %3120 = vset.pattern.permute.xlu1 %v3229_v0  ;;  %v453_v14 = vpop.permute.xlu1 %452  ;;  %v1249_v26 = vmax.f32 %v1185_v52, 0.0  ;;  %v1248_v60 = vmax.f32 %v1184_v8, 0.0  ;;  %v468_v48 = vpop.permute.xlu0 %467 }
 0x124   : > { %1068 = vperm.xlu1 %3120, %v3552_v22   ;;  %v573_v61 = vmul.f32 %v3534_v15, %v453_v14  ;;  %v574_v29 = vmul.f32 %v3537_v16, %v453_v14  ;;  %v575_v22 = vmul.f32 %v3534_v15, %v458_v30  ;;  %v579_v53 = vmul.f32 %v3534_v15, %v468_v48 }
 0x125   : > { %v1297_v62 = vpack.c.bf16 %v1249_v26, %v1247_v19  ;;  %v1296_v27 = vpack.c.bf16 %v1248_v60, %v1246_v13  ;;  %v580_v8 = vmul.f32 %v3537_v16, %v468_v48 }
 0x126   : > { %v648_v34 = vadd.f32 %v3546_v20, %v573_v61  ;;  %v649_v36 = vadd.f32 %v3549_v21, %v574_v29  ;;  %v654_v13 = vadd.f32 %v3546_v20, %v579_v53  ;;  %v1126_v61 = vmul.f32 %v3562_v28, %v3867_v7 }
 0x127   : > { %1620 = vmatprep.mubr.bf16.mxu0 %v1297_v62  ;;  %v655_v60 = vadd.f32 %v3549_v21, %v580_v8  ;;  %v1127_v29 = vmul.f32 %v3570_v33, %v3867_v7 }
 0x128   : > { %3121 = vset.pattern.permute.xlu1 %v3231_v17  ;;  %1621 = vmatmul.mubr.bf16.gmra.mrb[28].mxu0 %v1296_v27  ;;  %v748_v31 = vpop.permute.xlu1 %747  ;;  %v650_v17 = vadd.f32 %v3546_v20, %v575_v22 }
 0x129   : > { %v853_v54 = vmul.f32 %v3540_v18, %v748_v31  ;;  %v854_v55 = vmul.f32 %v3555_v23, %v748_v31  ;;  %522 = vperm.xlu1 %3121, %v3607_v42  }
 0x12b   : > { %v917_v39 = vadd.f32 %v853_v54, %v648_v34  ;;  %v918_v38 = vadd.f32 %v854_v55, %v649_v36 }
 0x12c   : > { %v752_v56 = vpop.permute.xlu1 %751 }
 0x12d   : > { %3122 = vset.pattern.permute.xlu1 %v3230_v1  ;;  %v855_v41 = vmul.f32 %v3540_v18, %v752_v56  ;;  %v856_v43 = vmul.f32 %v3555_v23, %v752_v56  ;;  %v1187_v44 = vadd.f32 %v1123_v59, %v918_v38  ;;  %v1186_v2 = vadd.f32 %v1122_v58, %v917_v39 }
 0x12e   : > { %803 = vperm.xlu1 %3122, %v3607_v42  }
 0x12f   : > { %v919_v1 = vadd.f32 %v855_v41, %v650_v17  ;;  %v920_v45 = vadd.f32 %v856_v43, %v651_v40  ;;  %v1251_v11 = vmax.f32 %v1187_v44, 0.0  ;;  %v1250_v37 = vmax.f32 %v1186_v2, 0.0 }
 0x131   : > { %v1021_v35 = vpop.permute.xlu1 %1020 }
 0x132   : > { %v1124_v46 = vmul.f32 %v3562_v28, %v1021_v35  ;;  %v1125_v51 = vmul.f32 %v3570_v33, %v1021_v35  ;;  %807 = vperm.xlu1 %3122, %v3592_v12   ;;  %v478_v35 = vpop.permute.xlu0 %477 }
 0x134   : > { %v1188_v49 = vadd.f32 %v1124_v46, %v919_v1  ;;  %v1189_v50 = vadd.f32 %v1125_v51, %v920_v45  ;;  %v583_v45 = vmul.f32 %v3534_v15, %v478_v35  ;;  %v584_v46 = vmul.f32 %v3537_v16, %v478_v35 }
 0x136   : > { %3124 = vset.pattern.permute.xlu1 %v3229_v0  ;;  %v463_v42 = vpop.permute.xlu1 %462  ;;  %v1253_v24 = vmax.f32 %v1189_v50, 0.0  ;;  %v1252_v57 = vmax.f32 %v1188_v49, 0.0  ;;  %v488_v50 = vpop.permute.xlu0 %487 }
 0x137   : > { %1076 = vperm.xlu1 %3124, %v3592_v12   ;;  %v577_v4 = vmul.f32 %v3534_v15, %v463_v42  ;;  %v578_v5 = vmul.f32 %v3537_v16, %v463_v42 }
 0x138   : > { %v1299_v25 = vpack.c.bf16 %v1253_v24, %v1251_v11  ;;  %v1298_v3 = vpack.c.bf16 %v1252_v57, %v1250_v37  ;;  %v658_v37 = vadd.f32 %v3546_v20, %v583_v45  ;;  %v659_v57 = vadd.f32 %v3549_v21, %v584_v46 }
 0x139   : > { %v652_v12 = vadd.f32 %v3546_v20, %v577_v4  ;;  %v653_v52 = vadd.f32 %v3549_v21, %v578_v5  ;;  %v1130_v4 = vmul.f32 %v3562_v28, %v3874_v63  ;;  %v1131_v5 = vmul.f32 %v3570_v33, %v3874_v63 }
 0x13a   : > { %1630 = vmatprep.mubr.bf16.mxu0 %v1299_v25 }
 0x13b   : > { %1631 = vmatmul.mubr.bf16.gmra.mrb[32].mxu0 %v1298_v3  ;;  %v756_v6 = vpop.permute.xlu1 %755 }
 0x13c   : > { %v857_v47 = vmul.f32 %v3540_v18, %v756_v6  ;;  %v858_v0 = vmul.f32 %v3555_v23, %v756_v6  ;;  %v3937_v6 = vpop.permute.xlu0 %497 }
 0x13e   : > { %v921_v19 = vadd.f32 %v857_v47, %v652_v12  ;;  %v922_v26 = vadd.f32 %v858_v0, %v653_v52 }
 0x13f   : > { %v760_v14 = vpop.permute.xlu1 %759 }
 0x140   : > { %v859_v62 = vmul.f32 %v3540_v18, %v760_v14  ;;  %v860_v27 = vmul.f32 %v3555_v23, %v760_v14  ;;  %v1191_v31 = vadd.f32 %v1127_v29, %v922_v26  ;;  %v1190_v54 = vadd.f32 %v1126_v61, %v921_v19  ;;  %v3941_v61 = vpop.permute.xlu0 %507 }
 0x142   : > { %v923_v55 = vadd.f32 %v859_v62, %v654_v13  ;;  %v924_v22 = vadd.f32 %v860_v27, %v655_v60  ;;  %v1255_v38 = vmax.f32 %v1191_v31, 0.0  ;;  %v1254_v40 = vmax.f32 %v1190_v54, 0.0 }
 0x144   : > { %v1029_v30 = vpop.permute.xlu1 %1028 }
 0x145   : > { %v1128_v32 = vmul.f32 %v3562_v28, %v1029_v30  ;;  %v1129_v34 = vmul.f32 %v3570_v33, %v1029_v30 }
 0x147   : > { %v1192_v36 = vadd.f32 %v1128_v32, %v923_v55  ;;  %v1193_v56 = vadd.f32 %v1129_v34, %v924_v22  ;;  %v1041_v32 = vpop.permute.xlu0 %1040 }
 0x149   : > { %v473_v39 = vpop.permute.xlu1 %472  ;;  %v1257_v17 = vmax.f32 %v1193_v56, 0.0  ;;  %v1256_v41 = vmax.f32 %v1192_v36, 0.0  ;;  %v587_v56 = vmul.f32 %v3534_v15, %v488_v50 }
 0x14a   : > { %v581_v7 = vmul.f32 %v3534_v15, %v473_v39  ;;  %v582_v59 = vmul.f32 %v3537_v16, %v473_v39  ;;  %v588_v39 = vmul.f32 %v3537_v16, %v488_v50 }
 0x14b   : > { %v1301_v43 = vpack.c.bf16 %v1257_v17, %v1255_v38  ;;  %v1300_v58 = vpack.c.bf16 %v1256_v41, %v1254_v40  ;;  %v1134_v41 = vmul.f32 %v3562_v28, %v1041_v32 }
 0x14c   : > { %v656_v51 = vadd.f32 %v3546_v20, %v581_v7  ;;  %v657_v49 = vadd.f32 %v3549_v21, %v582_v59  ;;  %v662_v59 = vadd.f32 %v3546_v20, %v587_v56  ;;  %v663_v35 = vadd.f32 %v3549_v21, %v588_v39 }
 0x14d   : > { %1640 = vmatprep.mubr.bf16.mxu0 %v1301_v43  ;;  %v1135_v43 = vmul.f32 %v3570_v33, %v1041_v32 }
 0x14e   : > { %1641 = vmatmul.mubr.bf16.gmra.mrb[36].mxu0 %v1300_v58  ;;  %v764_v44 = vpop.permute.xlu1 %763 }
 0x14f   : > { %v861_v2 = vmul.f32 %v3540_v18, %v764_v44  ;;  %v862_v1 = vmul.f32 %v3555_v23, %v764_v44 }
 0x151   : > { %v925_v11 = vadd.f32 %v861_v2, %v656_v51  ;;  %v926_v24 = vadd.f32 %v862_v1, %v657_v49 }
 0x152   : > { %v768_v42 = vpop.permute.xlu1 %767 }
 0x153   : > { %v863_v25 = vmul.f32 %v3540_v18, %v768_v42  ;;  %v864_v3 = vmul.f32 %v3555_v23, %v768_v42  ;;  %v1195_v47 = vadd.f32 %v1131_v5, %v926_v24  ;;  %v1194_v0 = vadd.f32 %v1130_v4, %v925_v11 }
 0x155   : > { %v927_v53 = vadd.f32 %v863_v25, %v658_v37  ;;  %v928_v8 = vadd.f32 %v864_v3, %v659_v57  ;;  %v1259_v13 = vmax.f32 %v1195_v47, 0.0  ;;  %v1258_v62 = vmax.f32 %v1194_v0, 0.0 }
 0x157   : > { %v1037_v48 = vpop.permute.xlu1 %1036 }
 0x158   : > { %v1132_v12 = vmul.f32 %v3562_v28, %v1037_v48  ;;  %v1133_v52 = vmul.f32 %v3570_v33, %v1037_v48 }
 0x15a   : > { %v1196_v14 = vadd.f32 %v1132_v12, %v927_v53  ;;  %v1197_v19 = vadd.f32 %v1133_v52, %v928_v8  ;;  %v1049_v8 = vpop.permute.xlu0 %1048 }
 0x15c   : > { %v483_v26 = vpop.permute.xlu1 %482  ;;  %v1261_v60 = vmax.f32 %v1197_v19, 0.0  ;;  %v1260_v27 = vmax.f32 %v1196_v14, 0.0  ;;  %v591_v14 = vmul.f32 %v3534_v15, %v3937_v6  ;;  %v592_v19 = vmul.f32 %v3537_v16, %v3937_v6  ;;  %v1346_v6 = vld [vmem:[%s4571_s4] sm:$0x3] }
 0x15d   : > { %v585_v30 = vmul.f32 %v3534_v15, %v483_v26  ;;  %v586_v31 = vmul.f32 %v3537_v16, %v483_v26 }
 0x15e   : > { %v1303_v63 = vpack.c.bf16 %v1261_v60, %v1259_v13  ;;  %v1302_v29 = vpack.c.bf16 %v1260_v27, %v1258_v62  ;;  %v1138_v62 = vmul.f32 %v3562_v28, %v1049_v8  ;;  %v1139_v27 = vmul.f32 %v3570_v33, %v1049_v8 }
 0x15f   : > { %v660_v34 = vadd.f32 %v3546_v20, %v585_v30  ;;  %v661_v36 = vadd.f32 %v3549_v21, %v586_v31  ;;  %v666_v30 = vadd.f32 %v3546_v20, %v591_v14  ;;  %v667_v31 = vadd.f32 %v3549_v21, %v592_v19 }
 0x160   : > { %1650 = vmatprep.mubr.bf16.mxu0 %v1303_v63  ;;  %v596_v8 = vmul.f32 %v3537_v16, %v3941_v61 }
 0x161   : > { %1651 = vmatmul.mubr.bf16.gmra.mrb[40].mxu0 %v1302_v29  ;;  %v772_v54 = vpop.permute.xlu1 %771 }
 0x162   : > { %v865_v55 = vmul.f32 %v3540_v18, %v772_v54  ;;  %v866_v22 = vmul.f32 %v3555_v23, %v772_v54 }
 0x164   : > { %v929_v17 = vadd.f32 %v865_v55, %v660_v34  ;;  %v930_v40 = vadd.f32 %v866_v22, %v661_v36 }
 0x165   : > { %v776_v38 = vpop.permute.xlu1 %775 }
 0x166   : > { %v867_v58 = vmul.f32 %v3540_v18, %v776_v38  ;;  %v868_v7 = vmul.f32 %v3555_v23, %v776_v38  ;;  %v1198_v44 = vadd.f32 %v1134_v41, %v929_v17  ;;  %v1199_v2 = vadd.f32 %v1135_v43, %v930_v40 }
 0x167   : > { %v3981_v17 = vrot.slane %v1346_v6, %v3520_v9  ;;  %v3984_v40 = vrot.slane %v1346_v6, %v3522_v10 }
 0x168   : > { %v931_v45 = vadd.f32 %v867_v58, %v662_v59  ;;  %v932_v46 = vadd.f32 %v868_v7, %v663_v35  ;;  %v1263_v24 = vmax.f32 %v1199_v2, 0.0  ;;  %v1262_v57 = vmax.f32 %v1198_v44, 0.0 }
 0x16a   : > { %v1045_v1 = vpop.permute.xlu1 %1044 }
 0x16b   : > { %v1136_v51 = vmul.f32 %v3562_v28, %v1045_v1  ;;  %v1137_v49 = vmul.f32 %v3570_v33, %v1045_v1 }
 0x16d   : > { %v1200_v50 = vadd.f32 %v1136_v51, %v931_v45  ;;  %v1201_v42 = vadd.f32 %v1137_v49, %v932_v46 }
 0x16f   : > { %v493_v11 = vpop.permute.xlu1 %492  ;;  %v1265_v37 = vmax.f32 %v1201_v42, 0.0  ;;  %v1264_v25 = vmax.f32 %v1200_v50, 0.0 }
 0x170   : > { %v589_v5 = vmul.f32 %v3534_v15, %v493_v11  ;;  %v590_v48 = vmul.f32 %v3537_v16, %v493_v11 }
 0x171   : > { %v1305_v3 = vpack.c.bf16 %v1265_v37, %v1263_v24  ;;  %v1304_v4 = vpack.c.bf16 %v1264_v25, %v1262_v57 }
 0x172   : > { %v664_v12 = vadd.f32 %v3546_v20, %v589_v5  ;;  %v665_v52 = vadd.f32 %v3549_v21, %v590_v48 }
 0x173   : > { %1660 = vmatprep.mubr.bf16.mxu0 %v1305_v3 }
 0x174   : > { %1661 = vmatmul.mubr.bf16.gmra.mrb[44].mxu0 %v1304_v4  ;;  %v780_v47 = vpop.permute.xlu1 %779 }
 0x175   : > { %v869_v0 = vmul.f32 %v3540_v18, %v780_v47  ;;  %v870_v53 = vmul.f32 %v3555_v23, %v780_v47 }
 0x177   : > { %v933_v13 = vadd.f32 %v869_v0, %v664_v12  ;;  %v934_v60 = vadd.f32 %v870_v53, %v665_v52  ;;  %v595_v53 = vmul.f32 %v3534_v15, %v3941_v61 }
 0x178   : > { %v784_v26 = vpop.permute.xlu1 %783 }
 0x179   : > { %v871_v63 = vmul.f32 %v3540_v18, %v784_v26  ;;  %v872_v29 = vmul.f32 %v3555_v23, %v784_v26  ;;  %v1202_v54 = vadd.f32 %v1138_v62, %v933_v13  ;;  %v1203_v55 = vadd.f32 %v1139_v27, %v934_v60  ;;  %v1057_v60 = vpop.permute.xlu0 %1056 }
 0x17b   : > { %v935_v32 = vadd.f32 %v871_v63, %v666_v30  ;;  %v936_v34 = vadd.f32 %v872_v29, %v667_v31  ;;  %v1267_v43 = vmax.f32 %v1203_v55, 0.0  ;;  %v1266_v7 = vmax.f32 %v1202_v54, 0.0 }
 0x17c   : > { %v1142_v30 = vmul.f32 %v3562_v28, %v1057_v60  ;;  %v1143_v31 = vmul.f32 %v3570_v33, %v1057_v60  ;;  %v670_v55 = vadd.f32 %v3546_v20, %v595_v53 }
 0x17d   : > { %v1053_v22 = vpop.permute.xlu1 %1052 }
 0x17e   : > { %v1140_v36 = vmul.f32 %v3562_v28, %v1053_v22  ;;  %v1141_v56 = vmul.f32 %v3570_v33, %v1053_v22  ;;  %v671_v22 = vadd.f32 %v3549_v21, %v596_v8 }
 0x180   : > { %v1204_v39 = vadd.f32 %v1140_v36, %v935_v32  ;;  %v1205_v38 = vadd.f32 %v1141_v56, %v936_v34 }
 0x182   : > { %v503_v41 = vpop.permute.xlu1 %502  ;;  %v1269_v58 = vmax.f32 %v1205_v38, 0.0  ;;  %v1268_v59 = vmax.f32 %v1204_v39, 0.0 }
 0x183   : > { %v1552_v35 = vpop.f32.mrb[0].mxu0  ;;  %v593_v46 = vmul.f32 %v3534_v15, %v503_v41  ;;  %v594_v51 = vmul.f32 %v3537_v16, %v503_v41 }
 0x184   : > { %v1553_v44 = vadd.f32 %v1552_v35, %v3981_v17  ;;  %v1554_v2 = vpop.f32.mrb[1].mxu0  ;;  %v1307_v1 = vpack.c.bf16 %v1269_v58, %v1267_v43  ;;  %v1306_v45 = vpack.c.bf16 %v1268_v59, %v1266_v7 }
 0x185   : > { %v1555_v49 = vadd.f32 %v1554_v2, %v3984_v40  ;;  %v1556_v50 = vpop.f32.mrb[2].mxu0  ;;  %v668_v5 = vadd.f32 %v3546_v20, %v593_v46  ;;  %v669_v48 = vadd.f32 %v3549_v21, %v594_v51 }
 0x186   : > { %v1557_v42 = vadd.f32 %v1556_v50, %v3981_v17  ;;  %v1558_v11 = vpop.f32.mrb[3].mxu0  ;;  %1670 = vmatprep.mubr.bf16.mxu0 %v1307_v1  ;;  %v1711_v57 = vmax.f32 %v1553_v44, 0.0  ;;  %v1065_v1 = vpop.permute.xlu0 %1064 }
 0x187   : > { %v1559_v24 = vadd.f32 %v1558_v11, %v3984_v40  ;;  %1671 = vmatmul.mubr.bf16.gmra.mrb[48].mxu0 %v1306_v45  ;;  %v788_v37 = vpop.permute.xlu1 %787  ;;  %v1712_v47 = vmax.f32 %v1555_v49, 0.0 }
 0x188   : > { %v1713_v25 = vmax.f32 %v1557_v42, 0.0  ;;  %v873_v3 = vmul.f32 %v3540_v18, %v788_v37  ;;  %v874_v4 = vmul.f32 %v3555_v23, %v788_v37 }
 0x189   : > { %v1714_v0 = vmax.f32 %v1559_v24, 0.0 }
 0x18a   : > { %v1775_v12 = vpack.c.bf16 %v1713_v25, %v1711_v57  ;;  %v937_v52 = vadd.f32 %v873_v3, %v668_v5  ;;  %v938_v14 = vadd.f32 %v874_v4, %v669_v48  ;;  %v518_v25 = vpop.permute.xlu0 %517 }
 0x18b   : > { %v1562_v19 = vpop.f32.mrb[4].mxu0  ;;  %v792_v26 = vpop.permute.xlu1 %791  ;;  %v1776_v13 = vpack.c.bf16 %v1714_v0, %v1712_v47  ;;  %v599_v48 = vmul.f32 %v3534_v15, %v518_v25  ;;  %v600_v53 = vmul.f32 %v3537_v16, %v518_v25 }
 0x18c   : > { %v1563_v62 = vadd.f32 %v1562_v19, %v3981_v17  ;;  %v1564_v27 = vpop.f32.mrb[5].mxu0  ;;  %v875_v63 = vmul.f32 %v3540_v18, %v792_v26  ;;  %v876_v29 = vmul.f32 %v3555_v23, %v792_v26  ;;  %v1207_v36 = vadd.f32 %v1143_v31, %v938_v14 }
 0x18d   : > { %v1565_v61 = vadd.f32 %v1564_v27, %v3984_v40  ;;  %v1566_v54 = vpop.f32.mrb[6].mxu0  ;;  %2043 = vmatprep.mubr.bf16.mxu1 %v1776_v13  ;;  %v1206_v56 = vadd.f32 %v1142_v30, %v937_v52  ;;  %v674_v26 = vadd.f32 %v3546_v20, %v599_v48 }
 0x18e   : > { %v1567_v6 = vadd.f32 %v1566_v54, %v3981_v17  ;;  %v1568_v32 = vpop.f32.mrb[7].mxu0  ;;  %2044 = vmatmul.mubr.bf16.vlgmr.msra.gmra.mrb[0].mxu1 %v1775_v12  ;;  %v1715_v39 = vmax.f32 %v1563_v62, 0.0  ;;  %v939_v38 = vadd.f32 %v875_v63, %v670_v55  ;;  %v940_v41 = vadd.f32 %v876_v29, %v671_v22 }
 0x18f   : > { %v1569_v34 = vadd.f32 %v1568_v32, %v3984_v40  ;;  %v1716_v7 = vmax.f32 %v1565_v61, 0.0  ;;  %v1271_v50 = vmax.f32 %v1207_v36, 0.0  ;;  %v1270_v11 = vmax.f32 %v1206_v56, 0.0 }
 0x190   : > { %v1717_v43 = vmax.f32 %v1567_v6, 0.0  ;;  %v1061_v58 = vpop.permute.xlu1 %1060  ;;  %v675_v61 = vadd.f32 %v3549_v21, %v600_v53  ;;  %v1146_v22 = vmul.f32 %v3562_v28, %v1065_v1  ;;  %v1147_v6 = vmul.f32 %v3570_v33, %v1065_v1 }
 0x191   : > { %v1718_v59 = vmax.f32 %v1569_v34, 0.0  ;;  %v1144_v35 = vmul.f32 %v3562_v28, %v1061_v58  ;;  %v1145_v44 = vmul.f32 %v3570_v33, %v1061_v58 }
 0x192   : > { %v1777_v2 = vpack.c.bf16 %v1717_v43, %v1715_v39 }
 0x193   : > { %v1778_v45 = vpack.c.bf16 %v1718_v59, %v1716_v7  ;;  %v1208_v46 = vadd.f32 %v1144_v35, %v939_v38  ;;  %v1209_v51 = vadd.f32 %v1145_v44, %v940_v41 }
 0x195   : > { %2053 = vmatprep.mubr.bf16.mxu1 %v1778_v45  ;;  %v513_v49 = vpop.permute.xlu1 %512  ;;  %v1273_v42 = vmax.f32 %v1209_v51, 0.0  ;;  %v1272_v24 = vmax.f32 %v1208_v46, 0.0 }
 0x196   : > { %2054 = vmatmul.mubr.bf16.gmra.mrb[4].mxu1 %v1777_v2  ;;  %v597_v3 = vmul.f32 %v3534_v15, %v513_v49  ;;  %v598_v4 = vmul.f32 %v3537_v16, %v513_v49 }
 0x197   : > { %v1309_v37 = vpack.c.bf16 %v1273_v42, %v1271_v50  ;;  %v1308_v57 = vpack.c.bf16 %v1272_v24, %v1270_v11  ;;  %v528_v42 = vpop.permute.xlu0 %527 }
 0x198   : > { %v672_v12 = vadd.f32 %v3546_v20, %v597_v3  ;;  %v673_v52 = vadd.f32 %v3549_v21, %v598_v4 }
 0x199   : > { %1680 = vmatprep.mubr.bf16.mxu0 %v1309_v37 }
 0x19a   : > { %1681 = vmatmul.mubr.bf16.gmra.mrb[52].mxu0 %v1308_v57  ;;  %v796_v5 = vpop.permute.xlu1 %795 }
 0x19b   : > { %v877_v47 = vmul.f32 %v3540_v18, %v796_v5  ;;  %v878_v0 = vmul.f32 %v3555_v23, %v796_v5  ;;  %v1073_v5 = vpop.permute.xlu0 %1072 }
 0x19c   : > { %v1572_v8 = vpop.f32.mrb[8].mxu0 }
 0x19d   : > { %v1573_v14 = vadd.f32 %v1572_v8, %v3981_v17  ;;  %v1574_v19 = vpop.f32.mrb[9].mxu0  ;;  %v941_v27 = vadd.f32 %v877_v47, %v672_v12  ;;  %v942_v63 = vadd.f32 %v878_v0, %v673_v52  ;;  %v603_v47 = vmul.f32 %v3534_v15, %v528_v42 }
 0x19e   : > { %v1575_v13 = vadd.f32 %v1574_v19, %v3984_v40  ;;  %v1576_v60 = vpop.f32.mrb[10].mxu0  ;;  %v800_v62 = vpop.permute.xlu1 %799  ;;  %v604_v52 = vmul.f32 %v3537_v16, %v528_v42 }
 0x19f   : > { %v1577_v29 = vadd.f32 %v1576_v60, %v3981_v17  ;;  %v879_v30 = vmul.f32 %v3540_v18, %v800_v62  ;;  %v1578_v31 = vpop.f32.mrb[11].mxu0  ;;  %v880_v54 = vmul.f32 %v3555_v23, %v800_v62  ;;  %v1719_v32 = vmax.f32 %v1573_v14, 0.0 }
 0x1a0   : > { %v1579_v55 = vadd.f32 %v1578_v31, %v3984_v40  ;;  %v1720_v36 = vmax.f32 %v1575_v13, 0.0  ;;  %v1211_v43 = vadd.f32 %v1147_v6, %v942_v63  ;;  %v1210_v58 = vadd.f32 %v1146_v22, %v941_v27 }
 0x1a1   : > { %v1721_v34 = vmax.f32 %v1577_v29, 0.0  ;;  %v943_v38 = vadd.f32 %v879_v30, %v674_v26  ;;  %v944_v7 = vadd.f32 %v880_v54, %v675_v61  ;;  %v1150_v14 = vmul.f32 %v3562_v28, %v1073_v5 }
 0x1a2   : > { %v1722_v56 = vmax.f32 %v1579_v55, 0.0  ;;  %v1275_v46 = vmax.f32 %v1211_v43, 0.0  ;;  %v1274_v49 = vmax.f32 %v1210_v58, 0.0  ;;  %v1151_v27 = vmul.f32 %v3570_v33, %v1073_v5 }
 0x1a3   : > { %v1779_v39 = vpack.c.bf16 %v1721_v34, %v1719_v32  ;;  %v1069_v41 = vpop.permute.xlu1 %1068  ;;  %v679_v55 = vadd.f32 %v3549_v21, %v604_v52 }
 0x1a4   : > { %v1780_v59 = vpack.c.bf16 %v1722_v56, %v1720_v36  ;;  %v1148_v35 = vmul.f32 %v3562_v28, %v1069_v41  ;;  %v1149_v44 = vmul.f32 %v3570_v33, %v1069_v41 }
 0x1a6   : > { %v1212_v2 = vadd.f32 %v1148_v35, %v943_v38  ;;  %v1213_v45 = vadd.f32 %v1149_v44, %v944_v7  ;;  %2063 = vmatprep.mubr.bf16.mxu1 %v1780_v59 }
 0x1a7   : > { %2064 = vmatmul.mubr.bf16.gmra.mrb[8].mxu1 %v1779_v39 }
 0x1a8   : > { %v523_v1 = vpop.permute.xlu1 %522  ;;  %v1277_v51 = vmax.f32 %v1213_v45, 0.0  ;;  %v1276_v50 = vmax.f32 %v1212_v2, 0.0 }
 0x1a9   : > { %v601_v37 = vmul.f32 %v3534_v15, %v523_v1  ;;  %v602_v57 = vmul.f32 %v3537_v16, %v523_v1  ;;  %v678_v16 = vadd.f32 %v3546_v20, %v603_v47 }
 0x1aa   : > { %v1311_v11 = vpack.c.bf16 %v1277_v51, %v1275_v46  ;;  %v1310_v24 = vpack.c.bf16 %v1276_v50, %v1274_v49 }
 0x1ab   : > { %v676_v0 = vadd.f32 %v3546_v20, %v601_v37  ;;  %v677_v53 = vadd.f32 %v3549_v21, %v602_v57 }
 0x1ac   : > { %1690 = vmatprep.mubr.bf16.mxu0 %v1311_v11 }
 0x1ad   : > { %1691 = vmatmul.mubr.bf16.gmra.mrb[56].mxu0 %v1310_v24  ;;  %v804_v25 = vpop.permute.xlu1 %803 }
 0x1ae   : > { %v881_v3 = vmul.f32 %v3540_v18, %v804_v25  ;;  %v882_v4 = vmul.f32 %v3555_v23, %v804_v25 }
 0x1af   : > { %v1582_v48 = vpop.f32.mrb[12].mxu0 }
 0x1b0   : > { %v1583_v8 = vadd.f32 %v1582_v48, %v3981_v17  ;;  %v1584_v12 = vpop.f32.mrb[13].mxu0  ;;  %v945_v60 = vadd.f32 %v881_v3, %v676_v0  ;;  %v946_v62 = vadd.f32 %v882_v4, %v677_v53 }
 0x1b1   : > { %v1585_v19 = vadd.f32 %v1584_v12, %v3984_v40  ;;  %v1586_v26 = vpop.f32.mrb[14].mxu0  ;;  %v808_v13 = vpop.permute.xlu1 %807 }
 0x1b2   : > { %v1587_v15 = vadd.f32 %v1586_v26, %v3981_v17  ;;  %v1588_v63 = vpop.f32.mrb[15].mxu0  ;;  %v883_v29 = vmul.f32 %v3540_v18, %v808_v13  ;;  %v884_v30 = vmul.f32 %v3555_v23, %v808_v13  ;;  %v1723_v61 = vmax.f32 %v1583_v8, 0.0 }
 0x1b3   : > { %v1589_v31 = vadd.f32 %v1588_v63, %v3984_v40  ;;  %v1724_v22 = vmax.f32 %v1585_v19, 0.0  ;;  %v1214_v32 = vadd.f32 %v1150_v14, %v945_v60  ;;  %v1215_v34 = vadd.f32 %v1151_v27, %v946_v62 }
 0x1b4   : > { %v1725_v54 = vmax.f32 %v1587_v15, 0.0  ;;  %v947_v56 = vadd.f32 %v883_v29, %v678_v16  ;;  %v948_v38 = vadd.f32 %v884_v30, %v679_v55 }
 0x1b5   : > { %v1726_v6 = vmax.f32 %v1589_v31, 0.0  ;;  %v1278_v20 = vmax.f32 %v1214_v32, 0.0  ;;  %v1279_v7 = vmax.f32 %v1215_v34, 0.0 }
 0x1b6   : > { %v1781_v36 = vpack.c.bf16 %v1725_v54, %v1723_v61  ;;  %v1077_v39 = vpop.permute.xlu1 %1076 }
 0x1b7   : > { %v1782_v41 = vpack.c.bf16 %v1726_v6, %v1724_v22  ;;  %v1152_v18 = vmul.f32 %v3562_v28, %v1077_v39  ;;  %v1153_v23 = vmul.f32 %v3570_v33, %v1077_v39 }
 0x1b9   : > { %v1216_v43 = vadd.f32 %v1152_v18, %v947_v56  ;;  %v1217_v58 = vadd.f32 %v1153_v23, %v948_v38  ;;  %2073 = vmatprep.mubr.bf16.mxu1 %v1782_v41 }
 0x1ba   : > { %2074 = vmatmul.mubr.bf16.gmra.mrb[12].mxu1 %v1781_v36 }
 0x1bb   : > { %v1280_v21 = vmax.f32 %v1216_v43, 0.0  ;;  %v1281_v59 = vmax.f32 %v1217_v58, 0.0 }
 0x1bd   : > { %v1313_v35 = vpack.c.bf16 %v1281_v59, %v1279_v7  ;;  %v1312_v44 = vpack.c.bf16 %v1280_v21, %v1278_v20 }
 0x1bf   : > { %1700 = vmatprep.mubr.bf16.mxu0 %v1313_v35 }
 0x1c0   : > { %1701 = vmatmul.mubr.bf16.gmra.mrb[60].mxu0 %v1312_v44 }
 0x1c2   : > { %v1592_v2 = vpop.f32.mrb[16].mxu0 }
 0x1c3   : > { %v1593_v45 = vadd.f32 %v1592_v2, %v3981_v17  ;;  %v1594_v1 = vpop.f32.mrb[17].mxu0 }
 0x1c4   : > { %v1595_v28 = vadd.f32 %v1594_v1, %v3984_v40  ;;  %v1596_v46 = vpop.f32.mrb[18].mxu0 }
 0x1c5   : > { %v1597_v33 = vadd.f32 %v1596_v46, %v3981_v17  ;;  %v1598_v51 = vpop.f32.mrb[19].mxu0  ;;  %v1727_v50 = vmax.f32 %v1593_v45, 0.0 }
 0x1c6   : > { %v1599_v49 = vadd.f32 %v1598_v51, %v3984_v40  ;;  %v1728_v11 = vmax.f32 %v1595_v28, 0.0 }
 0x1c7   : > { %v1729_v42 = vmax.f32 %v1597_v33, 0.0 }
 0x1c8   : > { %v1730_v24 = vmax.f32 %v1599_v49, 0.0 }
 0x1c9   : > { %v1783_v37 = vpack.c.bf16 %v1729_v42, %v1727_v50 }
 0x1ca   : > { %v1784_v57 = vpack.c.bf16 %v1730_v24, %v1728_v11 }
 0x1cc   : > { %2083 = vmatprep.mubr.bf16.mxu1 %v1784_v57 }
 0x1cd   : > { %2084 = vmatmul.mubr.bf16.gmra.mrb[16].mxu1 %v1783_v37 }
 0x1d5   : > { %v1602_v25 = vpop.f32.mrb[20].mxu0 }
 0x1d6   : > { %v1603_v3 = vadd.f32 %v1602_v25, %v3981_v17  ;;  %v1604_v4 = vpop.f32.mrb[21].mxu0 }
 0x1d7   : > { %v1605_v5 = vadd.f32 %v1604_v4, %v3984_v40  ;;  %v1606_v48 = vpop.f32.mrb[22].mxu0 }
 0x1d8   : > { %v1607_v47 = vadd.f32 %v1606_v48, %v3981_v17  ;;  %v1608_v0 = vpop.f32.mrb[23].mxu0  ;;  %v1731_v8 = vmax.f32 %v1603_v3, 0.0 }
 0x1d9   : > { %v1609_v53 = vadd.f32 %v1608_v0, %v3984_v40  ;;  %v1732_v52 = vmax.f32 %v1605_v5, 0.0 }
 0x1da   : > { %v1733_v12 = vmax.f32 %v1607_v47, 0.0 }
 0x1db   : > { %v1734_v14 = vmax.f32 %v1609_v53, 0.0 }
 0x1dc   : > { %v1785_v19 = vpack.c.bf16 %v1733_v12, %v1731_v8 }
 0x1dd   : > { %v1786_v26 = vpack.c.bf16 %v1734_v14, %v1732_v52 }
 0x1df   : > { %2093 = vmatprep.mubr.bf16.mxu1 %v1786_v26 }
 0x1e0   : > { %2094 = vmatmul.mubr.bf16.gmra.mrb[20].mxu1 %v1785_v19 }
 0x1e8   : > { %v1612_v13 = vpop.f32.mrb[24].mxu0 }
 0x1e9   : > { %v1613_v60 = vadd.f32 %v1612_v13, %v3981_v17  ;;  %v1614_v62 = vpop.f32.mrb[25].mxu0 }
 0x1ea   : > { %v1615_v27 = vadd.f32 %v1614_v62, %v3984_v40  ;;  %v1616_v15 = vpop.f32.mrb[26].mxu0 }
 0x1eb   : > { %v1617_v63 = vadd.f32 %v1616_v15, %v3981_v17  ;;  %v1618_v29 = vpop.f32.mrb[27].mxu0  ;;  %v1735_v31 = vmax.f32 %v1613_v60, 0.0 }
 0x1ec   : > { %v1619_v30 = vadd.f32 %v1618_v29, %v3984_v40  ;;  %v1736_v61 = vmax.f32 %v1615_v27, 0.0 }
 0x1ed   : > { %v1737_v16 = vmax.f32 %v1617_v63, 0.0 }
 0x1ee   : > { %v1738_v54 = vmax.f32 %v1619_v30, 0.0 }
 0x1ef   : > { %v1787_v55 = vpack.c.bf16 %v1737_v16, %v1735_v31 }
 0x1f0   : > { %v1788_v22 = vpack.c.bf16 %v1738_v54, %v1736_v61 }
 0x1f2   : > { %2103 = vmatprep.mubr.bf16.mxu1 %v1788_v22 }
 0x1f3   : > { %2104 = vmatmul.mubr.bf16.gmra.mrb[24].mxu1 %v1787_v55 }
 0x1fb   : > { %v1622_v6 = vpop.f32.mrb[28].mxu0 }
 0x1fc   : > { %v1623_v32 = vadd.f32 %v1622_v6, %v3981_v17  ;;  %v1624_v34 = vpop.f32.mrb[29].mxu0 }
 0x1fd   : > { %v1625_v36 = vadd.f32 %v1624_v34, %v3984_v40  ;;  %v1626_v56 = vpop.f32.mrb[30].mxu0 }
 0x1fe   : > { %v1627_v39 = vadd.f32 %v1626_v56, %v3981_v17  ;;  %v1628_v38 = vpop.f32.mrb[31].mxu0  ;;  %v1739_v18 = vmax.f32 %v1623_v32, 0.0 }
 0x1ff   : > { %v1629_v41 = vadd.f32 %v1628_v38, %v3984_v40  ;;  %v1740_v43 = vmax.f32 %v1625_v36, 0.0 }
 0x200   : > { %v1741_v23 = vmax.f32 %v1627_v39, 0.0 }
 0x201   : > { %v1742_v58 = vmax.f32 %v1629_v41, 0.0 }
 0x202   : > { %v1789_v20 = vpack.c.bf16 %v1741_v23, %v1739_v18 }
 0x203   : > { %v1790_v7 = vpack.c.bf16 %v1742_v58, %v1740_v43 }
 0x205   : > { %2113 = vmatprep.mubr.bf16.mxu1 %v1790_v7  ;;  %v1839_v7 = vld [vmem:[%s4573_s6] sm:$0x3] }
 0x206   : > { %2114 = vmatmul.mubr.bf16.gmra.mrb[28].mxu1 %v1789_v20 }
 0x20e   : > { %v1632_v21 = vpop.f32.mrb[32].mxu0 }
 0x20f   : > { %v1633_v59 = vadd.f32 %v1632_v21, %v3981_v17  ;;  %v1634_v35 = vpop.f32.mrb[33].mxu0 }
 0x210   : > { %v1635_v44 = vadd.f32 %v1634_v35, %v3984_v40  ;;  %v1636_v2 = vpop.f32.mrb[34].mxu0 }
 0x211   : > { %v1637_v45 = vadd.f32 %v1636_v2, %v3981_v17  ;;  %v1638_v1 = vpop.f32.mrb[35].mxu0  ;;  %v1743_v46 = vmax.f32 %v1633_v59, 0.0 }
 0x212   : > { %v1639_v28 = vadd.f32 %v1638_v1, %v3984_v40  ;;  %v1744_v51 = vmax.f32 %v1635_v44, 0.0  ;;  %v2268_v1 = vld [vmem:[%s4574_s7] ss:$4 sm:$0x3] }
 0x213   : > { %v1745_v33 = vmax.f32 %v1637_v45, 0.0  ;;  %v4092_v45 = vrot.slane %v1839_v7, %v3520_v9 }
 0x214   : > { %v1746_v49 = vmax.f32 %v1639_v28, 0.0  ;;  %v3055_v28 = vld [vmem:[%s4574_s7 + $0x1] ss:$4 sm:$0x3] }
 0x215   : > { %v1791_v50 = vpack.c.bf16 %v1745_v33, %v1743_v46 }
 0x216   : > { %v1792_v42 = vpack.c.bf16 %v1746_v49, %v1744_v51  ;;  %v4101_v51 = vrot.slane %v1839_v7, %v3522_v10  ;;  %v3056_v49 = vld [vmem:[%s4574_s7 + $0x2] ss:$4 sm:$0x3] }
 0x218   : > { %2123 = vmatprep.mubr.bf16.mxu1 %v1792_v42 }
 0x219   : > { %2124 = vmatmul.mubr.bf16.gmra.mrb[32].mxu1 %v1791_v50 }
 0x221   : > { %v1642_v11 = vpop.f32.mrb[36].mxu0 }
 0x222   : > { %v1643_v24 = vadd.f32 %v1642_v11, %v3981_v17  ;;  %v1644_v37 = vpop.f32.mrb[37].mxu0 }
 0x223   : > { %v1645_v57 = vadd.f32 %v1644_v37, %v3984_v40  ;;  %v1646_v25 = vpop.f32.mrb[38].mxu0  ;;  %v4107_v37 = vrot.slane %v2268_v1, %v3520_v9 }
 0x224   : > { %v1647_v3 = vadd.f32 %v1646_v25, %v3981_v17  ;;  %v1648_v4 = vpop.f32.mrb[39].mxu0  ;;  %v1747_v48 = vmax.f32 %v1643_v24, 0.0 }
 0x225   : > { %v1649_v5 = vadd.f32 %v1648_v4, %v3984_v40  ;;  %v1748_v0 = vmax.f32 %v1645_v57, 0.0  ;;  %v4111_v4 = vrot.slane %v3055_v28, %v3520_v9 }
 0x226   : > { %v1749_v47 = vmax.f32 %v1647_v3, 0.0 }
 0x227   : > { %v1750_v53 = vmax.f32 %v1649_v5, 0.0  ;;  %v4114_v5 = vrot.slane %v3056_v49, %v3520_v9 }
 0x228   : > { %v1793_v8 = vpack.c.bf16 %v1749_v47, %v1747_v48  ;;  %v4118_v47 = vrot.slane %v2268_v1, %v3522_v10 }
 0x229   : > { %v1794_v12 = vpack.c.bf16 %v1750_v53, %v1748_v0  ;;  %v4121_v53 = vrot.slane %v3055_v28, %v3522_v10 }
 0x22b   : > { %2133 = vmatprep.mubr.bf16.mxu1 %v1794_v12 }
 0x22c   : > { %2134 = vmatmul.mubr.bf16.gmra.mrb[36].mxu1 %v1793_v8  ;;  %v4124_v8 = vrot.slane %v3056_v49, %v3522_v10 }
 0x234   : > { %v1652_v52 = vpop.f32.mrb[40].mxu0 }
 0x235   : > { %v1653_v14 = vadd.f32 %v1652_v52, %v3981_v17  ;;  %v1654_v19 = vpop.f32.mrb[41].mxu0 }
 0x236   : > { %v1655_v26 = vadd.f32 %v1654_v19, %v3984_v40  ;;  %v1656_v13 = vpop.f32.mrb[42].mxu0 }
 0x237   : > { %v1657_v60 = vadd.f32 %v1656_v13, %v3981_v17  ;;  %v1658_v62 = vpop.f32.mrb[43].mxu0  ;;  %v1751_v15 = vmax.f32 %v1653_v14, 0.0 }
 0x238   : > { %v1659_v27 = vadd.f32 %v1658_v62, %v3984_v40  ;;  %v1752_v29 = vmax.f32 %v1655_v26, 0.0 }
 0x239   : > { %v1753_v63 = vmax.f32 %v1657_v60, 0.0 }
 0x23a   : > { %v1754_v30 = vmax.f32 %v1659_v27, 0.0 }
 0x23b   : > { %v1795_v31 = vpack.c.bf16 %v1753_v63, %v1751_v15 }
 0x23c   : > { %v1796_v16 = vpack.c.bf16 %v1754_v30, %v1752_v29 }
 0x23e   : > { %2143 = vmatprep.mubr.bf16.mxu1 %v1796_v16 }
 0x23f   : > { %2144 = vmatmul.mubr.bf16.gmra.mrb[40].mxu1 %v1795_v31 }
 0x247   : > { %v1662_v61 = vpop.f32.mrb[44].mxu0 }
 0x248   : > { %v1663_v54 = vadd.f32 %v1662_v61, %v3981_v17  ;;  %v1664_v55 = vpop.f32.mrb[45].mxu0 }
 0x249   : > { %v1665_v22 = vadd.f32 %v1664_v55, %v3984_v40  ;;  %v1666_v6 = vpop.f32.mrb[46].mxu0 }
 0x24a   : > { %v1667_v32 = vadd.f32 %v1666_v6, %v3981_v17  ;;  %v1668_v34 = vpop.f32.mrb[47].mxu0  ;;  %v1755_v56 = vmax.f32 %v1663_v54, 0.0 }
 0x24b   : > { %v1669_v36 = vadd.f32 %v1668_v34, %v3984_v40  ;;  %v1756_v38 = vmax.f32 %v1665_v22, 0.0 }
 0x24c   : > { %v1757_v39 = vmax.f32 %v1667_v32, 0.0 }
 0x24d   : > { %v1758_v41 = vmax.f32 %v1669_v36, 0.0 }
 0x24e   : > { %v1797_v18 = vpack.c.bf16 %v1757_v39, %v1755_v56 }
 0x24f   : > { %v1798_v23 = vpack.c.bf16 %v1758_v41, %v1756_v38 }
 0x251   : > { %2153 = vmatprep.mubr.bf16.mxu1 %v1798_v23 }
 0x252   : > { %2154 = vmatmul.mubr.bf16.gmra.mrb[44].mxu1 %v1797_v18 }
 0x25a   : > { %v1672_v43 = vpop.f32.mrb[48].mxu0 }
 0x25b   : > { %v1673_v58 = vadd.f32 %v1672_v43, %v3981_v17  ;;  %v1674_v20 = vpop.f32.mrb[49].mxu0 }
 0x25c   : > { %v1675_v21 = vadd.f32 %v1674_v20, %v3984_v40  ;;  %v1676_v59 = vpop.f32.mrb[50].mxu0 }
 0x25d   : > { %v1677_v35 = vadd.f32 %v1676_v59, %v3981_v17  ;;  %v1678_v44 = vpop.f32.mrb[51].mxu0  ;;  %v1759_v46 = vmax.f32 %v1673_v58, 0.0 }
 0x25e   : > { %v1679_v2 = vadd.f32 %v1678_v44, %v3984_v40  ;;  %v1760_v50 = vmax.f32 %v1675_v21, 0.0 }
 0x25f   : > { %v1761_v33 = vmax.f32 %v1677_v35, 0.0 }
 0x260   : > { %v1762_v42 = vmax.f32 %v1679_v2, 0.0 }
 0x261   : > { %v1799_v11 = vpack.c.bf16 %v1761_v33, %v1759_v46  ;;  %v2045_v24 = vpop.f32.mrb[0].mxu1 }
 0x262   : > { %v1800_v57 = vpack.c.bf16 %v1762_v42, %v1760_v50  ;;  %v2046_v25 = vadd.f32 %v2045_v24, %v4092_v45  ;;  %v2047_v3 = vpop.f32.mrb[1].mxu1 }
 0x263   : > { %v2048_v48 = vadd.f32 %v2047_v3, %v4101_v51  ;;  %v2049_v0 = vpop.f32.mrb[2].mxu1 }
 0x264   : > { %v2204_v12 = vmax.f32 %v2046_v25, 0.0  ;;  %v2050_v52 = vadd.f32 %v2049_v0, %v4092_v45  ;;  %v2051_v14 = vpop.f32.mrb[3].mxu1  ;;  %2163 = vmatprep.mubr.bf16.mxu1 %v1800_v57 }
 0x265   : > { %v2205_v19 = vmax.f32 %v2048_v48, 0.0  ;;  %v2052_v9 = vadd.f32 %v2051_v14, %v4101_v51  ;;  %2164 = vmatmul.mubr.bf16.gmra.mrb[48].mxu1 %v1799_v11 }
 0x266   : > { %v2280_v26 = vmul.f32 %v4107_v37, %v2204_v12  ;;  %v2206_v13 = vmax.f32 %v2050_v52, 0.0  ;;  %v2453_v60 = vmul.f32 %v4111_v4, %v2204_v12  ;;  %v2626_v62 = vmul.f32 %v4114_v5, %v2204_v12 }
 0x267   : > { %v2281_v27 = vmul.f32 %v4118_v47, %v2205_v19  ;;  %v2207_v10 = vmax.f32 %v2052_v9, 0.0  ;;  %v2454_v15 = vmul.f32 %v4121_v53, %v2205_v19  ;;  %v2627_v63 = vmul.f32 %v4124_v8, %v2205_v19 }
 0x268   : > { %v2455_v29 = vmul.f32 %v4111_v4, %v2206_v13  ;;  %v2628_v30 = vmul.f32 %v4114_v5, %v2206_v13  ;;  %v2282_v31 = vmul.f32 %v4107_v37, %v2206_v13 }
 0x269   : > { %v2456_v16 = vmul.f32 %v4121_v53, %v2207_v10  ;;  %v2629_v61 = vmul.f32 %v4124_v8, %v2207_v10  ;;  %v2055_v54 = vpop.f32.mrb[4].mxu1  ;;  %v2517_v55 = vadd.f32 %v2454_v15, %v2453_v60  ;;  %v2344_v22 = vadd.f32 %v2281_v27, %v2280_v26 }
 0x26a   : > { %v2056_v6 = vadd.f32 %v2055_v54, %v4092_v45  ;;  %v2057_v32 = vpop.f32.mrb[5].mxu1  ;;  %v2690_v34 = vadd.f32 %v2627_v63, %v2626_v62  ;;  %v2283_v36 = vmul.f32 %v4118_v47, %v2207_v10 }
 0x26b   : > { %v2058_v56 = vadd.f32 %v2057_v32, %v4101_v51  ;;  %2518 = vadd.xlane.f32.xlu0 %v2517_v55  ;;  %v2059_v39 = vpop.f32.mrb[6].mxu1  ;;  %2345 = vadd.xlane.f32.xlu1 %v2344_v22  ;;  %v2520_v38 = vadd.f32 %v2456_v16, %v2455_v29  ;;  %v2693_v41 = vadd.f32 %v2629_v61, %v2628_v30 }
 0x26c   : > { %v2208_v18 = vmax.f32 %v2056_v6, 0.0  ;;  %v2060_v23 = vadd.f32 %v2059_v39, %v4092_v45  ;;  %v2061_v43 = vpop.f32.mrb[7].mxu1  ;;  %v2347_v58 = vadd.f32 %v2283_v36, %v2282_v31 }
 0x26d   : > { %v2209_v20 = vmax.f32 %v2058_v56, 0.0  ;;  %v2062_v7 = vadd.f32 %v2061_v43, %v4101_v51  ;;  %v1682_v21 = vpop.f32.mrb[52].mxu0 }
 0x26e   : > { %v2210_v59 = vmax.f32 %v2060_v23, 0.0  ;;  %v1683_v35 = vadd.f32 %v1682_v21, %v3981_v17  ;;  %v1684_v44 = vpop.f32.mrb[53].mxu0  ;;  %v2284_v2 = vmul.f32 %v4107_v37, %v2208_v18  ;;  %v2457_v1 = vmul.f32 %v4111_v4, %v2208_v18 }
 0x26f   : > { %v2211_v28 = vmax.f32 %v2062_v7, 0.0  ;;  %2691 = vadd.xlane.f32.xlu0 %v2690_v34  ;;  %2521 = vadd.xlane.f32.xlu1 %v2520_v38  ;;  %v1685_v46 = vadd.f32 %v1684_v44, %v3984_v40  ;;  %v1686_v33 = vpop.f32.mrb[54].mxu0  ;;  %v2285_v49 = vmul.f32 %v4118_v47, %v2209_v20  ;;  %v2458_v50 = vmul.f32 %v4121_v53, %v2209_v20 }
 0x270   : > { %v2286_v42 = vmul.f32 %v4107_v37, %v2210_v59  ;;  %v2459_v11 = vmul.f32 %v4111_v4, %v2210_v59  ;;  %v2632_v24 = vmul.f32 %v4114_v5, %v2210_v59  ;;  %v1688_v57 = vpop.f32.mrb[55].mxu0  ;;  %v1763_v0 = vmax.f32 %v1683_v35, 0.0 }
 0x271   : > { %v2287_v25 = vmul.f32 %v4118_v47, %v2211_v28  ;;  %v2460_v3 = vmul.f32 %v4121_v53, %v2211_v28  ;;  %v2633_v48 = vmul.f32 %v4124_v8, %v2211_v28  ;;  %v1687_v12 = vadd.f32 %v1686_v33, %v3981_v17 }
 0x272   : > { %v1689_v52 = vadd.f32 %v1688_v57, %v3984_v40  ;;  %v2350_v14 = vadd.f32 %v2285_v49, %v2284_v2  ;;  %v2523_v19 = vadd.f32 %v2458_v50, %v2457_v1  ;;  %v1764_v9 = vmax.f32 %v1685_v46, 0.0 }
 0x273   : > { %2348 = vadd.xlane.f32.xlu0 %v2347_v58  ;;  %2694 = vadd.xlane.f32.xlu1 %v2693_v41  ;;  %v2353_v26 = vadd.f32 %v2287_v25, %v2286_v42  ;;  %v2526_v13 = vadd.f32 %v2460_v3, %v2459_v11  ;;  %v2630_v60 = vmul.f32 %v4114_v5, %v2208_v18  ;;  %v1765_v62 = vmax.f32 %v1687_v12, 0.0 }
 0x274   : > { %v1766_v27 = vmax.f32 %v1689_v52, 0.0  ;;  %v2631_v10 = vmul.f32 %v4124_v8, %v2209_v20  ;;  %v2699_v15 = vadd.f32 %v2633_v48, %v2632_v24 }
 0x275   : > { %v1801_v63 = vpack.c.bf16 %v1765_v62, %v1763_v0 }
 0x276   : > { %v1802_v29 = vpack.c.bf16 %v1766_v27, %v1764_v9  ;;  %v2696_v30 = vadd.f32 %v2631_v10, %v2630_v60 }
 0x277   : > { %2351 = vadd.xlane.f32.xlu0 %v2350_v14  ;;  %2354 = vadd.xlane.f32.xlu1 %v2353_v26 }
 0x278   : > { %2173 = vmatprep.mubr.bf16.mxu1 %v1802_v29 }
 0x279   : > { %2174 = vmatmul.mubr.bf16.gmra.mrb[52].mxu1 %v1801_v63 }
 0x27a   : > { %v2065_v31 = vpop.f32.mrb[8].mxu1 }
 0x27b   : > { %2524 = vadd.xlane.f32.xlu0 %v2523_v19  ;;  %v2066_v16 = vadd.f32 %v2065_v31, %v4092_v45  ;;  %2527 = vadd.xlane.f32.xlu1 %v2526_v13  ;;  %v2067_v61 = vpop.f32.mrb[9].mxu1 }
 0x27c   : > { %v2068_v54 = vadd.f32 %v2067_v61, %v4101_v51  ;;  %v2069_v55 = vpop.f32.mrb[10].mxu1 }
 0x27d   : > { %v2212_v22 = vmax.f32 %v2066_v16, 0.0  ;;  %v2070_v6 = vadd.f32 %v2069_v55, %v4092_v45  ;;  %v2071_v32 = vpop.f32.mrb[11].mxu1 }
 0x27e   : > { %v2213_v34 = vmax.f32 %v2068_v54, 0.0  ;;  %v2072_v36 = vadd.f32 %v2071_v32, %v4101_v51 }
 0x27f   : > { %v2214_v56 = vmax.f32 %v2070_v6, 0.0  ;;  %2697 = vadd.xlane.f32.xlu0 %v2696_v30  ;;  %2700 = vadd.xlane.f32.xlu1 %v2699_v15  ;;  %v2288_v39 = vmul.f32 %v4107_v37, %v2212_v22  ;;  %v2461_v38 = vmul.f32 %v4111_v4, %v2212_v22  ;;  %v2634_v41 = vmul.f32 %v4114_v5, %v2212_v22 }
 0x280   : > { %v2215_v18 = vmax.f32 %v2072_v36, 0.0  ;;  %v1692_v23 = vpop.f32.mrb[56].mxu0  ;;  %v2289_v43 = vmul.f32 %v4118_v47, %v2213_v34  ;;  %v2462_v58 = vmul.f32 %v4121_v53, %v2213_v34  ;;  %v2635_v20 = vmul.f32 %v4124_v8, %v2213_v34 }
 0x281   : > { %v2290_v7 = vmul.f32 %v4107_v37, %v2214_v56  ;;  %v2463_v21 = vmul.f32 %v4111_v4, %v2214_v56  ;;  %v2636_v59 = vmul.f32 %v4114_v5, %v2214_v56  ;;  %v1693_v35 = vadd.f32 %v1692_v23, %v3981_v17  ;;  %v1694_v44 = vpop.f32.mrb[57].mxu0 }
 0x282   : > { %v2291_v2 = vmul.f32 %v4118_v47, %v2215_v18  ;;  %v2464_v1 = vmul.f32 %v4121_v53, %v2215_v18  ;;  %v2637_v28 = vmul.f32 %v4124_v8, %v2215_v18  ;;  %v1695_v46 = vadd.f32 %v1694_v44, %v3984_v40  ;;  %v1696_v33 = vpop.f32.mrb[58].mxu0 }
 0x283   : > { %v1697_v49 = vadd.f32 %v1696_v33, %v3981_v17  ;;  %v1698_v50 = vpop.f32.mrb[59].mxu0  ;;  %v2356_v42 = vadd.f32 %v2289_v43, %v2288_v39  ;;  %v2529_v11 = vadd.f32 %v2462_v58, %v2461_v38  ;;  %v1767_v3 = vmax.f32 %v1693_v35, 0.0 }
 0x284   : > { %v1699_v24 = vadd.f32 %v1698_v50, %v3984_v40  ;;  %v2359_v57 = vadd.f32 %v2291_v2, %v2290_v7  ;;  %v2532_v25 = vadd.f32 %v2464_v1, %v2463_v21  ;;  %v2702_v0 = vadd.f32 %v2635_v20, %v2634_v41 }
 0x285   : > { %v1769_v48 = vmax.f32 %v1697_v49, 0.0  ;;  %2357 = vadd.xlane.f32.xlu0 %v2356_v42  ;;  %v2705_v12 = vadd.f32 %v2637_v28, %v2636_v59  ;;  %v1768_v52 = vmax.f32 %v1695_v46, 0.0 }
 0x286   : > { %v1770_v14 = vmax.f32 %v1699_v24, 0.0  ;;  %2360 = vadd.xlane.f32.xlu1 %v2359_v57 }
 0x287   : > { %v1803_v19 = vpack.c.bf16 %v1769_v48, %v1767_v3 }
 0x288   : > { %v1804_v9 = vpack.c.bf16 %v1770_v14, %v1768_v52 }
 0x289   : > { %2530 = vadd.xlane.f32.xlu0 %v2529_v11 }
 0x28a   : > { %2533 = vadd.xlane.f32.xlu1 %v2532_v25  ;;  %2183 = vmatprep.mubr.bf16.mxu1 %v1804_v9 }
 0x28b   : > { %2184 = vmatmul.mubr.bf16.gmra.mrb[56].mxu1 %v1803_v19 }
 0x28d   : > { %2703 = vadd.xlane.f32.xlu0 %v2702_v0  ;;  %v2075_v26 = vpop.f32.mrb[12].mxu1 }
 0x28e   : > { %v2076_v13 = vadd.f32 %v2075_v26, %v4092_v45  ;;  %v2077_v60 = vpop.f32.mrb[13].mxu1  ;;  %2706 = vadd.xlane.f32.xlu1 %v2705_v12 }
 0x28f   : > { %v2078_v62 = vadd.f32 %v2077_v60, %v4101_v51  ;;  %v2079_v27 = vpop.f32.mrb[14].mxu1 }
 0x290   : > { %v2216_v10 = vmax.f32 %v2076_v13, 0.0  ;;  %v2080_v15 = vadd.f32 %v2079_v27, %v4092_v45  ;;  %v2081_v63 = vpop.f32.mrb[15].mxu1 }
 0x291   : > { %v2217_v29 = vmax.f32 %v2078_v62, 0.0  ;;  %v2082_v30 = vadd.f32 %v2081_v63, %v4101_v51 }
 0x292   : > { %v2218_v31 = vmax.f32 %v2080_v15, 0.0  ;;  %v2292_v16 = vmul.f32 %v4107_v37, %v2216_v10  ;;  %v2465_v61 = vmul.f32 %v4111_v4, %v2216_v10  ;;  %v2638_v54 = vmul.f32 %v4114_v5, %v2216_v10 }
 0x293   : > { %v2219_v55 = vmax.f32 %v2082_v30, 0.0  ;;  %v1702_v22 = vpop.f32.mrb[60].mxu0  ;;  %v2293_v6 = vmul.f32 %v4118_v47, %v2217_v29  ;;  %v2466_v32 = vmul.f32 %v4121_v53, %v2217_v29  ;;  %v2639_v34 = vmul.f32 %v4124_v8, %v2217_v29 }
 0x294   : > { %v2294_v36 = vmul.f32 %v4107_v37, %v2218_v31  ;;  %v2467_v56 = vmul.f32 %v4111_v4, %v2218_v31  ;;  %v2640_v39 = vmul.f32 %v4114_v5, %v2218_v31  ;;  %v1703_v38 = vadd.f32 %v1702_v22, %v3981_v17  ;;  %v1704_v41 = vpop.f32.mrb[61].mxu0 }
 0x295   : > { %v2295_v18 = vmul.f32 %v4118_v47, %v2219_v55  ;;  %v2468_v23 = vmul.f32 %v4121_v53, %v2219_v55  ;;  %v2641_v43 = vmul.f32 %v4124_v8, %v2219_v55  ;;  %v1705_v58 = vadd.f32 %v1704_v41, %v3984_v40  ;;  %v1706_v20 = vpop.f32.mrb[62].mxu0 }
 0x296   : > { %v1707_v7 = vadd.f32 %v1706_v20, %v3981_v17  ;;  %v1708_v21 = vpop.f32.mrb[63].mxu0  ;;  %v2362_v59 = vadd.f32 %v2293_v6, %v2292_v16  ;;  %v2535_v35 = vadd.f32 %v2466_v32, %v2465_v61  ;;  %v1771_v28 = vmax.f32 %v1703_v38, 0.0 }
 0x297   : > { %v1709_v44 = vadd.f32 %v1708_v21, %v3984_v40  ;;  %v2365_v2 = vadd.f32 %v2295_v18, %v2294_v36  ;;  %v2538_v1 = vadd.f32 %v2468_v23, %v2467_v56  ;;  %v2708_v33 = vadd.f32 %v2639_v34, %v2638_v54 }
 0x298   : > { %v1773_v46 = vmax.f32 %v1707_v7, 0.0  ;;  %2363 = vadd.xlane.f32.xlu0 %v2362_v59  ;;  %v2711_v49 = vadd.f32 %v2641_v43, %v2640_v39  ;;  %v1772_v50 = vmax.f32 %v1705_v58, 0.0 }
 0x299   : > { %v1774_v42 = vmax.f32 %v1709_v44, 0.0  ;;  %2366 = vadd.xlane.f32.xlu1 %v2365_v2 }
 0x29a   : > { %v1805_v11 = vpack.c.bf16 %v1773_v46, %v1771_v28 }
 0x29b   : > { %v1806_v24 = vpack.c.bf16 %v1774_v42, %v1772_v50 }
 0x29c   : > { %2536 = vadd.xlane.f32.xlu0 %v2535_v35 }
 0x29d   : > { %2539 = vadd.xlane.f32.xlu1 %v2538_v1  ;;  %2193 = vmatprep.mubr.bf16.mxu1 %v1806_v24 }
 0x29e   : > { %2194 = vmatmul.mubr.bf16.gmra.mrb[60].mxu1 %v1805_v11 }
 0x2a0   : > { %2709 = vadd.xlane.f32.xlu0 %v2708_v33  ;;  %v2085_v17 = vpop.f32.mrb[16].mxu1 }
 0x2a1   : > { %v2086_v40 = vadd.f32 %v2085_v17, %v4092_v45  ;;  %v2087_v57 = vpop.f32.mrb[17].mxu1  ;;  %2712 = vadd.xlane.f32.xlu1 %v2711_v49 }
 0x2a2   : > { %v2088_v25 = vadd.f32 %v2087_v57, %v4101_v51  ;;  %v2089_v3 = vpop.f32.mrb[18].mxu1 }
 0x2a3   : > { %v2220_v48 = vmax.f32 %v2086_v40, 0.0  ;;  %v2090_v0 = vadd.f32 %v2089_v3, %v4092_v45  ;;  %v2091_v12 = vpop.f32.mrb[19].mxu1 }
 0x2a4   : > { %v2221_v52 = vmax.f32 %v2088_v25, 0.0  ;;  %v2092_v14 = vadd.f32 %v2091_v12, %v4101_v51 }
 0x2a5   : > { %v2222_v19 = vmax.f32 %v2090_v0, 0.0  ;;  %v2296_v9 = vmul.f32 %v4107_v37, %v2220_v48  ;;  %v2469_v26 = vmul.f32 %v4111_v4, %v2220_v48  ;;  %v2642_v13 = vmul.f32 %v4114_v5, %v2220_v48 }
 0x2a6   : > { %v2223_v60 = vmax.f32 %v2092_v14, 0.0  ;;  %v2297_v62 = vmul.f32 %v4118_v47, %v2221_v52  ;;  %v2470_v27 = vmul.f32 %v4121_v53, %v2221_v52  ;;  %v2643_v10 = vmul.f32 %v4124_v8, %v2221_v52 }
 0x2a7   : > { %v2298_v15 = vmul.f32 %v4107_v37, %v2222_v19  ;;  %v2471_v63 = vmul.f32 %v4111_v4, %v2222_v19  ;;  %v2644_v29 = vmul.f32 %v4114_v5, %v2222_v19 }
 0x2a8   : > { %v2299_v30 = vmul.f32 %v4118_v47, %v2223_v60  ;;  %v2472_v31 = vmul.f32 %v4121_v53, %v2223_v60  ;;  %v2645_v16 = vmul.f32 %v4124_v8, %v2223_v60  ;;  %v2368_v61 = vadd.f32 %v2297_v62, %v2296_v9 }
 0x2a9   : > { %v2541_v54 = vadd.f32 %v2470_v27, %v2469_v26  ;;  %v2714_v55 = vadd.f32 %v2643_v10, %v2642_v13 }
 0x2aa   : > { %2369 = vadd.xlane.f32.xlu0 %v2368_v61  ;;  %v2371_v22 = vadd.f32 %v2299_v30, %v2298_v15  ;;  %v2544_v6 = vadd.f32 %v2472_v31, %v2471_v63  ;;  %v2717_v32 = vadd.f32 %v2645_v16, %v2644_v29 }
 0x2ac   : > { %2372 = vadd.xlane.f32.xlu1 %v2371_v22 }
 0x2ae   : > { %2542 = vadd.xlane.f32.xlu0 %v2541_v54 }
 0x2b0   : > { %2545 = vadd.xlane.f32.xlu1 %v2544_v6 }
 0x2b2   : > { %2715 = vadd.xlane.f32.xlu0 %v2714_v55 }
 0x2b3   : > { %v2095_v34 = vpop.f32.mrb[20].mxu1 }
 0x2b4   : > { %v2096_v36 = vadd.f32 %v2095_v34, %v4092_v45  ;;  %v2097_v56 = vpop.f32.mrb[21].mxu1  ;;  %2718 = vadd.xlane.f32.xlu1 %v2717_v32 }
 0x2b5   : > { %v2098_v39 = vadd.f32 %v2097_v56, %v4101_v51  ;;  %v2099_v38 = vpop.f32.mrb[22].mxu1 }
 0x2b6   : > { %v2224_v41 = vmax.f32 %v2096_v36, 0.0  ;;  %v2100_v18 = vadd.f32 %v2099_v38, %v4092_v45  ;;  %v2101_v23 = vpop.f32.mrb[23].mxu1 }
 0x2b7   : > { %v2225_v43 = vmax.f32 %v2098_v39, 0.0  ;;  %v2102_v58 = vadd.f32 %v2101_v23, %v4101_v51 }
 0x2b8   : > { %v2473_v20 = vmul.f32 %v4111_v4, %v2224_v41  ;;  %v2646_v7 = vmul.f32 %v4114_v5, %v2224_v41  ;;  %v2226_v21 = vmax.f32 %v2100_v18, 0.0  ;;  %v2300_v59 = vmul.f32 %v4107_v37, %v2224_v41 }
 0x2b9   : > { %v2474_v35 = vmul.f32 %v4121_v53, %v2225_v43  ;;  %v2647_v44 = vmul.f32 %v4124_v8, %v2225_v43  ;;  %v2227_v2 = vmax.f32 %v2102_v58, 0.0  ;;  %v2301_v1 = vmul.f32 %v4118_v47, %v2225_v43 }
 0x2ba   : > { %v2302_v28 = vmul.f32 %v4107_v37, %v2226_v21  ;;  %v2475_v46 = vmul.f32 %v4111_v4, %v2226_v21  ;;  %v2648_v33 = vmul.f32 %v4114_v5, %v2226_v21 }
 0x2bb   : > { %v2303_v49 = vmul.f32 %v4118_v47, %v2227_v2  ;;  %v2476_v50 = vmul.f32 %v4121_v53, %v2227_v2  ;;  %v2649_v42 = vmul.f32 %v4124_v8, %v2227_v2  ;;  %v2374_v11 = vadd.f32 %v2301_v1, %v2300_v59 }
 0x2bc   : > { %v2547_v24 = vadd.f32 %v2474_v35, %v2473_v20  ;;  %v2720_v17 = vadd.f32 %v2647_v44, %v2646_v7 }
 0x2bd   : > { %2375 = vadd.xlane.f32.xlu0 %v2374_v11  ;;  %v2377_v40 = vadd.f32 %v2303_v49, %v2302_v28  ;;  %v2550_v57 = vadd.f32 %v2476_v50, %v2475_v46  ;;  %v2723_v25 = vadd.f32 %v2649_v42, %v2648_v33 }
 0x2bf   : > { %2378 = vadd.xlane.f32.xlu1 %v2377_v40 }
 0x2c1   : > { %2548 = vadd.xlane.f32.xlu0 %v2547_v24 }
 0x2c3   : > { %2551 = vadd.xlane.f32.xlu1 %v2550_v57 }
 0x2c5   : > { %2721 = vadd.xlane.f32.xlu0 %v2720_v17 }
 0x2c6   : > { %v2105_v3 = vpop.f32.mrb[24].mxu1 }
 0x2c7   : > { %v2106_v48 = vadd.f32 %v2105_v3, %v4092_v45  ;;  %v2107_v0 = vpop.f32.mrb[25].mxu1  ;;  %2724 = vadd.xlane.f32.xlu1 %v2723_v25 }
 0x2c8   : > { %v2108_v12 = vadd.f32 %v2107_v0, %v4101_v51  ;;  %v2109_v52 = vpop.f32.mrb[26].mxu1 }
 0x2c9   : > { %v2228_v14 = vmax.f32 %v2106_v48, 0.0  ;;  %v2110_v19 = vadd.f32 %v2109_v52, %v4092_v45  ;;  %v2111_v9 = vpop.f32.mrb[27].mxu1 }
 0x2ca   : > { %v2229_v26 = vmax.f32 %v2108_v12, 0.0  ;;  %v2112_v13 = vadd.f32 %v2111_v9, %v4101_v51 }
 0x2cb   : > { %v2304_v60 = vmul.f32 %v4107_v37, %v2228_v14  ;;  %v2477_v62 = vmul.f32 %v4111_v4, %v2228_v14  ;;  %v2650_v27 = vmul.f32 %v4114_v5, %v2228_v14  ;;  %v2230_v10 = vmax.f32 %v2110_v19, 0.0 }
 0x2cc   : > { %v2305_v15 = vmul.f32 %v4118_v47, %v2229_v26  ;;  %v2478_v63 = vmul.f32 %v4121_v53, %v2229_v26  ;;  %v2651_v29 = vmul.f32 %v4124_v8, %v2229_v26  ;;  %v2231_v30 = vmax.f32 %v2112_v13, 0.0 }
 0x2cd   : > { %v2306_v31 = vmul.f32 %v4107_v37, %v2230_v10  ;;  %v2479_v16 = vmul.f32 %v4111_v4, %v2230_v10  ;;  %v2652_v61 = vmul.f32 %v4114_v5, %v2230_v10 }
 0x2ce   : > { %v2307_v54 = vmul.f32 %v4118_v47, %v2231_v30  ;;  %v2480_v55 = vmul.f32 %v4121_v53, %v2231_v30  ;;  %v2653_v22 = vmul.f32 %v4124_v8, %v2231_v30  ;;  %v2380_v6 = vadd.f32 %v2305_v15, %v2304_v60 }
 0x2cf   : > { %v2553_v32 = vadd.f32 %v2478_v63, %v2477_v62  ;;  %v2726_v34 = vadd.f32 %v2651_v29, %v2650_v27 }
 0x2d0   : > { %2381 = vadd.xlane.f32.xlu0 %v2380_v6  ;;  %v2383_v36 = vadd.f32 %v2307_v54, %v2306_v31  ;;  %v2556_v56 = vadd.f32 %v2480_v55, %v2479_v16  ;;  %v2729_v39 = vadd.f32 %v2653_v22, %v2652_v61 }
 0x2d2   : > { %2384 = vadd.xlane.f32.xlu1 %v2383_v36 }
 0x2d4   : > { %2554 = vadd.xlane.f32.xlu0 %v2553_v32 }
 0x2d6   : > { %2557 = vadd.xlane.f32.xlu1 %v2556_v56 }
 0x2d8   : > { %2727 = vadd.xlane.f32.xlu0 %v2726_v34 }
 0x2d9   : > { %v2115_v38 = vpop.f32.mrb[28].mxu1 }
 0x2da   : > { %v2116_v41 = vadd.f32 %v2115_v38, %v4092_v45  ;;  %v2117_v18 = vpop.f32.mrb[29].mxu1  ;;  %2730 = vadd.xlane.f32.xlu1 %v2729_v39 }
 0x2db   : > { %v2118_v23 = vadd.f32 %v2117_v18, %v4101_v51  ;;  %v2119_v43 = vpop.f32.mrb[30].mxu1 }
 0x2dc   : > { %v2232_v58 = vmax.f32 %v2116_v41, 0.0  ;;  %v2120_v20 = vadd.f32 %v2119_v43, %v4092_v45  ;;  %v2121_v7 = vpop.f32.mrb[31].mxu1 }
 0x2dd   : > { %v2233_v21 = vmax.f32 %v2118_v23, 0.0  ;;  %v2122_v59 = vadd.f32 %v2121_v7, %v4101_v51 }
 0x2de   : > { %v2308_v35 = vmul.f32 %v4107_v37, %v2232_v58  ;;  %v2481_v44 = vmul.f32 %v4111_v4, %v2232_v58  ;;  %v2654_v2 = vmul.f32 %v4114_v5, %v2232_v58  ;;  %v2234_v1 = vmax.f32 %v2120_v20, 0.0  ;;  %v4283_v20 = vld [vmem:[%s4575_s8] ss:$0 sm:$0xff] }
 0x2df   : > { %v2309_v28 = vmul.f32 %v4118_v47, %v2233_v21  ;;  %v2482_v46 = vmul.f32 %v4121_v53, %v2233_v21  ;;  %v2655_v33 = vmul.f32 %v4124_v8, %v2233_v21  ;;  %v2235_v49 = vmax.f32 %v2122_v59, 0.0 }
 0x2e0   : > { %v2310_v50 = vmul.f32 %v4107_v37, %v2234_v1  ;;  %v2483_v42 = vmul.f32 %v4111_v4, %v2234_v1  ;;  %v2656_v11 = vmul.f32 %v4114_v5, %v2234_v1 }
 0x2e1   : > { %v2311_v24 = vmul.f32 %v4118_v47, %v2235_v49  ;;  %v2484_v17 = vmul.f32 %v4121_v53, %v2235_v49  ;;  %v2657_v40 = vmul.f32 %v4124_v8, %v2235_v49  ;;  %v2386_v57 = vadd.f32 %v2309_v28, %v2308_v35 }
 0x2e2   : > { %v2559_v25 = vadd.f32 %v2482_v46, %v2481_v44  ;;  %v2732_v3 = vadd.f32 %v2655_v33, %v2654_v2 }
 0x2e3   : > { %2387 = vadd.xlane.f32.xlu0 %v2386_v57  ;;  %v2389_v48 = vadd.f32 %v2311_v24, %v2310_v50  ;;  %v2562_v0 = vadd.f32 %v2484_v17, %v2483_v42  ;;  %v2735_v12 = vadd.f32 %v2657_v40, %v2656_v11 }
 0x2e5   : > { %2390 = vadd.xlane.f32.xlu1 %v2389_v48 }
 0x2e7   : > { %2560 = vadd.xlane.f32.xlu0 %v2559_v25 }
 0x2e9   : > { %2563 = vadd.xlane.f32.xlu1 %v2562_v0 }
 0x2eb   : > { %2733 = vadd.xlane.f32.xlu0 %v2732_v3 }
 0x2ec   : > { %v2125_v52 = vpop.f32.mrb[32].mxu1 }
 0x2ed   : > { %v2126_v14 = vadd.f32 %v2125_v52, %v4092_v45  ;;  %v2127_v19 = vpop.f32.mrb[33].mxu1  ;;  %2736 = vadd.xlane.f32.xlu1 %v2735_v12 }
 0x2ee   : > { %v2128_v9 = vadd.f32 %v2127_v19, %v4101_v51  ;;  %v2129_v26 = vpop.f32.mrb[34].mxu1 }
 0x2ef   : > { %v2236_v13 = vmax.f32 %v2126_v14, 0.0  ;;  %v2130_v60 = vadd.f32 %v2129_v26, %v4092_v45  ;;  %v2131_v62 = vpop.f32.mrb[35].mxu1 }
 0x2f0   : > { %v2237_v27 = vmax.f32 %v2128_v9, 0.0  ;;  %v2132_v10 = vadd.f32 %v2131_v62, %v4101_v51 }
 0x2f1   : > { %v2312_v15 = vmul.f32 %v4107_v37, %v2236_v13  ;;  %v2485_v63 = vmul.f32 %v4111_v4, %v2236_v13  ;;  %v2658_v29 = vmul.f32 %v4114_v5, %v2236_v13  ;;  %v2238_v30 = vmax.f32 %v2130_v60, 0.0 }
 0x2f2   : > { %v2313_v31 = vmul.f32 %v4118_v47, %v2237_v27  ;;  %v2486_v16 = vmul.f32 %v4121_v53, %v2237_v27  ;;  %v2659_v61 = vmul.f32 %v4124_v8, %v2237_v27  ;;  %v2239_v54 = vmax.f32 %v2132_v10, 0.0 }
 0x2f3   : > { %v2314_v55 = vmul.f32 %v4107_v37, %v2238_v30  ;;  %v2487_v22 = vmul.f32 %v4111_v4, %v2238_v30  ;;  %v2660_v6 = vmul.f32 %v4114_v5, %v2238_v30 }
 0x2f4   : > { %v2315_v32 = vmul.f32 %v4118_v47, %v2239_v54  ;;  %v2488_v34 = vmul.f32 %v4121_v53, %v2239_v54  ;;  %v2661_v36 = vmul.f32 %v4124_v8, %v2239_v54  ;;  %v2392_v56 = vadd.f32 %v2313_v31, %v2312_v15 }
 0x2f5   : > { %v2565_v39 = vadd.f32 %v2486_v16, %v2485_v63  ;;  %v2738_v38 = vadd.f32 %v2659_v61, %v2658_v29 }
 0x2f6   : > { %2393 = vadd.xlane.f32.xlu0 %v2392_v56  ;;  %v2395_v41 = vadd.f32 %v2315_v32, %v2314_v55  ;;  %v2568_v18 = vadd.f32 %v2488_v34, %v2487_v22  ;;  %v2741_v23 = vadd.f32 %v2661_v36, %v2660_v6 }
 0x2f8   : > { %v2519_v43 = vpop.xlane.xlu0 %2518  ;;  %v2346_v58 = vpop.xlane.xlu1 %2345  ;;  %2396 = vadd.xlane.f32.xlu1 %v2395_v41 }
 0x2f9   : > { %v2787_v7 = vsel %vm2786_vm0, %v2346_v58, %v2519_v43 }
 0x2fa   : > { %2566 = vadd.xlane.f32.xlu0 %v2565_v39 }
 0x2fc   : > { %v2692_v21 = vpop.xlane.xlu0 %2691  ;;  %v2522_v59 = vpop.xlane.xlu1 %2521  ;;  %2569 = vadd.xlane.f32.xlu1 %v2568_v18 }
 0x2fd   : > { %v2820_v35 = vsel %vm2819_vm1, %v2787_v7, %v2692_v21 }
 0x2fe   : > { %v2859_v44 = vadd.f32 %v4283_v20, %v2820_v35  ;;  %2739 = vadd.xlane.f32.xlu0 %v2738_v38 }
 0x2ff   : > { %v2135_v2 = vpop.f32.mrb[36].mxu1 }
 0x300   : > { %2892 = vst.msk [vmem:[%s4291_s25] sm:$0xff] %vm2891_vm2, %v2859_v44  ;;  %v2349_v1 = vpop.xlane.xlu0 %2348  ;;  %v2136_v28 = vadd.f32 %v2135_v2, %v4092_v45  ;;  %v2695_v46 = vpop.xlane.xlu1 %2694  ;;  %2742 = vadd.xlane.f32.xlu1 %v2741_v23 }
 0x301   : > { %v2788_v33 = vsel %vm2786_vm0, %v2349_v1, %v2522_v59  ;;  %v2137_v49 = vpop.f32.mrb[37].mxu1 }
 0x302   : > { %v2240_v50 = vmax.f32 %v2136_v28, 0.0  ;;  %v2821_v42 = vsel %vm2819_vm1, %v2788_v33, %v2695_v46  ;;  %v2138_v11 = vadd.f32 %v2137_v49, %v4101_v51  ;;  %v2139_v24 = vpop.f32.mrb[38].mxu1 }
 0x303   : > { %v2860_v17 = vadd.f32 %v4283_v20, %v2821_v42  ;;  %v2140_v40 = vadd.f32 %v2139_v24, %v4092_v45  ;;  %v2141_v57 = vpop.f32.mrb[39].mxu1 }
 0x304   : > { %v2316_v25 = vmul.f32 %v4107_v37, %v2240_v50  ;;  %v2489_v3 = vmul.f32 %v4111_v4, %v2240_v50  ;;  %v2662_v48 = vmul.f32 %v4114_v5, %v2240_v50  ;;  %v2241_v0 = vmax.f32 %v2138_v11, 0.0  ;;  %v2352_v12 = vpop.xlane.xlu0 %2351  ;;  %v2355_v52 = vpop.xlane.xlu1 %2354 }
 0x305   : > { %2893 = vst.msk [vmem:[%s4291_s25 + $0x8] sm:$0xff] %vm2891_vm2, %v2860_v17  ;;  %v2242_v14 = vmax.f32 %v2140_v40, 0.0  ;;  %v2142_v19 = vadd.f32 %v2141_v57, %v4101_v51 }
 0x306   : > { %v2317_v9 = vmul.f32 %v4118_v47, %v2241_v0  ;;  %v2490_v26 = vmul.f32 %v4121_v53, %v2241_v0  ;;  %v2663_v13 = vmul.f32 %v4124_v8, %v2241_v0 }
 0x307   : > { %v2318_v60 = vmul.f32 %v4107_v37, %v2242_v14  ;;  %v2491_v62 = vmul.f32 %v4111_v4, %v2242_v14  ;;  %v2664_v27 = vmul.f32 %v4114_v5, %v2242_v14  ;;  %v2243_v10 = vmax.f32 %v2142_v19, 0.0 }
 0x308   : > { %v2525_v15 = vpop.xlane.xlu0 %2524  ;;  %v2528_v63 = vpop.xlane.xlu1 %2527  ;;  %v2398_v29 = vadd.f32 %v2317_v9, %v2316_v25  ;;  %v2571_v30 = vadd.f32 %v2490_v26, %v2489_v3  ;;  %v2744_v31 = vadd.f32 %v2663_v13, %v2662_v48 }
 0x309   : > { %v2319_v16 = vmul.f32 %v4118_v47, %v2243_v10  ;;  %v2492_v61 = vmul.f32 %v4121_v53, %v2243_v10  ;;  %v2665_v54 = vmul.f32 %v4124_v8, %v2243_v10  ;;  %v2789_v32 = vsel %vm2786_vm0, %v2352_v12, %v2525_v15 }
 0x30a   : > { %2399 = vadd.xlane.f32.xlu0 %v2398_v29  ;;  %v2790_v34 = vsel %vm2786_vm0, %v2355_v52, %v2528_v63 }
 0x30b   : > { %v2401_v55 = vadd.f32 %v2319_v16, %v2318_v60  ;;  %v2574_v22 = vadd.f32 %v2492_v61, %v2491_v62  ;;  %v2747_v6 = vadd.f32 %v2665_v54, %v2664_v27 }
 0x30c   : > { %v2698_v36 = vpop.xlane.xlu0 %2697  ;;  %v2701_v56 = vpop.xlane.xlu1 %2700 }
 0x30d   : > { %v2822_v39 = vsel %vm2819_vm1, %v2789_v32, %v2698_v36  ;;  %2402 = vadd.xlane.f32.xlu1 %v2401_v55  ;;  %v2823_v38 = vsel %vm2819_vm1, %v2790_v34, %v2701_v56 }
 0x30e   : > { %v2861_v41 = vadd.f32 %v4283_v20, %v2822_v39  ;;  %v2862_v18 = vadd.f32 %v4283_v20, %v2823_v38  ;;  %2572 = vadd.xlane.f32.xlu0 %v2571_v30 }
 0x310   : > { %2894 = vst.msk [vmem:[%s4291_s25 + $0x10] sm:$0xff] %vm2891_vm2, %v2861_v41  ;;  %2895 = vst.msk [vmem:[%s4291_s25 + $0x18] sm:$0xff] %vm2891_vm2, %v2862_v18 }
 0x311   : > { %2575 = vadd.xlane.f32.xlu1 %v2574_v22 }
 0x312   : > { %v2358_v23 = vpop.xlane.xlu0 %2357  ;;  %2745 = vadd.xlane.f32.xlu0 %v2744_v31  ;;  %v2145_v43 = vpop.f32.mrb[40].mxu1 }
 0x313   : > { %v2146_v58 = vadd.f32 %v2145_v43, %v4092_v45  ;;  %v2147_v7 = vpop.f32.mrb[41].mxu1  ;;  %v2361_v21 = vpop.xlane.xlu1 %2360 }
 0x314   : > { %v2148_v59 = vadd.f32 %v2147_v7, %v4101_v51  ;;  %v2149_v35 = vpop.f32.mrb[42].mxu1 }
 0x315   : > { %v2244_v44 = vmax.f32 %v2146_v58, 0.0  ;;  %2748 = vadd.xlane.f32.xlu1 %v2747_v6  ;;  %v2150_v2 = vadd.f32 %v2149_v35, %v4092_v45  ;;  %v2151_v1 = vpop.f32.mrb[43].mxu1 }
 0x316   : > { %v2245_v28 = vmax.f32 %v2148_v59, 0.0  ;;  %v2531_v46 = vpop.xlane.xlu0 %2530  ;;  %v2152_v33 = vadd.f32 %v2151_v1, %v4101_v51 }
 0x317   : > { %v2320_v49 = vmul.f32 %v4107_v37, %v2244_v44  ;;  %v2493_v50 = vmul.f32 %v4111_v4, %v2244_v44  ;;  %v2666_v42 = vmul.f32 %v4114_v5, %v2244_v44  ;;  %v2246_v11 = vmax.f32 %v2150_v2, 0.0  ;;  %v2534_v24 = vpop.xlane.xlu1 %2533 }
 0x318   : > { %v2321_v17 = vmul.f32 %v4118_v47, %v2245_v28  ;;  %v2494_v40 = vmul.f32 %v4121_v53, %v2245_v28  ;;  %v2667_v57 = vmul.f32 %v4124_v8, %v2245_v28  ;;  %v2791_v25 = vsel %vm2786_vm0, %v2358_v23, %v2531_v46 }
 0x319   : > { %v2322_v3 = vmul.f32 %v4107_v37, %v2246_v11  ;;  %v2495_v48 = vmul.f32 %v4111_v4, %v2246_v11  ;;  %v2668_v0 = vmul.f32 %v4114_v5, %v2246_v11  ;;  %v2247_v12 = vmax.f32 %v2152_v33, 0.0 }
 0x31a   : > { %v2792_v52 = vsel %vm2786_vm0, %v2361_v21, %v2534_v24  ;;  %v2704_v14 = vpop.xlane.xlu0 %2703  ;;  %v2404_v19 = vadd.f32 %v2321_v17, %v2320_v49  ;;  %v2577_v9 = vadd.f32 %v2494_v40, %v2493_v50  ;;  %v2750_v26 = vadd.f32 %v2667_v57, %v2666_v42 }
 0x31b   : > { %v2323_v13 = vmul.f32 %v4118_v47, %v2247_v12  ;;  %v2496_v60 = vmul.f32 %v4121_v53, %v2247_v12  ;;  %v2669_v62 = vmul.f32 %v4124_v8, %v2247_v12  ;;  %v2824_v27 = vsel %vm2819_vm1, %v2791_v25, %v2704_v14  ;;  %v2707_v10 = vpop.xlane.xlu1 %2706 }
 0x31c   : > { %v2863_v15 = vadd.f32 %v4283_v20, %v2824_v27  ;;  %v2825_v63 = vsel %vm2819_vm1, %v2792_v52, %v2707_v10  ;;  %2405 = vadd.xlane.f32.xlu0 %v2404_v19 }
 0x31d   : > { %v2864_v29 = vadd.f32 %v4283_v20, %v2825_v63  ;;  %v2407_v30 = vadd.f32 %v2323_v13, %v2322_v3  ;;  %v2580_v31 = vadd.f32 %v2496_v60, %v2495_v48  ;;  %v2753_v16 = vadd.f32 %v2669_v62, %v2668_v0 }
 0x31e   : > { %2896 = vst.msk [vmem:[%s4291_s25 + $0x20] sm:$0xff] %vm2891_vm2, %v2863_v15 }
 0x31f   : > { %2897 = vst.msk [vmem:[%s4291_s25 + $0x28] sm:$0xff] %vm2891_vm2, %v2864_v29  ;;  %2408 = vadd.xlane.f32.xlu1 %v2407_v30 }
 0x320   : > { %2578 = vadd.xlane.f32.xlu0 %v2577_v9 }
 0x323   : > { %2581 = vadd.xlane.f32.xlu1 %v2580_v31 }
 0x324   : > { %2751 = vadd.xlane.f32.xlu0 %v2750_v26 }
 0x325   : > { %v2364_v61 = vpop.xlane.xlu0 %2363  ;;  %v2155_v54 = vpop.f32.mrb[44].mxu1 }
 0x326   : > { %v2156_v55 = vadd.f32 %v2155_v54, %v4092_v45  ;;  %v2157_v22 = vpop.f32.mrb[45].mxu1  ;;  %v2367_v6 = vpop.xlane.xlu1 %2366 }
 0x327   : > { %v2158_v32 = vadd.f32 %v2157_v22, %v4101_v51  ;;  %2754 = vadd.xlane.f32.xlu1 %v2753_v16  ;;  %v2159_v34 = vpop.f32.mrb[46].mxu1 }
 0x328   : > { %v2248_v36 = vmax.f32 %v2156_v55, 0.0  ;;  %v2160_v56 = vadd.f32 %v2159_v34, %v4092_v45  ;;  %v2161_v39 = vpop.f32.mrb[47].mxu1 }
 0x329   : > { %v2249_v38 = vmax.f32 %v2158_v32, 0.0  ;;  %v2537_v41 = vpop.xlane.xlu0 %2536  ;;  %v2162_v18 = vadd.f32 %v2161_v39, %v4101_v51 }
 0x32a   : > { %v2324_v23 = vmul.f32 %v4107_v37, %v2248_v36  ;;  %v2497_v43 = vmul.f32 %v4111_v4, %v2248_v36  ;;  %v2670_v58 = vmul.f32 %v4114_v5, %v2248_v36  ;;  %v2250_v7 = vmax.f32 %v2160_v56, 0.0  ;;  %v2540_v21 = vpop.xlane.xlu1 %2539 }
 0x32b   : > { %v2325_v59 = vmul.f32 %v4118_v47, %v2249_v38  ;;  %v2498_v35 = vmul.f32 %v4121_v53, %v2249_v38  ;;  %v2671_v44 = vmul.f32 %v4124_v8, %v2249_v38  ;;  %v2793_v2 = vsel %vm2786_vm0, %v2364_v61, %v2537_v41 }
 0x32c   : > { %v2326_v1 = vmul.f32 %v4107_v37, %v2250_v7  ;;  %v2499_v28 = vmul.f32 %v4111_v4, %v2250_v7  ;;  %v2672_v46 = vmul.f32 %v4114_v5, %v2250_v7  ;;  %v2251_v33 = vmax.f32 %v2162_v18, 0.0 }
 0x32d   : > { %v2794_v49 = vsel %vm2786_vm0, %v2367_v6, %v2540_v21  ;;  %v2710_v50 = vpop.xlane.xlu0 %2709  ;;  %v2410_v42 = vadd.f32 %v2325_v59, %v2324_v23  ;;  %v2583_v11 = vadd.f32 %v2498_v35, %v2497_v43  ;;  %v2756_v24 = vadd.f32 %v2671_v44, %v2670_v58 }
 0x32e   : > { %v2327_v17 = vmul.f32 %v4118_v47, %v2251_v33  ;;  %v2500_v40 = vmul.f32 %v4121_v53, %v2251_v33  ;;  %v2673_v57 = vmul.f32 %v4124_v8, %v2251_v33  ;;  %v2826_v25 = vsel %vm2819_vm1, %v2793_v2, %v2710_v50  ;;  %v2713_v3 = vpop.xlane.xlu1 %2712 }
 0x32f   : > { %v2865_v48 = vadd.f32 %v4283_v20, %v2826_v25  ;;  %v2827_v0 = vsel %vm2819_vm1, %v2794_v49, %v2713_v3  ;;  %2411 = vadd.xlane.f32.xlu0 %v2410_v42 }
 0x330   : > { %v2866_v12 = vadd.f32 %v4283_v20, %v2827_v0  ;;  %v2413_v52 = vadd.f32 %v2327_v17, %v2326_v1  ;;  %v2586_v14 = vadd.f32 %v2500_v40, %v2499_v28  ;;  %v2759_v19 = vadd.f32 %v2673_v57, %v2672_v46 }
 0x331   : > { %2898 = vst.msk [vmem:[%s4291_s25 + $0x30] sm:$0xff] %vm2891_vm2, %v2865_v48 }
 0x332   : > { %2899 = vst.msk [vmem:[%s4291_s25 + $0x38] sm:$0xff] %vm2891_vm2, %v2866_v12  ;;  %2414 = vadd.xlane.f32.xlu1 %v2413_v52 }
 0x333   : > { %2584 = vadd.xlane.f32.xlu0 %v2583_v11 }
 0x336   : > { %2587 = vadd.xlane.f32.xlu1 %v2586_v14 }
 0x337   : > { %v2370_v9 = vpop.xlane.xlu0 %2369  ;;  %2757 = vadd.xlane.f32.xlu0 %v2756_v24 }
 0x338   : > { %v2165_v26 = vpop.f32.mrb[48].mxu1 }
 0x339   : > { %v2166_v13 = vadd.f32 %v2165_v26, %v4092_v45  ;;  %v2167_v60 = vpop.f32.mrb[49].mxu1  ;;  %v2373_v62 = vpop.xlane.xlu1 %2372 }
 0x33a   : > { %2760 = vadd.xlane.f32.xlu1 %v2759_v19  ;;  %v2168_v27 = vadd.f32 %v2167_v60, %v4101_v51  ;;  %v2169_v10 = vpop.f32.mrb[50].mxu1 }
 0x33b   : > { %v2252_v15 = vmax.f32 %v2166_v13, 0.0  ;;  %v2170_v63 = vadd.f32 %v2169_v10, %v4092_v45  ;;  %v2543_v29 = vpop.xlane.xlu0 %2542  ;;  %v2171_v30 = vpop.f32.mrb[51].mxu1 }
 0x33c   : > { %v2253_v31 = vmax.f32 %v2168_v27, 0.0  ;;  %v2795_v16 = vsel %vm2786_vm0, %v2370_v9, %v2543_v29  ;;  %v2172_v61 = vadd.f32 %v2171_v30, %v4101_v51 }
 0x33d   : > { %v2328_v54 = vmul.f32 %v4107_v37, %v2252_v15  ;;  %v2501_v55 = vmul.f32 %v4111_v4, %v2252_v15  ;;  %v2674_v22 = vmul.f32 %v4114_v5, %v2252_v15  ;;  %v2254_v6 = vmax.f32 %v2170_v63, 0.0  ;;  %v2546_v32 = vpop.xlane.xlu1 %2545 }
 0x33e   : > { %v2329_v34 = vmul.f32 %v4118_v47, %v2253_v31  ;;  %v2502_v36 = vmul.f32 %v4121_v53, %v2253_v31  ;;  %v2675_v56 = vmul.f32 %v4124_v8, %v2253_v31  ;;  %v2255_v39 = vmax.f32 %v2172_v61, 0.0 }
 0x33f   : > { %v2330_v38 = vmul.f32 %v4107_v37, %v2254_v6  ;;  %v2503_v41 = vmul.f32 %v4111_v4, %v2254_v6  ;;  %v2676_v18 = vmul.f32 %v4114_v5, %v2254_v6  ;;  %v2796_v23 = vsel %vm2786_vm0, %v2373_v62, %v2546_v32  ;;  %v2716_v43 = vpop.xlane.xlu0 %2715 }
 0x340   : > { %v2331_v58 = vmul.f32 %v4118_v47, %v2255_v39  ;;  %v2504_v7 = vmul.f32 %v4121_v53, %v2255_v39  ;;  %v2677_v21 = vmul.f32 %v4124_v8, %v2255_v39  ;;  %v2828_v59 = vsel %vm2819_vm1, %v2795_v16, %v2716_v43 }
 0x341   : > { %v2867_v35 = vadd.f32 %v4283_v20, %v2828_v59  ;;  %v2719_v44 = vpop.xlane.xlu1 %2718  ;;  %v2416_v2 = vadd.f32 %v2329_v34, %v2328_v54  ;;  %v2589_v1 = vadd.f32 %v2502_v36, %v2501_v55  ;;  %v2762_v28 = vadd.f32 %v2675_v56, %v2674_v22 }
 0x342   : > { %v2829_v46 = vsel %vm2819_vm1, %v2796_v23, %v2719_v44  ;;  %v2419_v33 = vadd.f32 %v2331_v58, %v2330_v38  ;;  %v2592_v49 = vadd.f32 %v2504_v7, %v2503_v41  ;;  %v2765_v50 = vadd.f32 %v2677_v21, %v2676_v18 }
 0x343   : > { %2900 = vst.msk [vmem:[%s4291_s25 + $0x40] sm:$0xff] %vm2891_vm2, %v2867_v35  ;;  %v2868_v42 = vadd.f32 %v4283_v20, %v2829_v46  ;;  %2417 = vadd.xlane.f32.xlu0 %v2416_v2 }
 0x344   : > { %2420 = vadd.xlane.f32.xlu1 %v2419_v33 }
 0x345   : > { %2901 = vst.msk [vmem:[%s4291_s25 + $0x48] sm:$0xff] %vm2891_vm2, %v2868_v42 }
 0x347   : > { %2590 = vadd.xlane.f32.xlu0 %v2589_v1 }
 0x348   : > { %2593 = vadd.xlane.f32.xlu1 %v2592_v49 }
 0x34a   : > { %v2376_v11 = vpop.xlane.xlu0 %2375 }
 0x34b   : > { %2763 = vadd.xlane.f32.xlu0 %v2762_v28 }
 0x34c   : > { %v2175_v24 = vpop.f32.mrb[52].mxu1  ;;  %2766 = vadd.xlane.f32.xlu1 %v2765_v50  ;;  %v2379_v17 = vpop.xlane.xlu1 %2378 }
 0x34d   : > { %v2176_v40 = vadd.f32 %v2175_v24, %v4092_v45  ;;  %v2177_v57 = vpop.f32.mrb[53].mxu1 }
 0x34e   : > { %v2178_v25 = vadd.f32 %v2177_v57, %v4101_v51  ;;  %v2179_v3 = vpop.f32.mrb[54].mxu1  ;;  %v2549_v48 = vpop.xlane.xlu0 %2548 }
 0x34f   : > { %v2256_v0 = vmax.f32 %v2176_v40, 0.0  ;;  %v2180_v12 = vadd.f32 %v2179_v3, %v4092_v45  ;;  %v2181_v52 = vpop.f32.mrb[55].mxu1  ;;  %v2797_v19 = vsel %vm2786_vm0, %v2376_v11, %v2549_v48 }
 0x350   : > { %v2257_v14 = vmax.f32 %v2178_v25, 0.0  ;;  %v2182_v9 = vadd.f32 %v2181_v52, %v4101_v51  ;;  %v2552_v26 = vpop.xlane.xlu1 %2551 }
 0x351   : > { %v2332_v13 = vmul.f32 %v4107_v37, %v2256_v0  ;;  %v2505_v60 = vmul.f32 %v4111_v4, %v2256_v0  ;;  %v2678_v62 = vmul.f32 %v4114_v5, %v2256_v0  ;;  %v2258_v27 = vmax.f32 %v2180_v12, 0.0 }
 0x352   : > { %v2333_v10 = vmul.f32 %v4118_v47, %v2257_v14  ;;  %v2506_v15 = vmul.f32 %v4121_v53, %v2257_v14  ;;  %v2679_v63 = vmul.f32 %v4124_v8, %v2257_v14  ;;  %v2259_v29 = vmax.f32 %v2182_v9, 0.0  ;;  %v2722_v30 = vpop.xlane.xlu0 %2721 }
 0x353   : > { %v2334_v31 = vmul.f32 %v4107_v37, %v2258_v27  ;;  %v2507_v16 = vmul.f32 %v4111_v4, %v2258_v27  ;;  %v2680_v61 = vmul.f32 %v4114_v5, %v2258_v27  ;;  %v2798_v54 = vsel %vm2786_vm0, %v2379_v17, %v2552_v26 }
 0x354   : > { %v2335_v55 = vmul.f32 %v4118_v47, %v2259_v29  ;;  %v2508_v22 = vmul.f32 %v4121_v53, %v2259_v29  ;;  %v2681_v6 = vmul.f32 %v4124_v8, %v2259_v29  ;;  %v2830_v32 = vsel %vm2819_vm1, %v2797_v19, %v2722_v30  ;;  %v2725_v34 = vpop.xlane.xlu1 %2724 }
 0x355   : > { %v2869_v36 = vadd.f32 %v4283_v20, %v2830_v32  ;;  %v2831_v56 = vsel %vm2819_vm1, %v2798_v54, %v2725_v34  ;;  %v2422_v39 = vadd.f32 %v2333_v10, %v2332_v13  ;;  %v2595_v38 = vadd.f32 %v2506_v15, %v2505_v60 }
 0x356   : > { %v2870_v41 = vadd.f32 %v4283_v20, %v2831_v56  ;;  %v2425_v18 = vadd.f32 %v2335_v55, %v2334_v31  ;;  %v2598_v23 = vadd.f32 %v2508_v22, %v2507_v16  ;;  %v2768_v43 = vadd.f32 %v2679_v63, %v2678_v62 }
 0x357   : > { %2902 = vst.msk [vmem:[%s4291_s25 + $0x50] sm:$0xff] %vm2891_vm2, %v2869_v36  ;;  %2423 = vadd.xlane.f32.xlu0 %v2422_v39  ;;  %v2771_v58 = vadd.f32 %v2681_v6, %v2680_v61 }
 0x358   : > { %2903 = vst.msk [vmem:[%s4291_s25 + $0x58] sm:$0xff] %vm2891_vm2, %v2870_v41  ;;  %2426 = vadd.xlane.f32.xlu1 %v2425_v18 }
 0x35b   : > { %2596 = vadd.xlane.f32.xlu0 %v2595_v38 }
 0x35c   : > { %2599 = vadd.xlane.f32.xlu1 %v2598_v23 }
 0x35d   : > { %v2382_v7 = vpop.xlane.xlu0 %2381 }
 0x35e   : > { %v2185_v21 = vpop.f32.mrb[56].mxu1 }
 0x35f   : > { %2769 = vadd.xlane.f32.xlu0 %v2768_v43  ;;  %v2186_v59 = vadd.f32 %v2185_v21, %v4092_v45  ;;  %v2187_v35 = vpop.f32.mrb[57].mxu1  ;;  %v2385_v44 = vpop.xlane.xlu1 %2384 }
 0x360   : > { %2772 = vadd.xlane.f32.xlu1 %v2771_v58  ;;  %v2188_v2 = vadd.f32 %v2187_v35, %v4101_v51  ;;  %v2189_v1 = vpop.f32.mrb[58].mxu1 }
 0x361   : > { %v2260_v28 = vmax.f32 %v2186_v59, 0.0  ;;  %v2190_v46 = vadd.f32 %v2189_v1, %v4092_v45  ;;  %v2555_v33 = vpop.xlane.xlu0 %2554  ;;  %v2191_v49 = vpop.f32.mrb[59].mxu1 }
 0x362   : > { %v2261_v50 = vmax.f32 %v2188_v2, 0.0  ;;  %v2799_v42 = vsel %vm2786_vm0, %v2382_v7, %v2555_v33  ;;  %v2192_v11 = vadd.f32 %v2191_v49, %v4101_v51 }
 0x363   : > { %v2336_v24 = vmul.f32 %v4107_v37, %v2260_v28  ;;  %v2509_v17 = vmul.f32 %v4111_v4, %v2260_v28  ;;  %v2682_v40 = vmul.f32 %v4114_v5, %v2260_v28  ;;  %v2262_v57 = vmax.f32 %v2190_v46, 0.0  ;;  %v2558_v25 = vpop.xlane.xlu1 %2557 }
 0x364   : > { %v2337_v3 = vmul.f32 %v4118_v47, %v2261_v50  ;;  %v2510_v48 = vmul.f32 %v4121_v53, %v2261_v50  ;;  %v2683_v0 = vmul.f32 %v4124_v8, %v2261_v50  ;;  %v2263_v12 = vmax.f32 %v2192_v11, 0.0 }
 0x365   : > { %v2338_v52 = vmul.f32 %v4107_v37, %v2262_v57  ;;  %v2511_v14 = vmul.f32 %v4111_v4, %v2262_v57  ;;  %v2684_v19 = vmul.f32 %v4114_v5, %v2262_v57  ;;  %v2800_v9 = vsel %vm2786_vm0, %v2385_v44, %v2558_v25  ;;  %v2728_v26 = vpop.xlane.xlu0 %2727 }
 0x366   : > { %v2339_v13 = vmul.f32 %v4118_v47, %v2263_v12  ;;  %v2512_v60 = vmul.f32 %v4121_v53, %v2263_v12  ;;  %v2685_v62 = vmul.f32 %v4124_v8, %v2263_v12  ;;  %v2832_v27 = vsel %vm2819_vm1, %v2799_v42, %v2728_v26 }
 0x367   : > { %v2871_v10 = vadd.f32 %v4283_v20, %v2832_v27  ;;  %v2731_v15 = vpop.xlane.xlu1 %2730  ;;  %v2428_v63 = vadd.f32 %v2337_v3, %v2336_v24  ;;  %v2601_v29 = vadd.f32 %v2510_v48, %v2509_v17  ;;  %v2774_v30 = vadd.f32 %v2683_v0, %v2682_v40 }
 0x368   : > { %v2833_v31 = vsel %vm2819_vm1, %v2800_v9, %v2731_v15  ;;  %v2431_v16 = vadd.f32 %v2339_v13, %v2338_v52  ;;  %v2604_v61 = vadd.f32 %v2512_v60, %v2511_v14  ;;  %v2777_v54 = vadd.f32 %v2685_v62, %v2684_v19 }
 0x369   : > { %2904 = vst.msk [vmem:[%s4291_s25 + $0x60] sm:$0xff] %vm2891_vm2, %v2871_v10  ;;  %v2872_v55 = vadd.f32 %v4283_v20, %v2833_v31  ;;  %2429 = vadd.xlane.f32.xlu0 %v2428_v63 }
 0x36a   : > { %2432 = vadd.xlane.f32.xlu1 %v2431_v16 }
 0x36b   : > { %2905 = vst.msk [vmem:[%s4291_s25 + $0x68] sm:$0xff] %vm2891_vm2, %v2872_v55 }
 0x36d   : > { %2602 = vadd.xlane.f32.xlu0 %v2601_v29 }
 0x36e   : > { %2605 = vadd.xlane.f32.xlu1 %v2604_v61 }
 0x370   : > { %v2388_v22 = vpop.xlane.xlu0 %2387 }
 0x371   : > { %2775 = vadd.xlane.f32.xlu0 %v2774_v30  ;;  %v2195_v6 = vpop.f32.mrb[60].mxu1 }
 0x372   : > { %v2196_v32 = vadd.f32 %v2195_v6, %v4092_v45  ;;  %2778 = vadd.xlane.f32.xlu1 %v2777_v54  ;;  %v2197_v34 = vpop.f32.mrb[61].mxu1  ;;  %v2391_v36 = vpop.xlane.xlu1 %2390 }
 0x373   : > { %v2198_v56 = vadd.f32 %v2197_v34, %v4101_v51  ;;  %v2199_v39 = vpop.f32.mrb[62].mxu1 }
 0x374   : > { %v2264_v38 = vmax.f32 %v2196_v32, 0.0  ;;  %v2200_v41 = vadd.f32 %v2199_v39, %v4092_v45  ;;  %v2561_v18 = vpop.xlane.xlu0 %2560  ;;  %v2201_v23 = vpop.f32.mrb[63].mxu1 }
 0x375   : > { %v2265_v43 = vmax.f32 %v2198_v56, 0.0  ;;  %v2801_v58 = vsel %vm2786_vm0, %v2388_v22, %v2561_v18  ;;  %v2202_v7 = vadd.f32 %v2201_v23, %v4101_v51 }
 0x376   : > { %v2340_v21 = vmul.f32 %v4107_v37, %v2264_v38  ;;  %v2513_v59 = vmul.f32 %v4111_v4, %v2264_v38  ;;  %v2686_v35 = vmul.f32 %v4114_v5, %v2264_v38  ;;  %v2266_v44 = vmax.f32 %v2200_v41, 0.0  ;;  %v2564_v2 = vpop.xlane.xlu1 %2563 }
 0x377   : > { %v2341_v1 = vmul.f32 %v4118_v47, %v2265_v43  ;;  %v2514_v28 = vmul.f32 %v4121_v53, %v2265_v43  ;;  %v2687_v45 = vmul.f32 %v4124_v8, %v2265_v43  ;;  %v2267_v46 = vmax.f32 %v2202_v7, 0.0 }
 0x378   : > { %v2342_v33 = vmul.f32 %v4107_v37, %v2266_v44  ;;  %v2515_v49 = vmul.f32 %v4111_v4, %v2266_v44  ;;  %v2688_v51 = vmul.f32 %v4114_v5, %v2266_v44  ;;  %v2802_v50 = vsel %vm2786_vm0, %v2391_v36, %v2564_v2  ;;  %v2734_v42 = vpop.xlane.xlu0 %2733 }
 0x379   : > { %v2343_v11 = vmul.f32 %v4118_v47, %v2267_v46  ;;  %v2516_v24 = vmul.f32 %v4121_v53, %v2267_v46  ;;  %v2689_v17 = vmul.f32 %v4124_v8, %v2267_v46  ;;  %v2834_v40 = vsel %vm2819_vm1, %v2801_v58, %v2734_v42 }
 0x37a   : > { %v2873_v57 = vadd.f32 %v4283_v20, %v2834_v40  ;;  %v2737_v37 = vpop.xlane.xlu1 %2736  ;;  %v2434_v25 = vadd.f32 %v2341_v1, %v2340_v21  ;;  %v2607_v4 = vadd.f32 %v2514_v28, %v2513_v59  ;;  %v2780_v3 = vadd.f32 %v2687_v45, %v2686_v35 }
 0x37b   : > { %v2835_v5 = vsel %vm2819_vm1, %v2802_v50, %v2737_v37  ;;  %v2437_v48 = vadd.f32 %v2343_v11, %v2342_v33  ;;  %v2610_v0 = vadd.f32 %v2516_v24, %v2515_v49  ;;  %v2783_v12 = vadd.f32 %v2689_v17, %v2688_v51 }
 0x37c   : > { %2906 = vst.msk [vmem:[%s4291_s25 + $0x70] sm:$0xff] %vm2891_vm2, %v2873_v57  ;;  %v2874_v47 = vadd.f32 %v4283_v20, %v2835_v5  ;;  %2435 = vadd.xlane.f32.xlu0 %v2434_v25 }
 0x37d   : > { %2438 = vadd.xlane.f32.xlu1 %v2437_v48 }
 0x37e   : > { %2907 = vst.msk [vmem:[%s4291_s25 + $0x78] sm:$0xff] %vm2891_vm2, %v2874_v47 }
 0x380   : > { %2608 = vadd.xlane.f32.xlu0 %v2607_v4 }
 0x381   : > { %2611 = vadd.xlane.f32.xlu1 %v2610_v0 }
 0x383   : > { %v2394_v53 = vpop.xlane.xlu0 %2393 }
 0x384   : > { %2781 = vadd.xlane.f32.xlu0 %v2780_v3 }
 0x385   : > { %2784 = vadd.xlane.f32.xlu1 %v2783_v12  ;;  %v2397_v8 = vpop.xlane.xlu1 %2396 }
 0x387   : > { %v2567_v52 = vpop.xlane.xlu0 %2566 }
 0x388   : > { %v2803_v19 = vsel %vm2786_vm0, %v2394_v53, %v2567_v52 }
 0x389   : > { %v2570_v14 = vpop.xlane.xlu1 %2569 }
 0x38a   : > { %v2804_v13 = vsel %vm2786_vm0, %v2397_v8, %v2570_v14 }
 0x38b   : > { %v2740_v9 = vpop.xlane.xlu0 %2739 }
 0x38c   : > { %v2836_v26 = vsel %vm2819_vm1, %v2803_v19, %v2740_v9 }
 0x38d   : > { %v2875_v60 = vadd.f32 %v4283_v20, %v2836_v26  ;;  %v2743_v62 = vpop.xlane.xlu1 %2742 }
 0x38e   : > { %v2837_v27 = vsel %vm2819_vm1, %v2804_v13, %v2743_v62 }
 0x38f   : > { %2908 = vst.msk [vmem:[%s4291_s25 + $0x80] sm:$0xff] %vm2891_vm2, %v2875_v60  ;;  %v2876_v10 = vadd.f32 %v4283_v20, %v2837_v27 }
 0x391   : > { %2909 = vst.msk [vmem:[%s4291_s25 + $0x88] sm:$0xff] %vm2891_vm2, %v2876_v10 }
 0x397   : > { %v2400_v15 = vpop.xlane.xlu0 %2399 }
 0x39a   : > { %v2403_v63 = vpop.xlane.xlu1 %2402 }
 0x39b   : > { %v2573_v29 = vpop.xlane.xlu0 %2572 }
 0x39c   : > { %v2805_v31 = vsel %vm2786_vm0, %v2400_v15, %v2573_v29 }
 0x39e   : > { %v2576_v30 = vpop.xlane.xlu1 %2575 }
 0x39f   : > { %v2746_v16 = vpop.xlane.xlu0 %2745  ;;  %v2806_v55 = vsel %vm2786_vm0, %v2403_v63, %v2576_v30 }
 0x3a0   : > { %v2838_v61 = vsel %vm2819_vm1, %v2805_v31, %v2746_v16 }
 0x3a1   : > { %v2877_v54 = vadd.f32 %v4283_v20, %v2838_v61 }
 0x3a2   : > { %v2749_v22 = vpop.xlane.xlu1 %2748 }
 0x3a3   : > { %2910 = vst.msk [vmem:[%s4291_s25 + $0x90] sm:$0xff] %vm2891_vm2, %v2877_v54  ;;  %v2839_v6 = vsel %vm2819_vm1, %v2806_v55, %v2749_v22 }
 0x3a4   : > { %v2878_v32 = vadd.f32 %v4283_v20, %v2839_v6 }
 0x3a6   : > { %2911 = vst.msk [vmem:[%s4291_s25 + $0x98] sm:$0xff] %vm2891_vm2, %v2878_v32 }
 0x3a9   : > { %v2406_v34 = vpop.xlane.xlu0 %2405 }
 0x3ac   : > { %v2409_v36 = vpop.xlane.xlu1 %2408 }
 0x3ad   : > { %v2579_v56 = vpop.xlane.xlu0 %2578 }
 0x3ae   : > { %v2807_v38 = vsel %vm2786_vm0, %v2406_v34, %v2579_v56 }
 0x3b0   : > { %v2582_v39 = vpop.xlane.xlu1 %2581 }
 0x3b1   : > { %v2752_v41 = vpop.xlane.xlu0 %2751  ;;  %v2808_v43 = vsel %vm2786_vm0, %v2409_v36, %v2582_v39 }
 0x3b2   : > { %v2840_v18 = vsel %vm2819_vm1, %v2807_v38, %v2752_v41 }
 0x3b3   : > { %v2879_v23 = vadd.f32 %v4283_v20, %v2840_v18 }
 0x3b4   : > { %v2755_v58 = vpop.xlane.xlu1 %2754 }
 0x3b5   : > { %2912 = vst.msk [vmem:[%s4291_s25 + $0xa0] sm:$0xff] %vm2891_vm2, %v2879_v23  ;;  %v2841_v7 = vsel %vm2819_vm1, %v2808_v43, %v2755_v58 }
 0x3b6   : > { %v2880_v21 = vadd.f32 %v4283_v20, %v2841_v7 }
 0x3b8   : > { %2913 = vst.msk [vmem:[%s4291_s25 + $0xa8] sm:$0xff] %vm2891_vm2, %v2880_v21 }
 0x3bc   : > { %v2412_v59 = vpop.xlane.xlu0 %2411 }
 0x3bf   : > { %v2415_v35 = vpop.xlane.xlu1 %2414 }
 0x3c0   : > { %v2585_v44 = vpop.xlane.xlu0 %2584 }
 0x3c1   : > { %v2809_v1 = vsel %vm2786_vm0, %v2412_v59, %v2585_v44 }
 0x3c3   : > { %v2588_v2 = vpop.xlane.xlu1 %2587 }
 0x3c4   : > { %v2758_v28 = vpop.xlane.xlu0 %2757  ;;  %v2810_v33 = vsel %vm2786_vm0, %v2415_v35, %v2588_v2 }
 0x3c5   : > { %v2842_v45 = vsel %vm2819_vm1, %v2809_v1, %v2758_v28 }
 0x3c6   : > { %v2881_v46 = vadd.f32 %v4283_v20, %v2842_v45 }
 0x3c7   : > { %v2761_v49 = vpop.xlane.xlu1 %2760 }
 0x3c8   : > { %2914 = vst.msk [vmem:[%s4291_s25 + $0xb0] sm:$0xff] %vm2891_vm2, %v2881_v46  ;;  %v2843_v51 = vsel %vm2819_vm1, %v2810_v33, %v2761_v49 }
 0x3c9   : > { %v2882_v50 = vadd.f32 %v4283_v20, %v2843_v51 }
 0x3cb   : > { %2915 = vst.msk [vmem:[%s4291_s25 + $0xb8] sm:$0xff] %vm2891_vm2, %v2882_v50 }
 0x3d0   : > { %v2418_v42 = vpop.xlane.xlu0 %2417 }
 0x3d1   : > { %v2421_v11 = vpop.xlane.xlu1 %2420 }
 0x3d4   : > { %v2591_v24 = vpop.xlane.xlu0 %2590 }
 0x3d5   : > { %v2594_v17 = vpop.xlane.xlu1 %2593  ;;  %v2811_v40 = vsel %vm2786_vm0, %v2418_v42, %v2591_v24 }
 0x3d6   : > { %v2812_v37 = vsel %vm2786_vm0, %v2421_v11, %v2594_v17 }
 0x3d8   : > { %v2764_v57 = vpop.xlane.xlu0 %2763 }
 0x3d9   : > { %v2844_v25 = vsel %vm2819_vm1, %v2811_v40, %v2764_v57  ;;  %v2767_v4 = vpop.xlane.xlu1 %2766 }
 0x3da   : > { %v2883_v3 = vadd.f32 %v4283_v20, %v2844_v25  ;;  %v2845_v5 = vsel %vm2819_vm1, %v2812_v37, %v2767_v4 }
 0x3db   : > { %v2884_v48 = vadd.f32 %v4283_v20, %v2845_v5 }
 0x3dc   : > { %2916 = vst.msk [vmem:[%s4291_s25 + $0xc0] sm:$0xff] %vm2891_vm2, %v2883_v3 }
 0x3dd   : > { %2917 = vst.msk [vmem:[%s4291_s25 + $0xc8] sm:$0xff] %vm2891_vm2, %v2884_v48 }
 0x3e4   : > { %v2424_v0 = vpop.xlane.xlu0 %2423 }
 0x3e5   : > { %v2427_v12 = vpop.xlane.xlu1 %2426 }
 0x3e8   : > { %v2597_v47 = vpop.xlane.xlu0 %2596 }
 0x3e9   : > { %v2600_v53 = vpop.xlane.xlu1 %2599  ;;  %v2813_v8 = vsel %vm2786_vm0, %v2424_v0, %v2597_v47 }
 0x3ea   : > { %v2814_v14 = vsel %vm2786_vm0, %v2427_v12, %v2600_v53 }
 0x3ec   : > { %v2770_v52 = vpop.xlane.xlu0 %2769 }
 0x3ed   : > { %v2846_v19 = vsel %vm2819_vm1, %v2813_v8, %v2770_v52  ;;  %v2773_v9 = vpop.xlane.xlu1 %2772 }
 0x3ee   : > { %v2885_v26 = vadd.f32 %v4283_v20, %v2846_v19  ;;  %v2847_v13 = vsel %vm2819_vm1, %v2814_v14, %v2773_v9 }
 0x3ef   : > { %v2886_v60 = vadd.f32 %v4283_v20, %v2847_v13 }
 0x3f0   : > { %2918 = vst.msk [vmem:[%s4291_s25 + $0xd0] sm:$0xff] %vm2891_vm2, %v2885_v26 }
 0x3f1   : > { %2919 = vst.msk [vmem:[%s4291_s25 + $0xd8] sm:$0xff] %vm2891_vm2, %v2886_v60 }
 0x3f6   : > { %v2430_v62 = vpop.xlane.xlu0 %2429 }
 0x3f7   : > { %v2433_v27 = vpop.xlane.xlu1 %2432 }
 0x3fa   : > { %v2603_v10 = vpop.xlane.xlu0 %2602 }
 0x3fb   : > { %v2606_v15 = vpop.xlane.xlu1 %2605  ;;  %v2815_v63 = vsel %vm2786_vm0, %v2430_v62, %v2603_v10 }
 0x3fc   : > { %v2816_v30 = vsel %vm2786_vm0, %v2433_v27, %v2606_v15 }
 0x3fe   : > { %v2776_v29 = vpop.xlane.xlu0 %2775 }
 0x3ff   : > { %v2848_v31 = vsel %vm2819_vm1, %v2815_v63, %v2776_v29  ;;  %v2779_v16 = vpop.xlane.xlu1 %2778 }
 0x400   : > { %v2887_v61 = vadd.f32 %v4283_v20, %v2848_v31  ;;  %v2849_v54 = vsel %vm2819_vm1, %v2816_v30, %v2779_v16 }
 0x401   : > { %v2888_v55 = vadd.f32 %v4283_v20, %v2849_v54 }
 0x402   : > { %2920 = vst.msk [vmem:[%s4291_s25 + $0xe0] sm:$0xff] %vm2891_vm2, %v2887_v61 }
 0x403   : > { %2921 = vst.msk [vmem:[%s4291_s25 + $0xe8] sm:$0xff] %vm2891_vm2, %v2888_v55 }
 0x409   : > { %v2436_v22 = vpop.xlane.xlu0 %2435 }
 0x40a   : > { %v2439_v6 = vpop.xlane.xlu1 %2438 }
 0x40d   : > { %v2609_v32 = vpop.xlane.xlu0 %2608 }
 0x40e   : > { %v2612_v34 = vpop.xlane.xlu1 %2611  ;;  %v2817_v36 = vsel %vm2786_vm0, %v2436_v22, %v2609_v32 }
 0x40f   : > { %v2818_v39 = vsel %vm2786_vm0, %v2439_v6, %v2612_v34 }
 0x411   : > { %v2782_v56 = vpop.xlane.xlu0 %2781 }
 0x412   : > { %v2850_v38 = vsel %vm2819_vm1, %v2817_v36, %v2782_v56  ;;  %v2785_v41 = vpop.xlane.xlu1 %2784 }
 0x413   : > { %v2889_v18 = vadd.f32 %v4283_v20, %v2850_v38  ;;  %v2851_v23 = vsel %vm2819_vm1, %v2818_v39, %v2785_v41 }
 0x414   : > { %v2890_v43 = vadd.f32 %v4283_v20, %v2851_v23 }
 0x415   : > { %2922 = vst.msk [vmem:[%s4291_s25 + $0xf0] sm:$0xff] %vm2891_vm2, %v2889_v18 }
 0x416   : > { %2923 = vst.msk [vmem:[%s4291_s25 + $0xf8] sm:$0xff] %vm2891_vm2, %v2890_v43 }
 0x417 PF: > { %s19_s30 = sadd.s32 1, %s3227_s30  }
 0x418   : > { %p16_p4 = scmp.ge.s32.totalorder %s19_s30, 4  }
 0x41a   :  { %18 = sbr.rel (!%p16_p4) target bundleno = 1 (0x1), region = 90 }

</bundles_post_ra>
